<compile_context>
chip_gen: v5e
topology: v5e:2x2
jax: 0.10.0
libtpu: 0.0.40
codegen_flags: <defaults>
</compile_context>

<pallas_src>
import functools
import math

import jax
import jax.numpy as jnp
from jax.experimental import pallas as pl
from jax.experimental.pallas import tpu as pltpu

VMEM_LIMIT = 48 * 1024 * 1024

# ----------------------------------------------------------------------------
# Fixed filter coefficients (sobel + gaussian, identical to the PyTorch init)
# ----------------------------------------------------------------------------
SOBEL_X = ((-1.0, 0.0, 1.0), (-2.0, 0.0, 2.0), (-1.0, 0.0, 1.0))
SOBEL_Y = ((-1.0, -2.0, -1.0), (0.0, 0.0, 0.0), (1.0, 2.0, 1.0))


def _gaussian_kernel2(kernel_size=3, sigma=1.0):
    r = kernel_size // 2
    k = [[0.0] * kernel_size for _ in range(kernel_size)]
    s = 0.0
    for y in range(-r, r + 1):
        for x in range(-r, r + 1):
            v = 1.0 / (2.0 * math.pi * sigma ** 2) * math.exp(
                -1.0 / (2.0 * sigma ** 2) * (x * x + y * y))
            k[y + r][x + r] = v
            s += v
    return [[v / s for v in row] for row in k]


GAUSS = _gaussian_kernel2()


# ----------------------------------------------------------------------------
# Pallas kernel 1: filterHL  (sobel edges, edge weighting, depthwise gaussian)
# ----------------------------------------------------------------------------
# TODO(synk): for very large H,W this full-spatial block should be H-tiled via
# the grid (VMEM pressure, esp. v7x 64 MiB); fine at the sizes exercised here.
def filter_hl_kernel(xp_ref, we_ref, bl_ref):
    xp = xp_ref[0]                                 # (4, H+2, W+2) f32
    H, W = we_ref.shape[2], we_ref.shape[3]
    ex = jnp.zeros((H, W), jnp.float32)
    ey = jnp.zeros((H, W), jnp.float32)
    bl = jnp.zeros((3, H, W), jnp.float32)
    for dy in range(3):
        for dx in range(3):
            win = xp[:, dy:dy + H, dx:dx + W]      # (4, H, W)
            L = win[3]
            cx, cy, cg = SOBEL_X[dy][dx], SOBEL_Y[dy][dx], GAUSS[dy][dx]
            if cx != 0.0:
                ex = ex + cx * L
            if cy != 0.0:
                ey = ey + cy * L
            bl = bl + cg * win[0:3]
    edge = jnp.sqrt(ex * ex + ey * ey)
    rgb_c = xp[0:3, 1:1 + H, 1:1 + W]              # unpadded RGB
    we_ref[0] = rgb_c * (1.0 + edge)[None, :, :]
    bl_ref[0] = bl


def filter_hl(x):
    """x: (N, 4, H, W) -> (weight_edge (N,3,H,W), blur (N,3,H,W)) f32 NCHW."""
    N, C, H, W = x.shape
    assert C == 4
    xp = jnp.pad(x, ((0, 0), (0, 0), (1, 1), (1, 1)))
    return pl.pallas_call(
        filter_hl_kernel,
        out_shape=(jax.ShapeDtypeStruct((N, 3, H, W), jnp.float32),
                   jax.ShapeDtypeStruct((N, 3, H, W), jnp.float32)),
        grid=(N,),
        in_specs=[pl.BlockSpec((1, 4, H + 2, W + 2), lambda b: (b, 0, 0, 0))],
        out_specs=(pl.BlockSpec((1, 3, H, W), lambda b: (b, 0, 0, 0)),
                   pl.BlockSpec((1, 3, H, W), lambda b: (b, 0, 0, 0))),
        compiler_params=pltpu.CompilerParams(
            dimension_semantics=("parallel",)),
    )(xp)


# ----------------------------------------------------------------------------
# Pallas kernel 2: M-tiled bf16 matmul + folded BN + ReLU  (7x7 stem conv)
# ----------------------------------------------------------------------------
def matmul_bn_relu_kernel(p_ref, w_ref, s_ref, b_ref, o_ref):
    acc = jnp.dot(p_ref[...], w_ref[...], preferred_element_type=jnp.float32)
    out = jnp.maximum(acc * s_ref[...] + b_ref[...], 0.0)
    o_ref[...] = out.astype(o_ref.dtype)


def matmul_bn_relu(patches, w_mat, scale, bias, tm=512):
    """patches (M,K) bf16, w_mat (K,N) bf16 -> (M,N) f32, BN+ReLU fused."""
    M, K = patches.shape
    N = w_mat.shape[1]
    tm = min(tm, M)
    return pl.pallas_call(
        matmul_bn_relu_kernel,
        out_shape=jax.ShapeDtypeStruct((M, N), jnp.float32),
        grid=(pl.cdiv(M, tm),),
        in_specs=[pl.BlockSpec((tm, K), lambda i: (i, 0)),
                  pl.BlockSpec((K, N), lambda i: (0, 0)),
                  pl.BlockSpec((1, N), lambda i: (0, 0)),
                  pl.BlockSpec((1, N), lambda i: (0, 0))],
        out_specs=pl.BlockSpec((tm, N), lambda i: (i, 0)),
        compiler_params=pltpu.CompilerParams(
            dimension_semantics=("parallel",),
            vmem_limit_bytes=VMEM_LIMIT),
    )(patches, w_mat, scale, bias)


def im2col(x, kh, kw, stride, pad):
    """x: (N, C, H, W) -> patches (N*Ho*Wo, C*kh*kw), C-major then (i,j)."""
    N, C, H, W = x.shape
    xp = jnp.pad(x, ((0, 0), (0, 0), (pad, pad), (pad, pad)))
    Hp, Wp = H + 2 * pad, W + 2 * pad
    Ho = (Hp - kh) // stride + 1
    Wo = (Wp - kw) // stride + 1
    cols = []
    for i in range(kh):
        for j in range(kw):
            cols.append(xp[:, :,
                           i:i + stride * (Ho - 1) + 1:stride,
                           j:j + stride * (Wo - 1) + 1:stride])
    patches = jnp.stack(cols, axis=2)                 # (N, C, kh*kw, Ho, Wo)
    patches = patches.transpose(0, 3, 4, 1, 2).reshape(N * Ho * Wo, C * kh * kw)
    return patches, Ho, Wo


# ----------------------------------------------------------------------------
# Pallas kernel 3: direct stride-2 3x3 maxpool (pad=1), polyphase inputs.
# Output is written straight into the padded-flat NHWC layout used by layer1:
#   rows r of the flat buffer map to (ip, jp) = (r // (Wc+2), r % (Wc+2)) of a
#   (Hc+4, Wc+2) grid; image pixel (i, j) lives at (i+2, j+1); everything else
#   is zero (serves as the 3x3 conv zero padding of the next layer).
# ----------------------------------------------------------------------------
def maxpool_kernel(ee_ref, eo_ref, oe_ref, oo_ref, o_ref):
    Hc = o_ref.shape[1] - 4
    Wc = o_ref.shape[2] - 2
    ee, eo, oe, oo = ee_ref[0], eo_ref[0], oe_ref[0], oo_ref[0]
    out = oo                                            # (Hc, Wc, C)
    for di in (0, 1):
        for dj in (0, 1):
            out = jnp.maximum(out, ee[di:di + Hc, dj:dj + Wc, :])
    for di in (0, 1):
        out = jnp.maximum(out, eo[di:di + Hc, :, :])
    for dj in (0, 1):
        out = jnp.maximum(out, oe[:, dj:dj + Wc, :])
    o_ref[0] = jnp.zeros(o_ref.shape[1:], o_ref.dtype)
    o_ref[0, 2:Hc + 2, 1:Wc + 1, :] = out.astype(o_ref.dtype)


def maxpool_3x3_s2_p1_padded_flat(x_nhwc):
    """(N, Ho, Wo, C) f32 -> (N, (Hc+4)*(Wc+2), C) padded-flat activation."""
    N, Ho, Wo, C = x_nhwc.shape
    Hc = (Ho - 1) // 2 + 1
    Wc = (Wo - 1) // 2 + 1
    xp = jnp.pad(x_nhwc, ((0, 0), (1, 1), (1, 1), (0, 0)),
                 constant_values=-3.0e38)
    # polyphase split (cheap strided slices in XLA) -> unit-stride kernel reads
    ee = xp[:, 0::2, 0::2, :][:, :Hc + 1, :Wc + 1, :]
    eo = xp[:, 0::2, 1::2, :][:, :Hc + 1, :Wc, :]
    oe = xp[:, 1::2, 0::2, :][:, :Hc, :Wc + 1, :]
    oo = xp[:, 1::2, 1::2, :][:, :Hc, :Wc, :]
    out4 = pl.pallas_call(
        maxpool_kernel,
        out_shape=jax.ShapeDtypeStruct((N, Hc + 4, Wc + 2, C), jnp.float32),
        grid=(N,),
        in_specs=[pl.BlockSpec((1, Hc + 1, Wc + 1, C), lambda n: (n, 0, 0, 0)),
                  pl.BlockSpec((1, Hc + 1, Wc, C), lambda n: (n, 0, 0, 0)),
                  pl.BlockSpec((1, Hc, Wc + 1, C), lambda n: (n, 0, 0, 0)),
                  pl.BlockSpec((1, Hc, Wc, C), lambda n: (n, 0, 0, 0))],
        out_specs=pl.BlockSpec((1, Hc + 4, Wc + 2, C), lambda n: (n, 0, 0, 0)),
        compiler_params=pltpu.CompilerParams(
            dimension_semantics=("parallel",)),
    )(ee, eo, oe, oo)
    return out4.reshape(N, (Hc + 4) * (Wc + 2), C), Hc, Wc


# ----------------------------------------------------------------------------
# Pallas kernel 4: fused 3x3 conv + folded BN (+residual) + ReLU on the
# padded-flat layout.  9 shifted MXU matmuls accumulate in f32; output is
# re-emitted in the same padded-flat layout (zero borders restored).
# ----------------------------------------------------------------------------
def _conv3x3_compute(x_ref, r_ref, w_ref, s_ref, b_ref, m_ref, o_ref, Hc, Wc):
    Wrow = Wc + 2
    M = Hc * Wrow                                       # "extended" row count
    Cout = o_ref.shape[2]
    acc = jnp.zeros((M, Cout), jnp.float32)
    for dy in range(3):
        for dx in range(3):
            off = (dy + 1) * Wrow + dx - 1              # shifted-tap offset
            tap = x_ref[0, off:off + M, :].astype(jnp.bfloat16)
            acc = acc + jnp.dot(tap, w_ref[dy, dx],
                                preferred_element_type=jnp.float32)
    out = acc * s_ref[...] + b_ref[...]
    if r_ref is not None:                               # identity shortcut
        out = out + r_ref[0, 2 * Wrow:2 * Wrow + M, :]
    out = jnp.maximum(out, 0.0) * m_ref[...]            # zero the pad columns
    o_ref[0] = jnp.zeros(o_ref.shape[1:], o_ref.dtype)  # restore zero borders
    o_ref[0, 2 * Wrow:2 * Wrow + M, :] = out.astype(o_ref.dtype)


def conv3x3_kernel(x_ref, w_ref, s_ref, b_ref, m_ref, o_ref, *, Hc, Wc):
    _conv3x3_compute(x_ref, None, w_ref, s_ref, b_ref, m_ref, o_ref, Hc, Wc)


def conv3x3_res_kernel(x_ref, r_ref, w_ref, s_ref, b_ref, m_ref, o_ref, *,
                       Hc, Wc):
    _conv3x3_compute(x_ref, r_ref, w_ref, s_ref, b_ref, m_ref, o_ref, Hc, Wc)


def conv3x3_bn_relu(x_flat, w_hwio, scale, bias, col_mask, Hc, Wc,
                    residual=None):
    """x_flat: (N, (Hc+4)*(Wc+2), Cin) f32 padded-flat; returns same layout."""
    N, Ptot, Cin = x_flat.shape
    Cout = w_hwio.shape[-1]
    M = Hc * (Wc + 2)
    act_spec = pl.BlockSpec((1, Ptot, Cin), lambda n: (n, 0, 0))
    fixed_specs = [
        pl.BlockSpec((3, 3, Cin, Cout), lambda n: (0, 0, 0, 0)),
        pl.BlockSpec((1, Cout), lambda n: (0, 0)),
        pl.BlockSpec((1, Cout), lambda n: (0, 0)),
        pl.BlockSpec((M, 1), lambda n: (0, 0)),
    ]
    out_spec = pl.BlockSpec((1, Ptot, Cout), lambda n: (n, 0, 0))
    out_shape = jax.ShapeDtypeStruct((N, Ptot, Cout), jnp.float32)
    cp = pltpu.CompilerParams(dimension_semantics=("parallel",),
                              vmem_limit_bytes=VMEM_LIMIT)
    if residual is None:
        return pl.pallas_call(
            functools.partial(conv3x3_kernel, Hc=Hc, Wc=Wc),
            out_shape=out_shape, grid=(N,),
            in_specs=[act_spec] + fixed_specs,
            out_specs=out_spec, compiler_params=cp,
        )(x_flat, w_hwio, scale, bias, col_mask)
    return pl.pallas_call(
        functools.partial(conv3x3_res_kernel, Hc=Hc, Wc=Wc),
        out_shape=out_shape, grid=(N,),
        in_specs=[act_spec, act_spec] + fixed_specs,
        out_specs=out_spec, compiler_params=cp,
    )(x_flat, residual, w_hwio, scale, bias, col_mask)


# ----------------------------------------------------------------------------
# ResNet backbone (layer0 + layer1 of resnet34, as used by the forward)
# ----------------------------------------------------------------------------
def _init_bn(c, eps=1e-5):
    gamma = jnp.ones((c,), jnp.float32)
    beta = jnp.full((c,), 1e-4, jnp.float32)      # initialize_weights() BN init
    running_mean = jnp.zeros((c,), jnp.float32)
    running_var = jnp.ones((c,), jnp.float32)
    scale = gamma / jnp.sqrt(running_var + eps)   # eval-mode BN folded
    bias = beta - running_mean * scale
    return scale, bias


def _conv_w(key, cout, cin, kh, kw):
    std = math.sqrt(2.0 / (cin * kh * kw))        # kaiming_normal_, relu
    return std * jax.random.normal(key, (cout, cin, kh, kw), jnp.float32)


def init_backbone(key):
    keys = jax.random.split(key, 7)
    params = {'conv0': _conv_w(keys[0], 64, 3, 7, 7), 'bn0': _init_bn(64),
              'layer1': []}
    ki = 1
    for _ in range(3):                            # resnet34 layer1: 3 BasicBlocks
        params['layer1'].append({
            'w1': _conv_w(keys[ki], 64, 64, 3, 3), 'bn1': _init_bn(64),
            'w2': _conv_w(keys[ki + 1], 64, 64, 3, 3), 'bn2': _init_bn(64),
        })
        ki += 2
    return params


def backbone_forward(params, x_nchw):
    """x_nchw (N,3,H,W) f32 -> layer1 feature (N,64,H/4,W/4) f32 (NCHW)."""
    N = x_nchw.shape[0]
    # layer0: 7x7 s2 p3 conv + BN + ReLU  (im2col -> tiled fused bf16 matmul)
    # TODO(synk): the 7x7 stem still materializes im2col patches in HBM; a
    # fully fused stem would need K=3 per-tap matmuls which under-fill the MXU.
    patches, Ho, Wo = im2col(x_nchw.astype(jnp.bfloat16), 7, 7, 2, 3)
    w_mat = params['conv0'].reshape(64, -1).T.astype(jnp.bfloat16)   # (147,64)
    s0, b0 = params['bn0']
    stem = matmul_bn_relu(patches, w_mat, s0.reshape(1, -1), b0.reshape(1, -1))
    stem = stem.reshape(N, Ho, Wo, 64)                               # NHWC
    # layer0 maxpool (stride-2 direct) -> padded-flat layer1 activations
    h, Hc, Wc = maxpool_3x3_s2_p1_padded_flat(stem)
    # layer1: 3 BasicBlocks (fused conv+BN(+res)+ReLU kernels, no transposes)
    Wrow = Wc + 2
    M = Hc * Wrow
    jq = jnp.arange(M, dtype=jnp.int32) % Wrow
    col_mask = ((jq >= 1) & (jq <= Wc)).astype(jnp.float32).reshape(M, 1)
    for blk in params['layer1']:
        w1 = blk['w1'].transpose(2, 3, 1, 0).astype(jnp.bfloat16)    # HWIO
        w2 = blk['w2'].transpose(2, 3, 1, 0).astype(jnp.bfloat16)
        s1, b1 = blk['bn1']
        s2, b2 = blk['bn2']
        y = conv3x3_bn_relu(h, w1, s1.reshape(1, -1), b1.reshape(1, -1),
                            col_mask, Hc, Wc)
        h = conv3x3_bn_relu(y, w2, s2.reshape(1, -1), b2.reshape(1, -1),
                            col_mask, Hc, Wc, residual=h)
    # unpack padded-flat -> NCHW feature map (single cheap transpose at the end)
    feat = h.reshape(N, Hc + 4, Wrow, 64)[:, 2:Hc + 2, 1:Wc + 1, :]
    return feat.transpose(0, 3, 1, 2)


# ----------------------------------------------------------------------------
# HLCDNet forward
# ----------------------------------------------------------------------------
def hlcdnet_forward(params, pre_data, post_data):
    B = pre_data.shape[0]
    # Batch pre/post together so shared-weight stages run once.
    x = jnp.concatenate([pre_data, post_data], axis=0)        # (2B, 4, H, W)
    weight_edge, blur = filter_hl(x)
    refeatH = backbone_forward(params['backboneH'], weight_edge)
    # TODO(synk): reference extractorL has arity/name bugs (declared with two
    # inputs, called with one, returns an undefined `refeat`); we run backboneL
    # on each blurred input as the forward intends.
    refeatL = backbone_forward(params['backboneL'], blur)
    # Reference forward returns None; we return the features so callers can
    # block on the full computation.
    return refeatH[:B], refeatH[B:], refeatL[:B], refeatL[B:]


# ----------------------------------------------------------------------------
if __name__ == "__main__":
    key = jax.random.PRNGKey(0)
    k_pre, k_post, k_bh, k_bl = jax.random.split(key, 4)

    B, H, W = 2, 16, 16
    # 4 channels: RGB + illumination (L) channel, as filterHL expects
    pre_data = jax.random.uniform(k_pre, (B, 4, H, W), jnp.float32)
    post_data = jax.random.uniform(k_post, (B, 4, H, W), jnp.float32)

    params = {
        'backboneH': init_backbone(k_bh),
        'backboneL': init_backbone(k_bl),
    }

    outs = jax.jit(hlcdnet_forward)(params, pre_data, post_data)
    jax.block_until_ready(outs)
    print("KERNEL_OK")
</pallas_src>

<mosaic_0001>
module attributes {stable_mosaic.version = 11 : i64} {
  func.func @filter_hl_kernel(%arg0: i32, %arg1: memref<1x4x18x18xf32, #tpu.memory_space<vmem>>, %arg2: memref<1x3x16x16xf32, #tpu.memory_space<vmem>>, %arg3: memref<1x3x16x16xf32, #tpu.memory_space<vmem>>) attributes {dimension_semantics = [#tpu.dimension_semantics<parallel>], iteration_bounds = array<i64: 4>, scalar_prefetch = 0 : i64, scratch_operands = 0 : i64, tpu.core_type = #tpu.core_type<tc>, window_params = [{transform_indices = @transform_0, window_bounds = array<i64: 1, 4, 18, 18>}, {transform_indices = @transform_1, window_bounds = array<i64: 1, 3, 16, 16>}, {transform_indices = @transform_2, window_bounds = array<i64: 1, 3, 16, 16>}]} {
    %c0 = arith.constant 0 : index
    %c0_0 = arith.constant 0 : index
    %c0_1 = arith.constant 0 : index
    %c0_2 = arith.constant 0 : index
    %0 = vector.load %arg1[%c0, %c0_0, %c0_1, %c0_2] : memref<1x4x18x18xf32, #tpu.memory_space<vmem>>, vector<1x4x18x18xf32>
    %1 = vector.shape_cast %0 : vector<1x4x18x18xf32> to vector<4x18x18xf32>
    %cst = arith.constant 0.000000e+00 : f32
    %2 = vector.broadcast %cst : f32 to vector<16x16xf32>
    %cst_3 = arith.constant 0.000000e+00 : f32
    %3 = vector.broadcast %cst_3 : f32 to vector<16x16xf32>
    %cst_4 = arith.constant 0.000000e+00 : f32
    %4 = vector.broadcast %cst_4 : f32 to vector<3x16x16xf32>
    %5 = vector.extract_strided_slice %1 {offsets = [0, 0, 0], sizes = [4, 16, 16], strides = [1, 1, 1]} : vector<4x18x18xf32> to vector<4x16x16xf32>
    %6 = vector.extract_strided_slice %5 {offsets = [3, 0, 0], sizes = [1, 16, 16], strides = [1, 1, 1]} : vector<4x16x16xf32> to vector<1x16x16xf32>
    %7 = vector.shape_cast %6 : vector<1x16x16xf32> to vector<16x16xf32>
    %cst_5 = arith.constant -1.000000e+00 : f32
    %8 = vector.broadcast %cst_5 : f32 to vector<16x16xf32>
    %9 = arith.mulf %8, %7 : vector<16x16xf32>
    %10 = arith.addf %2, %9 : vector<16x16xf32>
    %cst_6 = arith.constant -1.000000e+00 : f32
    %11 = vector.broadcast %cst_6 : f32 to vector<16x16xf32>
    %12 = arith.mulf %11, %7 : vector<16x16xf32>
    %13 = arith.addf %3, %12 : vector<16x16xf32>
    %14 = vector.extract_strided_slice %5 {offsets = [0, 0, 0], sizes = [3, 16, 16], strides = [1, 1, 1]} : vector<4x16x16xf32> to vector<3x16x16xf32>
    %cst_7 = arith.constant 0.0751136094 : f32
    %15 = vector.broadcast %cst_7 : f32 to vector<3x16x16xf32>
    %16 = arith.mulf %15, %14 : vector<3x16x16xf32>
    %17 = arith.addf %4, %16 : vector<3x16x16xf32>
    %18 = vector.extract_strided_slice %1 {offsets = [0, 0, 1], sizes = [4, 16, 16], strides = [1, 1, 1]} : vector<4x18x18xf32> to vector<4x16x16xf32>
    %19 = vector.extract_strided_slice %18 {offsets = [3, 0, 0], sizes = [1, 16, 16], strides = [1, 1, 1]} : vector<4x16x16xf32> to vector<1x16x16xf32>
    %20 = vector.shape_cast %19 : vector<1x16x16xf32> to vector<16x16xf32>
    %cst_8 = arith.constant -2.000000e+00 : f32
    %21 = vector.broadcast %cst_8 : f32 to vector<16x16xf32>
    %22 = arith.mulf %21, %20 : vector<16x16xf32>
    %23 = arith.addf %13, %22 : vector<16x16xf32>
    %24 = vector.extract_strided_slice %18 {offsets = [0, 0, 0], sizes = [3, 16, 16], strides = [1, 1, 1]} : vector<4x16x16xf32> to vector<3x16x16xf32>
    %cst_9 = arith.constant 0.123841405 : f32
    %25 = vector.broadcast %cst_9 : f32 to vector<3x16x16xf32>
    %26 = arith.mulf %25, %24 : vector<3x16x16xf32>
    %27 = arith.addf %17, %26 : vector<3x16x16xf32>
    %28 = vector.extract_strided_slice %1 {offsets = [0, 0, 2], sizes = [4, 16, 16], strides = [1, 1, 1]} : vector<4x18x18xf32> to vector<4x16x16xf32>
    %29 = vector.extract_strided_slice %28 {offsets = [3, 0, 0], sizes = [1, 16, 16], strides = [1, 1, 1]} : vector<4x16x16xf32> to vector<1x16x16xf32>
    %30 = vector.shape_cast %29 : vector<1x16x16xf32> to vector<16x16xf32>
    %cst_10 = arith.constant 1.000000e+00 : f32
    %31 = vector.broadcast %cst_10 : f32 to vector<16x16xf32>
    %32 = arith.mulf %31, %30 : vector<16x16xf32>
    %33 = arith.addf %10, %32 : vector<16x16xf32>
    %cst_11 = arith.constant -1.000000e+00 : f32
    %34 = vector.broadcast %cst_11 : f32 to vector<16x16xf32>
    %35 = arith.mulf %34, %30 : vector<16x16xf32>
    %36 = arith.addf %23, %35 : vector<16x16xf32>
    %37 = vector.extract_strided_slice %28 {offsets = [0, 0, 0], sizes = [3, 16, 16], strides = [1, 1, 1]} : vector<4x16x16xf32> to vector<3x16x16xf32>
    %cst_12 = arith.constant 0.0751136094 : f32
    %38 = vector.broadcast %cst_12 : f32 to vector<3x16x16xf32>
    %39 = arith.mulf %38, %37 : vector<3x16x16xf32>
    %40 = arith.addf %27, %39 : vector<3x16x16xf32>
    %41 = vector.extract_strided_slice %1 {offsets = [0, 1, 0], sizes = [4, 16, 16], strides = [1, 1, 1]} : vector<4x18x18xf32> to vector<4x16x16xf32>
    %42 = vector.extract_strided_slice %41 {offsets = [3, 0, 0], sizes = [1, 16, 16], strides = [1, 1, 1]} : vector<4x16x16xf32> to vector<1x16x16xf32>
    %43 = vector.shape_cast %42 : vector<1x16x16xf32> to vector<16x16xf32>
    %cst_13 = arith.constant -2.000000e+00 : f32
    %44 = vector.broadcast %cst_13 : f32 to vector<16x16xf32>
    %45 = arith.mulf %44, %43 : vector<16x16xf32>
    %46 = arith.addf %33, %45 : vector<16x16xf32>
    %47 = vector.extract_strided_slice %41 {offsets = [0, 0, 0], sizes = [3, 16, 16], strides = [1, 1, 1]} : vector<4x16x16xf32> to vector<3x16x16xf32>
    %cst_14 = arith.constant 0.123841405 : f32
    %48 = vector.broadcast %cst_14 : f32 to vector<3x16x16xf32>
    %49 = arith.mulf %48, %47 : vector<3x16x16xf32>
    %50 = arith.addf %40, %49 : vector<3x16x16xf32>
    %51 = vector.extract_strided_slice %1 {offsets = [0, 1, 1], sizes = [4, 16, 16], strides = [1, 1, 1]} : vector<4x18x18xf32> to vector<4x16x16xf32>
    %52 = vector.extract_strided_slice %51 {offsets = [0, 0, 0], sizes = [3, 16, 16], strides = [1, 1, 1]} : vector<4x16x16xf32> to vector<3x16x16xf32>
    %cst_15 = arith.constant 0.204179958 : f32
    %53 = vector.broadcast %cst_15 : f32 to vector<3x16x16xf32>
    %54 = arith.mulf %53, %52 : vector<3x16x16xf32>
    %55 = arith.addf %50, %54 : vector<3x16x16xf32>
    %56 = vector.extract_strided_slice %1 {offsets = [0, 1, 2], sizes = [4, 16, 16], strides = [1, 1, 1]} : vector<4x18x18xf32> to vector<4x16x16xf32>
    %57 = vector.extract_strided_slice %56 {offsets = [3, 0, 0], sizes = [1, 16, 16], strides = [1, 1, 1]} : vector<4x16x16xf32> to vector<1x16x16xf32>
    %58 = vector.shape_cast %57 : vector<1x16x16xf32> to vector<16x16xf32>
    %cst_16 = arith.constant 2.000000e+00 : f32
    %59 = vector.broadcast %cst_16 : f32 to vector<16x16xf32>
    %60 = arith.mulf %59, %58 : vector<16x16xf32>
    %61 = arith.addf %46, %60 : vector<16x16xf32>
    %62 = vector.extract_strided_slice %56 {offsets = [0, 0, 0], sizes = [3, 16, 16], strides = [1, 1, 1]} : vector<4x16x16xf32> to vector<3x16x16xf32>
    %cst_17 = arith.constant 0.123841405 : f32
    %63 = vector.broadcast %cst_17 : f32 to vector<3x16x16xf32>
    %64 = arith.mulf %63, %62 : vector<3x16x16xf32>
    %65 = arith.addf %55, %64 : vector<3x16x16xf32>
    %66 = vector.extract_strided_slice %1 {offsets = [0, 2, 0], sizes = [4, 16, 16], strides = [1, 1, 1]} : vector<4x18x18xf32> to vector<4x16x16xf32>
    %67 = vector.extract_strided_slice %66 {offsets = [3, 0, 0], sizes = [1, 16, 16], strides = [1, 1, 1]} : vector<4x16x16xf32> to vector<1x16x16xf32>
    %68 = vector.shape_cast %67 : vector<1x16x16xf32> to vector<16x16xf32>
    %cst_18 = arith.constant -1.000000e+00 : f32
    %69 = vector.broadcast %cst_18 : f32 to vector<16x16xf32>
    %70 = arith.mulf %69, %68 : vector<16x16xf32>
    %71 = arith.addf %61, %70 : vector<16x16xf32>
    %cst_19 = arith.constant 1.000000e+00 : f32
    %72 = vector.broadcast %cst_19 : f32 to vector<16x16xf32>
    %73 = arith.mulf %72, %68 : vector<16x16xf32>
    %74 = arith.addf %36, %73 : vector<16x16xf32>
    %75 = vector.extract_strided_slice %66 {offsets = [0, 0, 0], sizes = [3, 16, 16], strides = [1, 1, 1]} : vector<4x16x16xf32> to vector<3x16x16xf32>
    %cst_20 = arith.constant 0.0751136094 : f32
    %76 = vector.broadcast %cst_20 : f32 to vector<3x16x16xf32>
    %77 = arith.mulf %76, %75 : vector<3x16x16xf32>
    %78 = arith.addf %65, %77 : vector<3x16x16xf32>
    %79 = vector.extract_strided_slice %1 {offsets = [0, 2, 1], sizes = [4, 16, 16], strides = [1, 1, 1]} : vector<4x18x18xf32> to vector<4x16x16xf32>
    %80 = vector.extract_strided_slice %79 {offsets = [3, 0, 0], sizes = [1, 16, 16], strides = [1, 1, 1]} : vector<4x16x16xf32> to vector<1x16x16xf32>
    %81 = vector.shape_cast %80 : vector<1x16x16xf32> to vector<16x16xf32>
    %cst_21 = arith.constant 2.000000e+00 : f32
    %82 = vector.broadcast %cst_21 : f32 to vector<16x16xf32>
    %83 = arith.mulf %82, %81 : vector<16x16xf32>
    %84 = arith.addf %74, %83 : vector<16x16xf32>
    %85 = vector.extract_strided_slice %79 {offsets = [0, 0, 0], sizes = [3, 16, 16], strides = [1, 1, 1]} : vector<4x16x16xf32> to vector<3x16x16xf32>
    %cst_22 = arith.constant 0.123841405 : f32
    %86 = vector.broadcast %cst_22 : f32 to vector<3x16x16xf32>
    %87 = arith.mulf %86, %85 : vector<3x16x16xf32>
    %88 = arith.addf %78, %87 : vector<3x16x16xf32>
    %89 = vector.extract_strided_slice %1 {offsets = [0, 2, 2], sizes = [4, 16, 16], strides = [1, 1, 1]} : vector<4x18x18xf32> to vector<4x16x16xf32>
    %90 = vector.extract_strided_slice %89 {offsets = [3, 0, 0], sizes = [1, 16, 16], strides = [1, 1, 1]} : vector<4x16x16xf32> to vector<1x16x16xf32>
    %91 = vector.shape_cast %90 : vector<1x16x16xf32> to vector<16x16xf32>
    %cst_23 = arith.constant 1.000000e+00 : f32
    %92 = vector.broadcast %cst_23 : f32 to vector<16x16xf32>
    %93 = arith.mulf %92, %91 : vector<16x16xf32>
    %94 = arith.addf %71, %93 : vector<16x16xf32>
    %cst_24 = arith.constant 1.000000e+00 : f32
    %95 = vector.broadcast %cst_24 : f32 to vector<16x16xf32>
    %96 = arith.mulf %95, %91 : vector<16x16xf32>
    %97 = arith.addf %84, %96 : vector<16x16xf32>
    %98 = vector.extract_strided_slice %89 {offsets = [0, 0, 0], sizes = [3, 16, 16], strides = [1, 1, 1]} : vector<4x16x16xf32> to vector<3x16x16xf32>
    %cst_25 = arith.constant 0.0751136094 : f32
    %99 = vector.broadcast %cst_25 : f32 to vector<3x16x16xf32>
    %100 = arith.mulf %99, %98 : vector<3x16x16xf32>
    %101 = arith.addf %88, %100 : vector<3x16x16xf32>
    %102 = arith.mulf %94, %94 : vector<16x16xf32>
    %103 = arith.mulf %97, %97 : vector<16x16xf32>
    %104 = arith.addf %102, %103 : vector<16x16xf32>
    %105 = math.sqrt %104 : vector<16x16xf32>
    %106 = vector.extract_strided_slice %1 {offsets = [0, 1, 1], sizes = [3, 16, 16], strides = [1, 1, 1]} : vector<4x18x18xf32> to vector<3x16x16xf32>
    %cst_26 = arith.constant 1.000000e+00 : f32
    %107 = vector.broadcast %cst_26 : f32 to vector<16x16xf32>
    %108 = arith.addf %107, %105 : vector<16x16xf32>
    %109 = vector.shape_cast %108 : vector<16x16xf32> to vector<1x16x16xf32>
    %110 = vector.broadcast %109 : vector<1x16x16xf32> to vector<3x16x16xf32>
    %111 = arith.mulf %106, %110 : vector<3x16x16xf32>
    %c0_27 = arith.constant 0 : index
    %c0_28 = arith.constant 0 : index
    %c0_29 = arith.constant 0 : index
    %c0_30 = arith.constant 0 : index
    %112 = vector.load %arg2[%c0_27, %c0_28, %c0_29, %c0_30] : memref<1x3x16x16xf32, #tpu.memory_space<vmem>>, vector<1x3x16x16xf32>
    %113 = vector.shape_cast %112 : vector<1x3x16x16xf32> to vector<3x16x16xf32>
    %114 = vector.shape_cast %111 : vector<3x16x16xf32> to vector<1x3x16x16xf32>
    tpu.vector_store %arg2[%c0_27, %c0_28, %c0_29, %c0_30], %114 {strides = array<i32>} : memref<1x3x16x16xf32, #tpu.memory_space<vmem>>, vector<1x3x16x16xf32>,
    %c0_31 = arith.constant 0 : index
    %c0_32 = arith.constant 0 : index
    %c0_33 = arith.constant 0 : index
    %c0_34 = arith.constant 0 : index
    %115 = vector.load %arg3[%c0_31, %c0_32, %c0_33, %c0_34] : memref<1x3x16x16xf32, #tpu.memory_space<vmem>>, vector<1x3x16x16xf32>
    %116 = vector.shape_cast %115 : vector<1x3x16x16xf32> to vector<3x16x16xf32>
    %117 = vector.shape_cast %101 : vector<3x16x16xf32> to vector<1x3x16x16xf32>
    tpu.vector_store %arg3[%c0_31, %c0_32, %c0_33, %c0_34], %117 {strides = array<i32>} : memref<1x3x16x16xf32, #tpu.memory_space<vmem>>, vector<1x3x16x16xf32>,
    return
  }
  func.func @transform_0(%arg0: i32) -> (i32, i32, i32, i32) {
    %c0_i32 = arith.constant 0 : i32
    %c0_i32_0 = arith.constant 0 : i32
    %c0_i32_1 = arith.constant 0 : i32
    %c0_i32_2 = arith.constant 0 : i32
    return %arg0, %c0_i32, %c0_i32_0, %c0_i32_1 : i32, i32, i32, i32
  }
  func.func @transform_1(%arg0: i32) -> (i32, i32, i32, i32) {
    %c0_i32 = arith.constant 0 : i32
    %c0_i32_0 = arith.constant 0 : i32
    %c0_i32_1 = arith.constant 0 : i32
    %c0_i32_2 = arith.constant 0 : i32
    return %arg0, %c0_i32, %c0_i32_0, %c0_i32_1 : i32, i32, i32, i32
  }
  func.func @transform_2(%arg0: i32) -> (i32, i32, i32, i32) {
    %c0_i32 = arith.constant 0 : i32
    %c0_i32_0 = arith.constant 0 : i32
    %c0_i32_1 = arith.constant 0 : i32
    %c0_i32_2 = arith.constant 0 : i32
    return %arg0, %c0_i32, %c0_i32_0, %c0_i32_1 : i32, i32, i32, i32
  }
}

module attributes {stable_mosaic.version = 11 : i64} {
  func.func @matmul_bn_relu_kernel(%arg0: i32, %arg1: memref<256x147xbf16, #tpu.memory_space<vmem>>, %arg2: memref<147x64xbf16, #tpu.memory_space<vmem>>, %arg3: memref<1x64xf32, #tpu.memory_space<vmem>>, %arg4: memref<1x64xf32, #tpu.memory_space<vmem>>, %arg5: memref<256x64xf32, #tpu.memory_space<vmem>>) attributes {dimension_semantics = [#tpu.dimension_semantics<parallel>], iteration_bounds = array<i64: 1>, scalar_prefetch = 0 : i64, scratch_operands = 0 : i64, tpu.core_type = #tpu.core_type<tc>, window_params = [{transform_indices = @transform_0, window_bounds = array<i64: 256, 147>}, {pipeline_mode = #tpu.pipeline_mode<synchronous>, transform_indices = @transform_1, window_bounds = array<i64: 147, 64>}, {pipeline_mode = #tpu.pipeline_mode<synchronous>, transform_indices = @transform_2, window_bounds = array<i64: 1, 64>}, {pipeline_mode = #tpu.pipeline_mode<synchronous>, transform_indices = @transform_3, window_bounds = array<i64: 1, 64>}, {transform_indices = @transform_4, window_bounds = array<i64: 256, 64>}]} {
    %c0 = arith.constant 0 : index
    %c0_0 = arith.constant 0 : index
    %0 = vector.load %arg1[%c0, %c0_0] : memref<256x147xbf16, #tpu.memory_space<vmem>>, vector<256x147xbf16>
    %c0_1 = arith.constant 0 : index
    %c0_2 = arith.constant 0 : index
    %1 = vector.load %arg2[%c0_1, %c0_2] : memref<147x64xbf16, #tpu.memory_space<vmem>>, vector<147x64xbf16>
    %cst = arith.constant dense<0.000000e+00> : vector<256x64xf32>
    %2 = tpu.matmul %0, %1, %cst {dimension_numbers = #tpu.dot_dimension_numbers<[1], [0], [0], [1], [0, 0, 1, 1], [], []>} : vector<256x147xbf16>, vector<147x64xbf16>, vector<256x64xf32> -> vector<256x64xf32>
    %c0_3 = arith.constant 0 : index
    %c0_4 = arith.constant 0 : index
    %3 = vector.load %arg3[%c0_3, %c0_4] : memref<1x64xf32, #tpu.memory_space<vmem>>, vector<1x64xf32>
    %4 = vector.broadcast %3 : vector<1x64xf32> to vector<256x64xf32>
    %5 = arith.mulf %2, %4 : vector<256x64xf32>
    %c0_5 = arith.constant 0 : index
    %c0_6 = arith.constant 0 : index
    %6 = vector.load %arg4[%c0_5, %c0_6] : memref<1x64xf32, #tpu.memory_space<vmem>>, vector<1x64xf32>
    %7 = vector.broadcast %6 : vector<1x64xf32> to vector<256x64xf32>
    %8 = arith.addf %5, %7 : vector<256x64xf32>
    %cst_7 = arith.constant 0.000000e+00 : f32
    %9 = vector.broadcast %cst_7 : f32 to vector<256x64xf32>
    %10 = arith.maximumf %8, %9 : vector<256x64xf32>
    %c0_8 = arith.constant 0 : index
    %c0_9 = arith.constant 0 : index
    %11 = vector.load %arg5[%c0_8, %c0_9] : memref<256x64xf32, #tpu.memory_space<vmem>>, vector<256x64xf32>
    tpu.vector_store %arg5[%c0_8, %c0_9], %10 {strides = array<i32>} : memref<256x64xf32, #tpu.memory_space<vmem>>, vector<256x64xf32>,
    return
  }
  func.func @transform_0(%arg0: i32) -> (i32, i32) {
    %c0_i32 = arith.constant 0 : i32
    %c0_i32_0 = arith.constant 0 : i32
    return %arg0, %c0_i32 : i32, i32
  }
  func.func @transform_1(%arg0: i32) -> (i32, i32) {
    %c0_i32 = arith.constant 0 : i32
    %c0_i32_0 = arith.constant 0 : i32
    %c0_i32_1 = arith.constant 0 : i32
    return %c0_i32, %c0_i32_0 : i32, i32
  }
  func.func @transform_2(%arg0: i32) -> (i32, i32) {
    %c0_i32 = arith.constant 0 : i32
    %c0_i32_0 = arith.constant 0 : i32
    %c0_i32_1 = arith.constant 0 : i32
    return %c0_i32, %c0_i32_0 : i32, i32
  }
  func.func @transform_3(%arg0: i32) -> (i32, i32) {
    %c0_i32 = arith.constant 0 : i32
    %c0_i32_0 = arith.constant 0 : i32
    %c0_i32_1 = arith.constant 0 : i32
    return %c0_i32, %c0_i32_0 : i32, i32
  }
  func.func @transform_4(%arg0: i32) -> (i32, i32) {
    %c0_i32 = arith.constant 0 : i32
    %c0_i32_0 = arith.constant 0 : i32
    return %arg0, %c0_i32 : i32, i32
  }
}

module attributes {stable_mosaic.version = 11 : i64} {
  func.func @maxpool_kernel(%arg0: i32, %arg1: memref<1x5x5x64xf32, #tpu.memory_space<vmem>>, %arg2: memref<1x5x4x64xf32, #tpu.memory_space<vmem>>, %arg3: memref<1x4x5x64xf32, #tpu.memory_space<vmem>>, %arg4: memref<1x4x4x64xf32, #tpu.memory_space<vmem>>, %arg5: memref<1x8x6x64xf32, #tpu.memory_space<vmem>>) attributes {dimension_semantics = [#tpu.dimension_semantics<parallel>], iteration_bounds = array<i64: 4>, scalar_prefetch = 0 : i64, scratch_operands = 0 : i64, tpu.core_type = #tpu.core_type<tc>, window_params = [{transform_indices = @transform_0, window_bounds = array<i64: 1, 5, 5, 64>}, {transform_indices = @transform_1, window_bounds = array<i64: 1, 5, 4, 64>}, {transform_indices = @transform_2, window_bounds = array<i64: 1, 4, 5, 64>}, {transform_indices = @transform_3, window_bounds = array<i64: 1, 4, 4, 64>}, {transform_indices = @transform_4, window_bounds = array<i64: 1, 8, 6, 64>}]} {
    %c0 = arith.constant 0 : index
    %c0_0 = arith.constant 0 : index
    %c0_1 = arith.constant 0 : index
    %c0_2 = arith.constant 0 : index
    %0 = vector.load %arg1[%c0, %c0_0, %c0_1, %c0_2] : memref<1x5x5x64xf32, #tpu.memory_space<vmem>>, vector<1x5x5x64xf32>
    %1 = vector.shape_cast %0 : vector<1x5x5x64xf32> to vector<5x5x64xf32>
    %c0_3 = arith.constant 0 : index
    %c0_4 = arith.constant 0 : index
    %c0_5 = arith.constant 0 : index
    %c0_6 = arith.constant 0 : index
    %2 = vector.load %arg2[%c0_3, %c0_4, %c0_5, %c0_6] : memref<1x5x4x64xf32, #tpu.memory_space<vmem>>, vector<1x5x4x64xf32>
    %3 = vector.shape_cast %2 : vector<1x5x4x64xf32> to vector<5x4x64xf32>
    %c0_7 = arith.constant 0 : index
    %c0_8 = arith.constant 0 : index
    %c0_9 = arith.constant 0 : index
    %c0_10 = arith.constant 0 : index
    %4 = vector.load %arg3[%c0_7, %c0_8, %c0_9, %c0_10] : memref<1x4x5x64xf32, #tpu.memory_space<vmem>>, vector<1x4x5x64xf32>
    %5 = vector.shape_cast %4 : vector<1x4x5x64xf32> to vector<4x5x64xf32>
    %c0_11 = arith.constant 0 : index
    %c0_12 = arith.constant 0 : index
    %c0_13 = arith.constant 0 : index
    %c0_14 = arith.constant 0 : index
    %6 = vector.load %arg4[%c0_11, %c0_12, %c0_13, %c0_14] : memref<1x4x4x64xf32, #tpu.memory_space<vmem>>, vector<1x4x4x64xf32>
    %7 = vector.shape_cast %6 : vector<1x4x4x64xf32> to vector<4x4x64xf32>
    %8 = vector.extract_strided_slice %1 {offsets = [0, 0, 0], sizes = [4, 4, 64], strides = [1, 1, 1]} : vector<5x5x64xf32> to vector<4x4x64xf32>
    %9 = arith.maximumf %7, %8 : vector<4x4x64xf32>
    %10 = vector.extract_strided_slice %1 {offsets = [0, 1, 0], sizes = [4, 4, 64], strides = [1, 1, 1]} : vector<5x5x64xf32> to vector<4x4x64xf32>
    %11 = arith.maximumf %9, %10 : vector<4x4x64xf32>
    %12 = vector.extract_strided_slice %1 {offsets = [1, 0, 0], sizes = [4, 4, 64], strides = [1, 1, 1]} : vector<5x5x64xf32> to vector<4x4x64xf32>
    %13 = arith.maximumf %11, %12 : vector<4x4x64xf32>
    %14 = vector.extract_strided_slice %1 {offsets = [1, 1, 0], sizes = [4, 4, 64], strides = [1, 1, 1]} : vector<5x5x64xf32> to vector<4x4x64xf32>
    %15 = arith.maximumf %13, %14 : vector<4x4x64xf32>
    %16 = vector.extract_strided_slice %3 {offsets = [0, 0, 0], sizes = [4, 4, 64], strides = [1, 1, 1]} : vector<5x4x64xf32> to vector<4x4x64xf32>
    %17 = arith.maximumf %15, %16 : vector<4x4x64xf32>
    %18 = vector.extract_strided_slice %3 {offsets = [1, 0, 0], sizes = [4, 4, 64], strides = [1, 1, 1]} : vector<5x4x64xf32> to vector<4x4x64xf32>
    %19 = arith.maximumf %17, %18 : vector<4x4x64xf32>
    %20 = vector.extract_strided_slice %5 {offsets = [0, 0, 0], sizes = [4, 4, 64], strides = [1, 1, 1]} : vector<4x5x64xf32> to vector<4x4x64xf32>
    %21 = arith.maximumf %19, %20 : vector<4x4x64xf32>
    %22 = vector.extract_strided_slice %5 {offsets = [0, 1, 0], sizes = [4, 4, 64], strides = [1, 1, 1]} : vector<4x5x64xf32> to vector<4x4x64xf32>
    %23 = arith.maximumf %21, %22 : vector<4x4x64xf32>
    %cst = arith.constant 0.000000e+00 : f32
    %24 = vector.broadcast %cst : f32 to vector<8x6x64xf32>
    %c0_15 = arith.constant 0 : index
    %c0_16 = arith.constant 0 : index
    %c0_17 = arith.constant 0 : index
    %c0_18 = arith.constant 0 : index
    %25 = vector.load %arg5[%c0_15, %c0_16, %c0_17, %c0_18] : memref<1x8x6x64xf32, #tpu.memory_space<vmem>>, vector<1x8x6x64xf32>
    %26 = vector.shape_cast %25 : vector<1x8x6x64xf32> to vector<8x6x64xf32>
    %27 = vector.shape_cast %24 : vector<8x6x64xf32> to vector<1x8x6x64xf32>
    tpu.vector_store %arg5[%c0_15, %c0_16, %c0_17, %c0_18], %27 {strides = array<i32>} : memref<1x8x6x64xf32, #tpu.memory_space<vmem>>, vector<1x8x6x64xf32>,
    %c0_19 = arith.constant 0 : index
    %c2 = arith.constant 2 : index
    %c1 = arith.constant 1 : index
    %c0_20 = arith.constant 0 : index
    %28 = vector.load %arg5[%c0_19, %c2, %c1, %c0_20] : memref<1x8x6x64xf32, #tpu.memory_space<vmem>>, vector<1x4x4x64xf32>
    %29 = vector.shape_cast %28 : vector<1x4x4x64xf32> to vector<4x4x64xf32>
    %30 = vector.shape_cast %23 : vector<4x4x64xf32> to vector<1x4x4x64xf32>
    tpu.vector_store %arg5[%c0_19, %c2, %c1, %c0_20], %30 {strides = array<i32>} : memref<1x8x6x64xf32, #tpu.memory_space<vmem>>, vector<1x4x4x64xf32>,
    return
  }
  func.func @transform_0(%arg0: i32) -> (i32, i32, i32, i32) {
    %c0_i32 = arith.constant 0 : i32
    %c0_i32_0 = arith.constant 0 : i32
    %c0_i32_1 = arith.constant 0 : i32
    %c0_i32_2 = arith.constant 0 : i32
    return %arg0, %c0_i32, %c0_i32_0, %c0_i32_1 : i32, i32, i32, i32
  }
  func.func @transform_1(%arg0: i32) -> (i32, i32, i32, i32) {
    %c0_i32 = arith.constant 0 : i32
    %c0_i32_0 = arith.constant 0 : i32
    %c0_i32_1 = arith.constant 0 : i32
    %c0_i32_2 = arith.constant 0 : i32
    return %arg0, %c0_i32, %c0_i32_0, %c0_i32_1 : i32, i32, i32, i32
  }
  func.func @transform_2(%arg0: i32) -> (i32, i32, i32, i32) {
    %c0_i32 = arith.constant 0 : i32
    %c0_i32_0 = arith.constant 0 : i32
    %c0_i32_1 = arith.constant 0 : i32
    %c0_i32_2 = arith.constant 0 : i32
    return %arg0, %c0_i32, %c0_i32_0, %c0_i32_1 : i32, i32, i32, i32
  }
  func.func @transform_3(%arg0: i32) -> (i32, i32, i32, i32) {
    %c0_i32 = arith.constant 0 : i32
    %c0_i32_0 = arith.constant 0 : i32
    %c0_i32_1 = arith.constant 0 : i32
    %c0_i32_2 = arith.constant 0 : i32
    return %arg0, %c0_i32, %c0_i32_0, %c0_i32_1 : i32, i32, i32, i32
  }
  func.func @transform_4(%arg0: i32) -> (i32, i32, i32, i32) {
    %c0_i32 = arith.constant 0 : i32
    %c0_i32_0 = arith.constant 0 : i32
    %c0_i32_1 = arith.constant 0 : i32
    %c0_i32_2 = arith.constant 0 : i32
    return %arg0, %c0_i32, %c0_i32_0, %c0_i32_1 : i32, i32, i32, i32
  }
}

module attributes {stable_mosaic.version = 11 : i64} {
  func.func @conv3x3_kernel(%arg0: i32, %arg1: memref<1x48x64xf32, #tpu.memory_space<vmem>>, %arg2: memref<3x3x64x64xbf16, #tpu.memory_space<vmem>>, %arg3: memref<1x64xf32, #tpu.memory_space<vmem>>, %arg4: memref<1x64xf32, #tpu.memory_space<vmem>>, %arg5: memref<24x1xf32, #tpu.memory_space<vmem>>, %arg6: memref<1x48x64xf32, #tpu.memory_space<vmem>>) attributes {dimension_semantics = [#tpu.dimension_semantics<parallel>], iteration_bounds = array<i64: 4>, scalar_prefetch = 0 : i64, scratch_operands = 0 : i64, tpu.core_type = #tpu.core_type<tc>, window_params = [{transform_indices = @transform_0, window_bounds = array<i64: 1, 48, 64>}, {pipeline_mode = #tpu.pipeline_mode<synchronous>, transform_indices = @transform_1, window_bounds = array<i64: 3, 3, 64, 64>}, {pipeline_mode = #tpu.pipeline_mode<synchronous>, transform_indices = @transform_2, window_bounds = array<i64: 1, 64>}, {pipeline_mode = #tpu.pipeline_mode<synchronous>, transform_indices = @transform_3, window_bounds = array<i64: 1, 64>}, {pipeline_mode = #tpu.pipeline_mode<synchronous>, transform_indices = @transform_4, window_bounds = array<i64: 24, 1>}, {transform_indices = @transform_5, window_bounds = array<i64: 1, 48, 64>}]} {
    %cst = arith.constant 0.000000e+00 : f32
    %0 = vector.broadcast %cst : f32 to vector<24x64xf32>
    %c0 = arith.constant 0 : index
    %c5 = arith.constant 5 : index
    %c0_0 = arith.constant 0 : index
    %1 = vector.load %arg1[%c0, %c5, %c0_0] : memref<1x48x64xf32, #tpu.memory_space<vmem>>, vector<1x24x64xf32>
    %2 = vector.shape_cast %1 : vector<1x24x64xf32> to vector<24x64xf32>
    %3 = arith.truncf %2 : vector<24x64xf32> to vector<24x64xbf16>
    %c0_1 = arith.constant 0 : index
    %c0_2 = arith.constant 0 : index
    %c0_3 = arith.constant 0 : index
    %c0_4 = arith.constant 0 : index
    %4 = vector.load %arg2[%c0_1, %c0_2, %c0_3, %c0_4] : memref<3x3x64x64xbf16, #tpu.memory_space<vmem>>, vector<1x1x64x64xbf16>
    %5 = vector.shape_cast %4 : vector<1x1x64x64xbf16> to vector<64x64xbf16>
    %cst_5 = arith.constant dense<0.000000e+00> : vector<24x64xf32>
    %6 = tpu.matmul %3, %5, %cst_5 {dimension_numbers = #tpu.dot_dimension_numbers<[1], [0], [0], [1], [0, 0, 1, 1], [], []>} : vector<24x64xbf16>, vector<64x64xbf16>, vector<24x64xf32> -> vector<24x64xf32>
    %7 = arith.addf %0, %6 : vector<24x64xf32>
    %c0_6 = arith.constant 0 : index
    %c6 = arith.constant 6 : index
    %c0_7 = arith.constant 0 : index
    %8 = vector.load %arg1[%c0_6, %c6, %c0_7] : memref<1x48x64xf32, #tpu.memory_space<vmem>>, vector<1x24x64xf32>
    %9 = vector.shape_cast %8 : vector<1x24x64xf32> to vector<24x64xf32>
    %10 = arith.truncf %9 : vector<24x64xf32> to vector<24x64xbf16>
    %c0_8 = arith.constant 0 : index
    %c1 = arith.constant 1 : index
    %c0_9 = arith.constant 0 : index
    %c0_10 = arith.constant 0 : index
    %11 = vector.load %arg2[%c0_8, %c1, %c0_9, %c0_10] : memref<3x3x64x64xbf16, #tpu.memory_space<vmem>>, vector<1x1x64x64xbf16>
    %12 = vector.shape_cast %11 : vector<1x1x64x64xbf16> to vector<64x64xbf16>
    %cst_11 = arith.constant dense<0.000000e+00> : vector<24x64xf32>
    %13 = tpu.matmul %10, %12, %cst_11 {dimension_numbers = #tpu.dot_dimension_numbers<[1], [0], [0], [1], [0, 0, 1, 1], [], []>} : vector<24x64xbf16>, vector<64x64xbf16>, vector<24x64xf32> -> vector<24x64xf32>
    %14 = arith.addf %7, %13 : vector<24x64xf32>
    %c0_12 = arith.constant 0 : index
    %c7 = arith.constant 7 : index
    %c0_13 = arith.constant 0 : index
    %15 = vector.load %arg1[%c0_12, %c7, %c0_13] : memref<1x48x64xf32, #tpu.memory_space<vmem>>, vector<1x24x64xf32>
    %16 = vector.shape_cast %15 : vector<1x24x64xf32> to vector<24x64xf32>
    %17 = arith.truncf %16 : vector<24x64xf32> to vector<24x64xbf16>
    %c0_14 = arith.constant 0 : index
    %c2 = arith.constant 2 : index
    %c0_15 = arith.constant 0 : index
    %c0_16 = arith.constant 0 : index
    %18 = vector.load %arg2[%c0_14, %c2, %c0_15, %c0_16] : memref<3x3x64x64xbf16, #tpu.memory_space<vmem>>, vector<1x1x64x64xbf16>
    %19 = vector.shape_cast %18 : vector<1x1x64x64xbf16> to vector<64x64xbf16>
    %cst_17 = arith.constant dense<0.000000e+00> : vector<24x64xf32>
    %20 = tpu.matmul %17, %19, %cst_17 {dimension_numbers = #tpu.dot_dimension_numbers<[1], [0], [0], [1], [0, 0, 1, 1], [], []>} : vector<24x64xbf16>, vector<64x64xbf16>, vector<24x64xf32> -> vector<24x64xf32>
    %21 = arith.addf %14, %20 : vector<24x64xf32>
    %c0_18 = arith.constant 0 : index
    %c11 = arith.constant 11 : index
    %c0_19 = arith.constant 0 : index
    %22 = vector.load %arg1[%c0_18, %c11, %c0_19] : memref<1x48x64xf32, #tpu.memory_space<vmem>>, vector<1x24x64xf32>
    %23 = vector.shape_cast %22 : vector<1x24x64xf32> to vector<24x64xf32>
    %24 = arith.truncf %23 : vector<24x64xf32> to vector<24x64xbf16>
    %c1_20 = arith.constant 1 : index
    %c0_21 = arith.constant 0 : index
    %c0_22 = arith.constant 0 : index
    %c0_23 = arith.constant 0 : index
    %25 = vector.load %arg2[%c1_20, %c0_21, %c0_22, %c0_23] : memref<3x3x64x64xbf16, #tpu.memory_space<vmem>>, vector<1x1x64x64xbf16>
    %26 = vector.shape_cast %25 : vector<1x1x64x64xbf16> to vector<64x64xbf16>
    %cst_24 = arith.constant dense<0.000000e+00> : vector<24x64xf32>
    %27 = tpu.matmul %24, %26, %cst_24 {dimension_numbers = #tpu.dot_dimension_numbers<[1], [0], [0], [1], [0, 0, 1, 1], [], []>} : vector<24x64xbf16>, vector<64x64xbf16>, vector<24x64xf32> -> vector<24x64xf32>
    %28 = arith.addf %21, %27 : vector<24x64xf32>
    %c0_25 = arith.constant 0 : index
    %c12 = arith.constant 12 : index
    %c0_26 = arith.constant 0 : index
    %29 = vector.load %arg1[%c0_25, %c12, %c0_26] : memref<1x48x64xf32, #tpu.memory_space<vmem>>, vector<1x24x64xf32>
    %30 = vector.shape_cast %29 : vector<1x24x64xf32> to vector<24x64xf32>
    %31 = arith.truncf %30 : vector<24x64xf32> to vector<24x64xbf16>
    %c1_27 = arith.constant 1 : index
    %c1_28 = arith.constant 1 : index
    %c0_29 = arith.constant 0 : index
    %c0_30 = arith.constant 0 : index
    %32 = vector.load %arg2[%c1_27, %c1_28, %c0_29, %c0_30] : memref<3x3x64x64xbf16, #tpu.memory_space<vmem>>, vector<1x1x64x64xbf16>
    %33 = vector.shape_cast %32 : vector<1x1x64x64xbf16> to vector<64x64xbf16>
    %cst_31 = arith.constant dense<0.000000e+00> : vector<24x64xf32>
    %34 = tpu.matmul %31, %33, %cst_31 {dimension_numbers = #tpu.dot_dimension_numbers<[1], [0], [0], [1], [0, 0, 1, 1], [], []>} : vector<24x64xbf16>, vector<64x64xbf16>, vector<24x64xf32> -> vector<24x64xf32>
    %35 = arith.addf %28, %34 : vector<24x64xf32>
    %c0_32 = arith.constant 0 : index
    %c13 = arith.constant 13 : index
    %c0_33 = arith.constant 0 : index
    %36 = vector.load %arg1[%c0_32, %c13, %c0_33] : memref<1x48x64xf32, #tpu.memory_space<vmem>>, vector<1x24x64xf32>
    %37 = vector.shape_cast %36 : vector<1x24x64xf32> to vector<24x64xf32>
    %38 = arith.truncf %37 : vector<24x64xf32> to vector<24x64xbf16>
    %c1_34 = arith.constant 1 : index
    %c2_35 = arith.constant 2 : index
    %c0_36 = arith.constant 0 : index
    %c0_37 = arith.constant 0 : index
    %39 = vector.load %arg2[%c1_34, %c2_35, %c0_36, %c0_37] : memref<3x3x64x64xbf16, #tpu.memory_space<vmem>>, vector<1x1x64x64xbf16>
    %40 = vector.shape_cast %39 : vector<1x1x64x64xbf16> to vector<64x64xbf16>
    %cst_38 = arith.constant dense<0.000000e+00> : vector<24x64xf32>
    %41 = tpu.matmul %38, %40, %cst_38 {dimension_numbers = #tpu.dot_dimension_numbers<[1], [0], [0], [1], [0, 0, 1, 1], [], []>} : vector<24x64xbf16>, vector<64x64xbf16>, vector<24x64xf32> -> vector<24x64xf32>
    %42 = arith.addf %35, %41 : vector<24x64xf32>
    %c0_39 = arith.constant 0 : index
    %c17 = arith.constant 17 : index
    %c0_40 = arith.constant 0 : index
    %43 = vector.load %arg1[%c0_39, %c17, %c0_40] : memref<1x48x64xf32, #tpu.memory_space<vmem>>, vector<1x24x64xf32>
    %44 = vector.shape_cast %43 : vector<1x24x64xf32> to vector<24x64xf32>
    %45 = arith.truncf %44 : vector<24x64xf32> to vector<24x64xbf16>
    %c2_41 = arith.constant 2 : index
    %c0_42 = arith.constant 0 : index
    %c0_43 = arith.constant 0 : index
    %c0_44 = arith.constant 0 : index
    %46 = vector.load %arg2[%c2_41, %c0_42, %c0_43, %c0_44] : memref<3x3x64x64xbf16, #tpu.memory_space<vmem>>, vector<1x1x64x64xbf16>
    %47 = vector.shape_cast %46 : vector<1x1x64x64xbf16> to vector<64x64xbf16>
    %cst_45 = arith.constant dense<0.000000e+00> : vector<24x64xf32>
    %48 = tpu.matmul %45, %47, %cst_45 {dimension_numbers = #tpu.dot_dimension_numbers<[1], [0], [0], [1], [0, 0, 1, 1], [], []>} : vector<24x64xbf16>, vector<64x64xbf16>, vector<24x64xf32> -> vector<24x64xf32>
    %49 = arith.addf %42, %48 : vector<24x64xf32>
    %c0_46 = arith.constant 0 : index
    %c18 = arith.constant 18 : index
    %c0_47 = arith.constant 0 : index
    %50 = vector.load %arg1[%c0_46, %c18, %c0_47] : memref<1x48x64xf32, #tpu.memory_space<vmem>>, vector<1x24x64xf32>
    %51 = vector.shape_cast %50 : vector<1x24x64xf32> to vector<24x64xf32>
    %52 = arith.truncf %51 : vector<24x64xf32> to vector<24x64xbf16>
    %c2_48 = arith.constant 2 : index
    %c1_49 = arith.constant 1 : index
    %c0_50 = arith.constant 0 : index
    %c0_51 = arith.constant 0 : index
    %53 = vector.load %arg2[%c2_48, %c1_49, %c0_50, %c0_51] : memref<3x3x64x64xbf16, #tpu.memory_space<vmem>>, vector<1x1x64x64xbf16>
    %54 = vector.shape_cast %53 : vector<1x1x64x64xbf16> to vector<64x64xbf16>
    %cst_52 = arith.constant dense<0.000000e+00> : vector<24x64xf32>
    %55 = tpu.matmul %52, %54, %cst_52 {dimension_numbers = #tpu.dot_dimension_numbers<[1], [0], [0], [1], [0, 0, 1, 1], [], []>} : vector<24x64xbf16>, vector<64x64xbf16>, vector<24x64xf32> -> vector<24x64xf32>
    %56 = arith.addf %49, %55 : vector<24x64xf32>
    %c0_53 = arith.constant 0 : index
    %c19 = arith.constant 19 : index
    %c0_54 = arith.constant 0 : index
    %57 = vector.load %arg1[%c0_53, %c19, %c0_54] : memref<1x48x64xf32, #tpu.memory_space<vmem>>, vector<1x24x64xf32>
    %58 = vector.shape_cast %57 : vector<1x24x64xf32> to vector<24x64xf32>
    %59 = arith.truncf %58 : vector<24x64xf32> to vector<24x64xbf16>
    %c2_55 = arith.constant 2 : index
    %c2_56 = arith.constant 2 : index
    %c0_57 = arith.constant 0 : index
    %c0_58 = arith.constant 0 : index
    %60 = vector.load %arg2[%c2_55, %c2_56, %c0_57, %c0_58] : memref<3x3x64x64xbf16, #tpu.memory_space<vmem>>, vector<1x1x64x64xbf16>
    %61 = vector.shape_cast %60 : vector<1x1x64x64xbf16> to vector<64x64xbf16>
    %cst_59 = arith.constant dense<0.000000e+00> : vector<24x64xf32>
    %62 = tpu.matmul %59, %61, %cst_59 {dimension_numbers = #tpu.dot_dimension_numbers<[1], [0], [0], [1], [0, 0, 1, 1], [], []>} : vector<24x64xbf16>, vector<64x64xbf16>, vector<24x64xf32> -> vector<24x64xf32>
    %63 = arith.addf %56, %62 : vector<24x64xf32>
    %c0_60 = arith.constant 0 : index
    %c0_61 = arith.constant 0 : index
    %64 = vector.load %arg3[%c0_60, %c0_61] : memref<1x64xf32, #tpu.memory_space<vmem>>, vector<1x64xf32>
    %65 = vector.broadcast %64 : vector<1x64xf32> to vector<24x64xf32>
    %66 = arith.mulf %63, %65 : vector<24x64xf32>
    %c0_62 = arith.constant 0 : index
    %c0_63 = arith.constant 0 : index
    %67 = vector.load %arg4[%c0_62, %c0_63] : memref<1x64xf32, #tpu.memory_space<vmem>>, vector<1x64xf32>
    %68 = vector.broadcast %67 : vector<1x64xf32> to vector<24x64xf32>
    %69 = arith.addf %66, %68 : vector<24x64xf32>
    %cst_64 = arith.constant 0.000000e+00 : f32
    %70 = vector.broadcast %cst_64 : f32 to vector<24x64xf32>
    %71 = arith.maximumf %69, %70 : vector<24x64xf32>
    %c0_65 = arith.constant 0 : index
    %c0_66 = arith.constant 0 : index
    %72 = vector.load %arg5[%c0_65, %c0_66] : memref<24x1xf32, #tpu.memory_space<vmem>>, vector<24x1xf32>
    %73 = vector.broadcast %72 : vector<24x1xf32> to vector<24x64xf32>
    %74 = arith.mulf %71, %73 : vector<24x64xf32>
    %cst_67 = arith.constant 0.000000e+00 : f32
    %75 = vector.broadcast %cst_67 : f32 to vector<48x64xf32>
    %c0_68 = arith.constant 0 : index
    %c0_69 = arith.constant 0 : index
    %c0_70 = arith.constant 0 : index
    %76 = vector.load %arg6[%c0_68, %c0_69, %c0_70] : memref<1x48x64xf32, #tpu.memory_space<vmem>>, vector<1x48x64xf32>
    %77 = vector.shape_cast %76 : vector<1x48x64xf32> to vector<48x64xf32>
    %78 = vector.shape_cast %75 : vector<48x64xf32> to vector<1x48x64xf32>
    tpu.vector_store %arg6[%c0_68, %c0_69, %c0_70], %78 {strides = array<i32>} : memref<1x48x64xf32, #tpu.memory_space<vmem>>, vector<1x48x64xf32>,
    %c0_71 = arith.constant 0 : index
    %c12_72 = arith.constant 12 : index
    %c0_73 = arith.constant 0 : index
    %79 = vector.load %arg6[%c0_71, %c12_72, %c0_73] : memref<1x48x64xf32, #tpu.memory_space<vmem>>, vector<1x24x64xf32>
    %80 = vector.shape_cast %79 : vector<1x24x64xf32> to vector<24x64xf32>
    %81 = vector.shape_cast %74 : vector<24x64xf32> to vector<1x24x64xf32>
    tpu.vector_store %arg6[%c0_71, %c12_72, %c0_73], %81 {strides = array<i32>} : memref<1x48x64xf32, #tpu.memory_space<vmem>>, vector<1x24x64xf32>,
    return
  }
  func.func @transform_0(%arg0: i32) -> (i32, i32, i32) {
    %c0_i32 = arith.constant 0 : i32
    %c0_i32_0 = arith.constant 0 : i32
    %c0_i32_1 = arith.constant 0 : i32
    return %arg0, %c0_i32, %c0_i32_0 : i32, i32, i32
  }
  func.func @transform_1(%arg0: i32) -> (i32, i32, i32, i32) {
    %c0_i32 = arith.constant 0 : i32
    %c0_i32_0 = arith.constant 0 : i32
    %c0_i32_1 = arith.constant 0 : i32
    %c0_i32_2 = arith.constant 0 : i32
    %c0_i32_3 = arith.constant 0 : i32
    return %c0_i32, %c0_i32_0, %c0_i32_1, %c0_i32_2 : i32, i32, i32, i32
  }
  func.func @transform_2(%arg0: i32) -> (i32, i32) {
    %c0_i32 = arith.constant 0 : i32
    %c0_i32_0 = arith.constant 0 : i32
    %c0_i32_1 = arith.constant 0 : i32
    return %c0_i32, %c0_i32_0 : i32, i32
  }
  func.func @transform_3(%arg0: i32) -> (i32, i32) {
    %c0_i32 = arith.constant 0 : i32
    %c0_i32_0 = arith.constant 0 : i32
    %c0_i32_1 = arith.constant 0 : i32
    return %c0_i32, %c0_i32_0 : i32, i32
  }
  func.func @transform_4(%arg0: i32) -> (i32, i32) {
    %c0_i32 = arith.constant 0 : i32
    %c0_i32_0 = arith.constant 0 : i32
    %c0_i32_1 = arith.constant 0 : i32
    return %c0_i32, %c0_i32_0 : i32, i32
  }
  func.func @transform_5(%arg0: i32) -> (i32, i32, i32) {
    %c0_i32 = arith.constant 0 : i32
    %c0_i32_0 = arith.constant 0 : i32
    %c0_i32_1 = arith.constant 0 : i32
    return %arg0, %c0_i32, %c0_i32_0 : i32, i32, i32
  }
}

module attributes {stable_mosaic.version = 11 : i64} {
  func.func @conv3x3_res_kernel(%arg0: i32, %arg1: memref<1x48x64xf32, #tpu.memory_space<vmem>>, %arg2: memref<1x48x64xf32, #tpu.memory_space<vmem>>, %arg3: memref<3x3x64x64xbf16, #tpu.memory_space<vmem>>, %arg4: memref<1x64xf32, #tpu.memory_space<vmem>>, %arg5: memref<1x64xf32, #tpu.memory_space<vmem>>, %arg6: memref<24x1xf32, #tpu.memory_space<vmem>>, %arg7: memref<1x48x64xf32, #tpu.memory_space<vmem>>) attributes {dimension_semantics = [#tpu.dimension_semantics<parallel>], iteration_bounds = array<i64: 4>, scalar_prefetch = 0 : i64, scratch_operands = 0 : i64, tpu.core_type = #tpu.core_type<tc>, window_params = [{transform_indices = @transform_0, window_bounds = array<i64: 1, 48, 64>}, {transform_indices = @transform_1, window_bounds = array<i64: 1, 48, 64>}, {pipeline_mode = #tpu.pipeline_mode<synchronous>, transform_indices = @transform_2, window_bounds = array<i64: 3, 3, 64, 64>}, {pipeline_mode = #tpu.pipeline_mode<synchronous>, transform_indices = @transform_3, window_bounds = array<i64: 1, 64>}, {pipeline_mode = #tpu.pipeline_mode<synchronous>, transform_indices = @transform_4, window_bounds = array<i64: 1, 64>}, {pipeline_mode = #tpu.pipeline_mode<synchronous>, transform_indices = @transform_5, window_bounds = array<i64: 24, 1>}, {transform_indices = @transform_6, window_bounds = array<i64: 1, 48, 64>}]} {
    %cst = arith.constant 0.000000e+00 : f32
    %0 = vector.broadcast %cst : f32 to vector<24x64xf32>
    %c0 = arith.constant 0 : index
    %c5 = arith.constant 5 : index
    %c0_0 = arith.constant 0 : index
    %1 = vector.load %arg1[%c0, %c5, %c0_0] : memref<1x48x64xf32, #tpu.memory_space<vmem>>, vector<1x24x64xf32>
    %2 = vector.shape_cast %1 : vector<1x24x64xf32> to vector<24x64xf32>
    %3 = arith.truncf %2 : vector<24x64xf32> to vector<24x64xbf16>
    %c0_1 = arith.constant 0 : index
    %c0_2 = arith.constant 0 : index
    %c0_3 = arith.constant 0 : index
    %c0_4 = arith.constant 0 : index
    %4 = vector.load %arg3[%c0_1, %c0_2, %c0_3, %c0_4] : memref<3x3x64x64xbf16, #tpu.memory_space<vmem>>, vector<1x1x64x64xbf16>
    %5 = vector.shape_cast %4 : vector<1x1x64x64xbf16> to vector<64x64xbf16>
    %cst_5 = arith.constant dense<0.000000e+00> : vector<24x64xf32>
    %6 = tpu.matmul %3, %5, %cst_5 {dimension_numbers = #tpu.dot_dimension_numbers<[1], [0], [0], [1], [0, 0, 1, 1], [], []>} : vector<24x64xbf16>, vector<64x64xbf16>, vector<24x64xf32> -> vector<24x64xf32>
    %7 = arith.addf %0, %6 : vector<24x64xf32>
    %c0_6 = arith.constant 0 : index
    %c6 = arith.constant 6 : index
    %c0_7 = arith.constant 0 : index
    %8 = vector.load %arg1[%c0_6, %c6, %c0_7] : memref<1x48x64xf32, #tpu.memory_space<vmem>>, vector<1x24x64xf32>
    %9 = vector.shape_cast %8 : vector<1x24x64xf32> to vector<24x64xf32>
    %10 = arith.truncf %9 : vector<24x64xf32> to vector<24x64xbf16>
    %c0_8 = arith.constant 0 : index
    %c1 = arith.constant 1 : index
    %c0_9 = arith.constant 0 : index
    %c0_10 = arith.constant 0 : index
    %11 = vector.load %arg3[%c0_8, %c1, %c0_9, %c0_10] : memref<3x3x64x64xbf16, #tpu.memory_space<vmem>>, vector<1x1x64x64xbf16>
    %12 = vector.shape_cast %11 : vector<1x1x64x64xbf16> to vector<64x64xbf16>
    %cst_11 = arith.constant dense<0.000000e+00> : vector<24x64xf32>
    %13 = tpu.matmul %10, %12, %cst_11 {dimension_numbers = #tpu.dot_dimension_numbers<[1], [0], [0], [1], [0, 0, 1, 1], [], []>} : vector<24x64xbf16>, vector<64x64xbf16>, vector<24x64xf32> -> vector<24x64xf32>
    %14 = arith.addf %7, %13 : vector<24x64xf32>
    %c0_12 = arith.constant 0 : index
    %c7 = arith.constant 7 : index
    %c0_13 = arith.constant 0 : index
    %15 = vector.load %arg1[%c0_12, %c7, %c0_13] : memref<1x48x64xf32, #tpu.memory_space<vmem>>, vector<1x24x64xf32>
    %16 = vector.shape_cast %15 : vector<1x24x64xf32> to vector<24x64xf32>
    %17 = arith.truncf %16 : vector<24x64xf32> to vector<24x64xbf16>
    %c0_14 = arith.constant 0 : index
    %c2 = arith.constant 2 : index
    %c0_15 = arith.constant 0 : index
    %c0_16 = arith.constant 0 : index
    %18 = vector.load %arg3[%c0_14, %c2, %c0_15, %c0_16] : memref<3x3x64x64xbf16, #tpu.memory_space<vmem>>, vector<1x1x64x64xbf16>
    %19 = vector.shape_cast %18 : vector<1x1x64x64xbf16> to vector<64x64xbf16>
    %cst_17 = arith.constant dense<0.000000e+00> : vector<24x64xf32>
    %20 = tpu.matmul %17, %19, %cst_17 {dimension_numbers = #tpu.dot_dimension_numbers<[1], [0], [0], [1], [0, 0, 1, 1], [], []>} : vector<24x64xbf16>, vector<64x64xbf16>, vector<24x64xf32> -> vector<24x64xf32>
    %21 = arith.addf %14, %20 : vector<24x64xf32>
    %c0_18 = arith.constant 0 : index
    %c11 = arith.constant 11 : index
    %c0_19 = arith.constant 0 : index
    %22 = vector.load %arg1[%c0_18, %c11, %c0_19] : memref<1x48x64xf32, #tpu.memory_space<vmem>>, vector<1x24x64xf32>
    %23 = vector.shape_cast %22 : vector<1x24x64xf32> to vector<24x64xf32>
    %24 = arith.truncf %23 : vector<24x64xf32> to vector<24x64xbf16>
    %c1_20 = arith.constant 1 : index
    %c0_21 = arith.constant 0 : index
    %c0_22 = arith.constant 0 : index
    %c0_23 = arith.constant 0 : index
    %25 = vector.load %arg3[%c1_20, %c0_21, %c0_22, %c0_23] : memref<3x3x64x64xbf16, #tpu.memory_space<vmem>>, vector<1x1x64x64xbf16>
    %26 = vector.shape_cast %25 : vector<1x1x64x64xbf16> to vector<64x64xbf16>
    %cst_24 = arith.constant dense<0.000000e+00> : vector<24x64xf32>
    %27 = tpu.matmul %24, %26, %cst_24 {dimension_numbers = #tpu.dot_dimension_numbers<[1], [0], [0], [1], [0, 0, 1, 1], [], []>} : vector<24x64xbf16>, vector<64x64xbf16>, vector<24x64xf32> -> vector<24x64xf32>
    %28 = arith.addf %21, %27 : vector<24x64xf32>
    %c0_25 = arith.constant 0 : index
    %c12 = arith.constant 12 : index
    %c0_26 = arith.constant 0 : index
    %29 = vector.load %arg1[%c0_25, %c12, %c0_26] : memref<1x48x64xf32, #tpu.memory_space<vmem>>, vector<1x24x64xf32>
    %30 = vector.shape_cast %29 : vector<1x24x64xf32> to vector<24x64xf32>
    %31 = arith.truncf %30 : vector<24x64xf32> to vector<24x64xbf16>
    %c1_27 = arith.constant 1 : index
    %c1_28 = arith.constant 1 : index
    %c0_29 = arith.constant 0 : index
    %c0_30 = arith.constant 0 : index
    %32 = vector.load %arg3[%c1_27, %c1_28, %c0_29, %c0_30] : memref<3x3x64x64xbf16, #tpu.memory_space<vmem>>, vector<1x1x64x64xbf16>
    %33 = vector.shape_cast %32 : vector<1x1x64x64xbf16> to vector<64x64xbf16>
    %cst_31 = arith.constant dense<0.000000e+00> : vector<24x64xf32>
    %34 = tpu.matmul %31, %33, %cst_31 {dimension_numbers = #tpu.dot_dimension_numbers<[1], [0], [0], [1], [0, 0, 1, 1], [], []>} : vector<24x64xbf16>, vector<64x64xbf16>, vector<24x64xf32> -> vector<24x64xf32>
    %35 = arith.addf %28, %34 : vector<24x64xf32>
    %c0_32 = arith.constant 0 : index
    %c13 = arith.constant 13 : index
    %c0_33 = arith.constant 0 : index
    %36 = vector.load %arg1[%c0_32, %c13, %c0_33] : memref<1x48x64xf32, #tpu.memory_space<vmem>>, vector<1x24x64xf32>
    %37 = vector.shape_cast %36 : vector<1x24x64xf32> to vector<24x64xf32>
    %38 = arith.truncf %37 : vector<24x64xf32> to vector<24x64xbf16>
    %c1_34 = arith.constant 1 : index
    %c2_35 = arith.constant 2 : index
    %c0_36 = arith.constant 0 : index
    %c0_37 = arith.constant 0 : index
    %39 = vector.load %arg3[%c1_34, %c2_35, %c0_36, %c0_37] : memref<3x3x64x64xbf16, #tpu.memory_space<vmem>>, vector<1x1x64x64xbf16>
    %40 = vector.shape_cast %39 : vector<1x1x64x64xbf16> to vector<64x64xbf16>
    %cst_38 = arith.constant dense<0.000000e+00> : vector<24x64xf32>
    %41 = tpu.matmul %38, %40, %cst_38 {dimension_numbers = #tpu.dot_dimension_numbers<[1], [0], [0], [1], [0, 0, 1, 1], [], []>} : vector<24x64xbf16>, vector<64x64xbf16>, vector<24x64xf32> -> vector<24x64xf32>
    %42 = arith.addf %35, %41 : vector<24x64xf32>
    %c0_39 = arith.constant 0 : index
    %c17 = arith.constant 17 : index
    %c0_40 = arith.constant 0 : index
    %43 = vector.load %arg1[%c0_39, %c17, %c0_40] : memref<1x48x64xf32, #tpu.memory_space<vmem>>, vector<1x24x64xf32>
    %44 = vector.shape_cast %43 : vector<1x24x64xf32> to vector<24x64xf32>
    %45 = arith.truncf %44 : vector<24x64xf32> to vector<24x64xbf16>
    %c2_41 = arith.constant 2 : index
    %c0_42 = arith.constant 0 : index
    %c0_43 = arith.constant 0 : index
    %c0_44 = arith.constant 0 : index
    %46 = vector.load %arg3[%c2_41, %c0_42, %c0_43, %c0_44] : memref<3x3x64x64xbf16, #tpu.memory_space<vmem>>, vector<1x1x64x64xbf16>
    %47 = vector.shape_cast %46 : vector<1x1x64x64xbf16> to vector<64x64xbf16>
    %cst_45 = arith.constant dense<0.000000e+00> : vector<24x64xf32>
    %48 = tpu.matmul %45, %47, %cst_45 {dimension_numbers = #tpu.dot_dimension_numbers<[1], [0], [0], [1], [0, 0, 1, 1], [], []>} : vector<24x64xbf16>, vector<64x64xbf16>, vector<24x64xf32> -> vector<24x64xf32>
    %49 = arith.addf %42, %48 : vector<24x64xf32>
    %c0_46 = arith.constant 0 : index
    %c18 = arith.constant 18 : index
    %c0_47 = arith.constant 0 : index
    %50 = vector.load %arg1[%c0_46, %c18, %c0_47] : memref<1x48x64xf32, #tpu.memory_space<vmem>>, vector<1x24x64xf32>
    %51 = vector.shape_cast %50 : vector<1x24x64xf32> to vector<24x64xf32>
    %52 = arith.truncf %51 : vector<24x64xf32> to vector<24x64xbf16>
    %c2_48 = arith.constant 2 : index
    %c1_49 = arith.constant 1 : index
    %c0_50 = arith.constant 0 : index
    %c0_51 = arith.constant 0 : index
    %53 = vector.load %arg3[%c2_48, %c1_49, %c0_50, %c0_51] : memref<3x3x64x64xbf16, #tpu.memory_space<vmem>>, vector<1x1x64x64xbf16>
    %54 = vector.shape_cast %53 : vector<1x1x64x64xbf16> to vector<64x64xbf16>
    %cst_52 = arith.constant dense<0.000000e+00> : vector<24x64xf32>
    %55 = tpu.matmul %52, %54, %cst_52 {dimension_numbers = #tpu.dot_dimension_numbers<[1], [0], [0], [1], [0, 0, 1, 1], [], []>} : vector<24x64xbf16>, vector<64x64xbf16>, vector<24x64xf32> -> vector<24x64xf32>
    %56 = arith.addf %49, %55 : vector<24x64xf32>
    %c0_53 = arith.constant 0 : index
    %c19 = arith.constant 19 : index
    %c0_54 = arith.constant 0 : index
    %57 = vector.load %arg1[%c0_53, %c19, %c0_54] : memref<1x48x64xf32, #tpu.memory_space<vmem>>, vector<1x24x64xf32>
    %58 = vector.shape_cast %57 : vector<1x24x64xf32> to vector<24x64xf32>
    %59 = arith.truncf %58 : vector<24x64xf32> to vector<24x64xbf16>
    %c2_55 = arith.constant 2 : index
    %c2_56 = arith.constant 2 : index
    %c0_57 = arith.constant 0 : index
    %c0_58 = arith.constant 0 : index
    %60 = vector.load %arg3[%c2_55, %c2_56, %c0_57, %c0_58] : memref<3x3x64x64xbf16, #tpu.memory_space<vmem>>, vector<1x1x64x64xbf16>
    %61 = vector.shape_cast %60 : vector<1x1x64x64xbf16> to vector<64x64xbf16>
    %cst_59 = arith.constant dense<0.000000e+00> : vector<24x64xf32>
    %62 = tpu.matmul %59, %61, %cst_59 {dimension_numbers = #tpu.dot_dimension_numbers<[1], [0], [0], [1], [0, 0, 1, 1], [], []>} : vector<24x64xbf16>, vector<64x64xbf16>, vector<24x64xf32> -> vector<24x64xf32>
    %63 = arith.addf %56, %62 : vector<24x64xf32>
    %c0_60 = arith.constant 0 : index
    %c0_61 = arith.constant 0 : index
    %64 = vector.load %arg4[%c0_60, %c0_61] : memref<1x64xf32, #tpu.memory_space<vmem>>, vector<1x64xf32>
    %65 = vector.broadcast %64 : vector<1x64xf32> to vector<24x64xf32>
    %66 = arith.mulf %63, %65 : vector<24x64xf32>
    %c0_62 = arith.constant 0 : index
    %c0_63 = arith.constant 0 : index
    %67 = vector.load %arg5[%c0_62, %c0_63] : memref<1x64xf32, #tpu.memory_space<vmem>>, vector<1x64xf32>
    %68 = vector.broadcast %67 : vector<1x64xf32> to vector<24x64xf32>
    %69 = arith.addf %66, %68 : vector<24x64xf32>
    %c0_64 = arith.constant 0 : index
    %c12_65 = arith.constant 12 : index
    %c0_66 = arith.constant 0 : index
    %70 = vector.load %arg2[%c0_64, %c12_65, %c0_66] : memref<1x48x64xf32, #tpu.memory_space<vmem>>, vector<1x24x64xf32>
    %71 = vector.shape_cast %70 : vector<1x24x64xf32> to vector<24x64xf32>
    %72 = arith.addf %69, %71 : vector<24x64xf32>
    %cst_67 = arith.constant 0.000000e+00 : f32
    %73 = vector.broadcast %cst_67 : f32 to vector<24x64xf32>
    %74 = arith.maximumf %72, %73 : vector<24x64xf32>
    %c0_68 = arith.constant 0 : index
    %c0_69 = arith.constant 0 : index
    %75 = vector.load %arg6[%c0_68, %c0_69] : memref<24x1xf32, #tpu.memory_space<vmem>>, vector<24x1xf32>
    %76 = vector.broadcast %75 : vector<24x1xf32> to vector<24x64xf32>
    %77 = arith.mulf %74, %76 : vector<24x64xf32>
    %cst_70 = arith.constant 0.000000e+00 : f32
    %78 = vector.broadcast %cst_70 : f32 to vector<48x64xf32>
    %c0_71 = arith.constant 0 : index
    %c0_72 = arith.constant 0 : index
    %c0_73 = arith.constant 0 : index
    %79 = vector.load %arg7[%c0_71, %c0_72, %c0_73] : memref<1x48x64xf32, #tpu.memory_space<vmem>>, vector<1x48x64xf32>
    %80 = vector.shape_cast %79 : vector<1x48x64xf32> to vector<48x64xf32>
    %81 = vector.shape_cast %78 : vector<48x64xf32> to vector<1x48x64xf32>
    tpu.vector_store %arg7[%c0_71, %c0_72, %c0_73], %81 {strides = array<i32>} : memref<1x48x64xf32, #tpu.memory_space<vmem>>, vector<1x48x64xf32>,
    %c0_74 = arith.constant 0 : index
    %c12_75 = arith.constant 12 : index
    %c0_76 = arith.constant 0 : index
    %82 = vector.load %arg7[%c0_74, %c12_75, %c0_76] : memref<1x48x64xf32, #tpu.memory_space<vmem>>, vector<1x24x64xf32>
    %83 = vector.shape_cast %82 : vector<1x24x64xf32> to vector<24x64xf32>
    %84 = vector.shape_cast %77 : vector<24x64xf32> to vector<1x24x64xf32>
    tpu.vector_store %arg7[%c0_74, %c12_75, %c0_76], %84 {strides = array<i32>} : memref<1x48x64xf32, #tpu.memory_space<vmem>>, vector<1x24x64xf32>,
    return
  }
  func.func @transform_0(%arg0: i32) -> (i32, i32, i32) {
    %c0_i32 = arith.constant 0 : i32
    %c0_i32_0 = arith.constant 0 : i32
    %c0_i32_1 = arith.constant 0 : i32
    return %arg0, %c0_i32, %c0_i32_0 : i32, i32, i32
  }
  func.func @transform_1(%arg0: i32) -> (i32, i32, i32) {
    %c0_i32 = arith.constant 0 : i32
    %c0_i32_0 = arith.constant 0 : i32
    %c0_i32_1 = arith.constant 0 : i32
    return %arg0, %c0_i32, %c0_i32_0 : i32, i32, i32
  }
  func.func @transform_2(%arg0: i32) -> (i32, i32, i32, i32) {
    %c0_i32 = arith.constant 0 : i32
    %c0_i32_0 = arith.constant 0 : i32
    %c0_i32_1 = arith.constant 0 : i32
    %c0_i32_2 = arith.constant 0 : i32
    %c0_i32_3 = arith.constant 0 : i32
    return %c0_i32, %c0_i32_0, %c0_i32_1, %c0_i32_2 : i32, i32, i32, i32
  }
  func.func @transform_3(%arg0: i32) -> (i32, i32) {
    %c0_i32 = arith.constant 0 : i32
    %c0_i32_0 = arith.constant 0 : i32
    %c0_i32_1 = arith.constant 0 : i32
    return %c0_i32, %c0_i32_0 : i32, i32
  }
  func.func @transform_4(%arg0: i32) -> (i32, i32) {
    %c0_i32 = arith.constant 0 : i32
    %c0_i32_0 = arith.constant 0 : i32
    %c0_i32_1 = arith.constant 0 : i32
    return %c0_i32, %c0_i32_0 : i32, i32
  }
  func.func @transform_5(%arg0: i32) -> (i32, i32) {
    %c0_i32 = arith.constant 0 : i32
    %c0_i32_0 = arith.constant 0 : i32
    %c0_i32_1 = arith.constant 0 : i32
    return %c0_i32, %c0_i32_0 : i32, i32
  }
  func.func @transform_6(%arg0: i32) -> (i32, i32, i32) {
    %c0_i32 = arith.constant 0 : i32
    %c0_i32_0 = arith.constant 0 : i32
    %c0_i32_1 = arith.constant 0 : i32
    return %arg0, %c0_i32, %c0_i32_0 : i32, i32, i32
  }
}

</mosaic_0001>

<bundles_post_ra>
// kernel: hlcdnet_forward.17
= control target key start
LH: loop header
LB: loop body
LE: loop exit
PB: predicated region body
PF: predicated region fallthrough
CT: control target
= control target key end

     0   :  { %s820_s9 = smov 0   ;;  %s1195_s0 = inlined_call_operand.vmem [shape: f32[4,4,18,18], index: 0, kind: input, shape index: {}]   ;;  %s1196_s1 = inlined_call_operand.vmem [shape: f32[4,3,16,16], index: 1, kind: output, shape index: {0}]   ;;  %s1197_s2 = inlined_call_operand.vmem [shape: f32[4,3,16,16], index: 2, kind: output, shape index: {1}]  }
   0x1 LB: > { %s767_s10 = sadd.s32 4294967295, %s800_s9   ;;  %p771_p0 = scmp.ge.s32.totalorder %s800_s9, 1  ;;  %s800_s9 = sphi %s820_s9, %s13_s9  }
   0x2   : > { %p115_p1 = scmp.lt.s32.totalorder %s800_s9, 5 }
   0x4   : > { %p116_p2 = pnand %p771_p0, %p115_p1 }
   0x5   : > { %p142_p3 = scmp.lt.s32.totalorder (!%p116_p2), %s767_s10, 3  ;;  %s802_s15 = smov (!%p116_p2), 127  }
   0x6   : > { %119 = sbr.rel (%p116_p2) target bundleno = 453 (0x1c5), region = 24  ;;  %s803_s16 = smov (!%p116_p2), 126  }
   0x7   : > { %s804_s17 = smov (!%p116_p2), 1  }
   0xb   : > { %s1199_s10 = smov (!%p142_p3, %s767_s10), 3  ;;  %vm285_vm0 = vcmask 1046528   ;;  %vm430_vm1 = vcmask 1045504   ;;  %vm603_vm6 = vcmask 1040384   ;;  %vm663_vm7 = vcmask 130048  }
   0xc   : > { %s777_s11 = smul.u32 96, %s1199_s10  ;;  %vm665_vm8 = vcmask 122880   ;;  %vm661_vm9 = vcmask 130049  }
   0xd   : > { %s778_s18 = smul.u32 48, %s1199_s10 }
   0xe   : > { %s834_s14 = scalar_lea.vmem %s1195_s0, %s777_s11 }
   0xf   : > { %v166_v0 = vld [vmem:[%s834_s14 + $0x48] sm:$0xff]  ;;  %v838_v1 = vld [vmem:[%s834_s14 + $0x18] sm:$0xff]  ;;  %v841_v2 = vld [vmem:[%s834_s14] sm:$0xff]  ;;  %s1154_s21 = scalar_lea.vmem %s1197_s2, %s778_s18  ;;  %s151_s24 = scalar_lea.vmem %s1196_s1, %s778_s18 }
  0x10   : > { %v843_v3 = vmul.f32 -2.0, %v166_v0  ;;  %v846_v4 = vmul.f32 0.123841405, %v838_v1  ;;  %v849_v5 = vmul.f32 0.123841405, %v841_v2  ;;  %v167_v6 = vld [vmem:[%s834_s14 + $0x50] sm:$0xff] }
  0x11   : > { %v859_v7 = vld [vmem:[%s834_s14 + $0x20] sm:$0xff]  ;;  %v862_v8 = vld [vmem:[%s834_s14 + $0x8] sm:$0xff]  ;;  %v864_v9 = vmul.f32 -2.0, %v167_v6  ;;  %v879_v12 = vld [vmem:[%s834_s14 + $0x30] sm:$0xff]  ;;  %v385_v14 = vmul.f32 2.0, %v166_v0  ;;  %v386_v15 = vmul.f32 2.0, %v167_v6 }
  0x12   : > { %189 = vrot.lane.b32.xlu0 %v843_v3, %s802_s15  ;;  %213 = vrot.lane.b32.xlu2 %v846_v4, %s802_s15  ;;  %v867_v10 = vmul.f32 0.123841405, %v859_v7  ;;  %v870_v11 = vmul.f32 0.123841405, %v862_v8  ;;  %v882_v13 = vmul.f32 0.123841405, %v879_v12 }
  0x13   : > { %209 = vrot.lane.b32.xlu1 %v849_v5, %s802_s15  ;;  %v391_v16 = vrot.slane %v385_v14, 1  ;;  %v392_v17 = vrot.slane %v386_v15, 1  ;;  %v889_v18 = vld [vmem:[%s834_s14 + $0x58] sm:$0x3]  ;;  %v891_v19 = vmul.f32 -1.0, %v166_v0  ;;  %v894_v21 = vmul.f32 -1.0, %v167_v6 }
  0x14   : > { %v387_v22 = vmul.f32 2.0, %v889_v18  ;;  %v484_v24 = vrot.slane %v386_v15, 2  ;;  %v483_v26 = vrot.slane %v385_v14, 2  ;;  %v441_v30 = vrot.slane %v166_v0, 2  ;;  %v909_v32 = vld [vmem:[%s834_s14 + $0x38] sm:$0xff] }
  0x15   : > { %v393_v20 = vsel %vm285_vm0, %v391_v16, %v392_v17  ;;  %v442_v31 = vrot.slane %v167_v6, 2  ;;  %v444_v33 = vrot.slane %v889_v18, 2  ;;  %v913_v34 = vmul.f32 0.123841405, %v909_v32  ;;  %v958_v47 = vld [vmem:[%s834_s14 + $0x10] sm:$0x3] }
  0x16   : > { %v394_v23 = vrot.slane %v387_v22, 1  ;;  %v486_v25 = vrot.slane %v387_v22, 2  ;;  %v485_v29 = vsel %vm430_vm1, %v483_v26, %v484_v24  ;;  %v306_v37 = vrot.slane %v846_v4, 1  ;;  %v978_v60 = vld [vmem:[%s834_s14 + $0x40] sm:$0x3] }
  0x17   : > { %v916_v35 = vsel %vm430_vm1, %v441_v30, %v442_v31  ;;  %v919_v36 = vsel %vm430_vm1, %v442_v31, %v444_v33  ;;  %v307_v38 = vrot.slane %v867_v10, 1  ;;  %v935_v40 = vmul.f32 0.07511361, %v838_v1  ;;  %v981_v61 = vld [vmem:[%s834_s14 + $0x28] sm:$0x3] }
  0x18   : > { %v395_v27 = vsel %vm285_vm0, %v392_v17, %v394_v23  ;;  %v487_v28 = vsel %vm430_vm1, %v484_v24, %v486_v25  ;;  %v938_v41 = vmul.f32 0.07511361, %v841_v2  ;;  %v941_v42 = vmul.f32 0.07511361, %v862_v8 }
  0x19   : > { %v932_v39 = vsel %vm285_vm0, %v306_v37, %v307_v38  ;;  %v302_v43 = vrot.slane %v870_v11, 1  ;;  %v301_v44 = vrot.slane %v849_v5, 1  ;;  %v955_v46 = vmul.f32 0.07511361, %v909_v32 }
  0x1a   : > { %191 = vrot.lane.b32.xlu0 %v864_v9, %s802_s15  ;;  %215 = vrot.lane.b32.xlu2 %v867_v10, %s802_s15  ;;  %v961_v48 = vmul.f32 0.07511361, %v859_v7  ;;  %v331_v49 = vmul.f32 0.20417996, %v838_v1  ;;  %v332_v50 = vmul.f32 0.20417996, %v859_v7 }
  0x1b   : > { %211 = vrot.lane.b32.xlu1 %v870_v11, %s802_s15  ;;  %v950_v45 = vsel %vm285_vm0, %v301_v44, %v302_v43  ;;  %v966_v51 = vmul.f32 0.07511361, %v879_v12  ;;  %v329_v52 = vmul.f32 0.20417996, %v862_v8  ;;  %v328_v53 = vmul.f32 0.20417996, %v841_v2 }
  0x1c   : > { %v330_v54 = vmul.f32 0.20417996, %v958_v47  ;;  %v351_v55 = vrot.slane %v331_v49, 1  ;;  %v352_v56 = vrot.slane %v332_v50, 1  ;;  %v333_v14 = vmul.f32 0.20417996, %v981_v61 }
  0x1d   : > { %v347_v57 = vrot.slane %v329_v52, 1  ;;  %v346_v58 = vrot.slane %v328_v53, 1  ;;  %v334_v16 = vmul.f32 0.20417996, %v879_v12  ;;  %v497_v17 = vrot.slane %v870_v11, 2 }
  0x1e   : > { %v349_v59 = vrot.slane %v330_v54, 1  ;;  %v353_v62 = vsel %vm285_vm0, %v351_v55, %v352_v56  ;;  %v354_v25 = vrot.slane %v333_v14, 1  ;;  %v1004_v30 = vmul.f32 0.123841405, %v978_v60 }
  0x1f   : > { %v348_v63 = vsel %vm285_vm0, %v346_v58, %v347_v57  ;;  %v356_v26 = vrot.slane %v334_v16, 1  ;;  %v1007_v31 = vmul.f32 0.123841405, %v981_v61  ;;  %v312_v37 = vrot.slane %v913_v34, 1 }
  0x20   : > { %v350_v15 = vsel %vm285_vm0, %v347_v57, %v349_v59  ;;  %v314_v44 = vrot.slane %v1004_v30, 1  ;;  %v311_v50 = vrot.slane %v882_v13, 1  ;;  %v501_v54 = vrot.slane %v846_v4, 2 }
  0x21   : > { %v309_v49 = vrot.slane %v1007_v31, 1  ;;  %v502_v55 = vrot.slane %v867_v10, 2  ;;  %v286_v59 = vrot.slane %v843_v3, 1 }
  0x22   : > { %217 = vrot.lane.b32.xlu0 %v882_v13, %s802_s15  ;;  %237 = vrot.lane.b32.xlu2 %v167_v6, %s803_s16  ;;  %v336_v6 = vmul.f32 0.20417996, %v978_v60  ;;  %v1029_v53 = vsel %vm285_vm0, %v311_v50, %v312_v37  ;;  %v428_v50 = vmul.f32 -1.0, %v889_v18 }
  0x23   : > { %235 = vrot.lane.b32.xlu1 %v166_v0, %s803_s16  ;;  %v335_v0 = vmul.f32 0.20417996, %v909_v32  ;;  %v1026_v52 = vsel %vm285_vm0, %v307_v38, %v309_v49  ;;  %v503_v38 = vsel %vm430_vm1, %v501_v54, %v502_v55 }
  0x24   : > { %v359_v24 = vrot.slane %v336_v6, 1 }
  0x25   : > { %v357_v23 = vrot.slane %v335_v0, 1 }
  0x27   : > { %v358_v11 = vsel %vm285_vm0, %v356_v26, %v357_v23 }
  0x2a   : > { %245 = vrot.lane.b32.xlu0 %v891_v19, %s803_s16  ;;  %396 = vrot.lane.b32.xlu2 %v393_v20, %s803_s16  ;;  %v496_v20 = vrot.slane %v849_v5, 2  ;;  %v295_v5 = vmul.f32 0.123841405, %v958_v47 }
  0x2b   : > { %247 = vrot.lane.b32.xlu1 %v894_v21, %s803_s16 }
  0x2c   : > { %v498_v22 = vsel %vm430_vm1, %v496_v20, %v497_v17  ;;  %v499_v57 = vrot.slane %v295_v5, 2 }
  0x2e   : > { %v500_v58 = vsel %vm430_vm1, %v497_v17, %v499_v57 }
  0x32   : > { %398 = vrot.lane.b32.xlu0 %v395_v27, %s803_s16  ;;  %490 = vrot.lane.b32.xlu2 %v487_v28, %s802_s15  ;;  %v360_v27 = vsel %vm285_vm0, %v357_v23, %v359_v24  ;;  %v355_v28 = vsel %vm285_vm0, %v352_v56, %v354_v25 }
  0x33   : > { %488 = vrot.lane.b32.xlu1 %v485_v29, %s802_s15  ;;  %v304_v29 = vrot.slane %v295_v5, 1 }
  0x35   : > { %v1010_v33 = vsel %vm285_vm0, %v302_v43, %v304_v29  ;;  %v315_v43 = vsel %vm285_vm0, %v312_v37, %v314_v44 }
  0x3a   : > { %535 = vrot.lane.b32.xlu0 %v916_v35, %s803_s16  ;;  %219 = vrot.lane.b32.xlu2 %v913_v34, %s802_s15 }
  0x3b   : > { %537 = vrot.lane.b32.xlu1 %v919_v36, %s803_s16 }
  0x42   : > { %263 = vrot.lane.b32.xlu2 %v935_v40, %s803_s16  ;;  %259 = vrot.lane.b32.xlu0 %v938_v41, %s803_s16 }
  0x43   : > { %261 = vrot.lane.b32.xlu1 %v941_v42, %s803_s16 }
  0x4a   : > { %269 = vrot.lane.b32.xlu2 %v955_v46, %s803_s16  ;;  %265 = vrot.lane.b32.xlu0 %v961_v48, %s803_s16 }
  0x4b   : > { %267 = vrot.lane.b32.xlu1 %v966_v51, %s803_s16 }
  0x52   : > { %365 = vrot.lane.b32.xlu2 %v353_v62, %s802_s15  ;;  %361 = vrot.lane.b32.xlu0 %v348_v63, %s802_s15  ;;  %v287_v62 = vrot.slane %v864_v9, 1 }
  0x53   : > { %363 = vrot.lane.b32.xlu1 %v350_v15, %s802_s15 }
  0x54   : > { %v288_v63 = vsel %vm285_vm0, %v286_v59, %v287_v62 }
  0x5a   : > { %371 = vrot.lane.b32.xlu2 %v360_v27, %s802_s15  ;;  %367 = vrot.lane.b32.xlu0 %v355_v28, %s802_s15 }
  0x5b   : > { %369 = vrot.lane.b32.xlu1 %v358_v11, %s802_s15 }
  0x62   : > { %408 = vrot.lane.b32.xlu2 %v932_v39, %s803_s16  ;;  %404 = vrot.lane.b32.xlu0 %v950_v45, %s803_s16 }
  0x63   : > { %406 = vrot.lane.b32.xlu1 %v1010_v33, %s803_s16 }
  0x6a   : > { %414 = vrot.lane.b32.xlu2 %v315_v43, %s803_s16  ;;  %410 = vrot.lane.b32.xlu0 %v1026_v52, %s803_s16 }
  0x6b   : > { %412 = vrot.lane.b32.xlu1 %v1029_v53, %s803_s16 }
  0x6c   : > { %v214_v56 = vpop.permute.xlu2 %213 }
  0x6d   : > { %v229_v24 = vadd.f32 %v214_v56, %v935_v40 }
  0x72   : > { %515 = vrot.lane.b32.xlu2 %v503_v38, %s802_s15  ;;  %511 = vrot.lane.b32.xlu0 %v498_v22, %s802_s15  ;;  %v283_v22 = vmul.f32 -2.0, %v889_v18 }
  0x73   : > { %513 = vrot.lane.b32.xlu1 %v500_v58, %s802_s15  ;;  %v432_v58 = vrot.slane %v894_v21, 2 }
  0x74   : > { %v1047_v4 = vpop.permute.xlu2 %215  ;;  %v289_v11 = vrot.slane %v283_v22, 1 }
  0x76   : > { %v290_v49 = vsel %vm285_vm0, %v287_v62, %v289_v11 }
  0x7c   : > { %v238_v0 = vpop.permute.xlu2 %237 }
  0x7d   : > { %v242_v37 = vadd.f32 %v238_v0, %v894_v21 }
  0x84   : > { %v190_v6 = vpop.permute.xlu0 %189  ;;  %v397_v14 = vpop.permute.xlu2 %396 }
  0x85   : > { %v1050_v15 = vpop.permute.xlu1 %209  ;;  %v195_v56 = vadd.f32 %v190_v6, %v891_v19 }
  0x8c   : > { %v192_v16 = vpop.permute.xlu0 %191  ;;  %v491_v17 = vpop.permute.xlu2 %490 }
  0x8d   : > { %v1052_v3 = vpop.permute.xlu1 %211  ;;  %v196_v54 = vadd.f32 %v192_v16, %v894_v21 }
  0x94   : > { %v1054_v9 = vpop.permute.xlu0 %217  ;;  %v220_v20 = vpop.permute.xlu2 %219 }
  0x95   : > { %v236_v23 = vpop.permute.xlu1 %235  ;;  %v232_v44 = vadd.f32 %v220_v20, %v955_v46 }
  0x96   : > { %v241_v5 = vadd.f32 %v236_v23, %v891_v19  ;;  %v294_v23 = vadd.f32 %v290_v49, %v242_v37 }
  0x98   : > { %v293_v57 = vadd.f32 %v288_v63, %v241_v5 }
  0x9a   : > { %v402_v62 = vadd.f32 %v397_v14, %v293_v57 }
  0x9c   : > { %v246_v25 = vpop.permute.xlu0 %245  ;;  %v264_v26 = vpop.permute.xlu2 %263 }
  0x9d   : > { %v279_v27 = vadd.f32 %v264_v26, %v229_v24  ;;  %v248_v28 = vpop.permute.xlu1 %247  ;;  %v251_v0 = vadd.f32 %v246_v25, %v195_v56  ;;  %v434_v24 = vrot.slane %v428_v50, 2 }
  0x9e   : > { %v252_v38 = vadd.f32 %v248_v28, %v196_v54 }
  0x9f   : > { %v324_v29 = vadd.f32 %v932_v39, %v279_v27  ;;  %v431_v39 = vrot.slane %v891_v19, 2  ;;  %v435_v6 = vsel %vm430_vm1, %v432_v58, %v434_v24  ;;  %v448_v21 = vadd.f32 %v916_v35, %v251_v0 }
  0xa0   : > { %v449_v18 = vadd.f32 %v919_v36, %v252_v38 }
  0xa1   : > { %v433_v63 = vsel %vm430_vm1, %v431_v39, %v432_v58 }
  0xa2   : > { %v438_v11 = vadd.f32 %v433_v63, %v402_v62  ;;  %v495_v37 = vadd.f32 %v491_v17, %v449_v18  ;;  %v461_v17 = vrot.slane %v935_v40, 2 }
  0xa4   : > { %v399_v59 = vpop.permute.xlu0 %398  ;;  %v270_v22 = vpop.permute.xlu2 %269 }
  0xa5   : > { %v282_v20 = vadd.f32 %v270_v22, %v232_v44  ;;  %v489_v26 = vpop.permute.xlu1 %488  ;;  %v403_v16 = vadd.f32 %v399_v59, %v294_v23  ;;  %v462_v22 = vrot.slane %v961_v48, 2 }
  0xa6   : > { %v494_v28 = vadd.f32 %v489_v26, %v448_v21 }
  0xa7   : > { %v1068_v27 = vadd.f32 %v315_v43, %v282_v20  ;;  %v439_v5 = vadd.f32 %v435_v6, %v403_v16  ;;  %v1083_v16 = vsel %vm430_vm1, %v461_v17, %v462_v22 }
  0xac   : > { %v536_v19 = vpop.permute.xlu0 %535  ;;  %v366_v25 = vpop.permute.xlu2 %365 }
  0xad   : > { %v541_v44 = vadd.f32 %v536_v19, %v438_v11  ;;  %v543_v49 = vadd.f32 %v536_v19, %v494_v28  ;;  %v538_v14 = vpop.permute.xlu1 %537  ;;  %v381_v20 = vadd.f32 %v366_v25, %v324_v29 }
  0xae   : > { %v542_v43 = vadd.f32 %v538_v14, %v439_v5  ;;  %v544_v50 = vadd.f32 %v538_v14, %v495_v37 }
  0xaf   : > { %v569_v54 = vmul.f32 %v541_v44, %v541_v44  ;;  %v571_v36 = vmul.f32 %v543_v49, %v543_v49 }
  0xb0   : > { %v570_v56 = vmul.f32 %v542_v43, %v542_v43  ;;  %v572_v57 = vmul.f32 %v544_v50, %v544_v50 }
  0xb1   : > { %v573_v38 = vadd.f32 %v571_v36, %v569_v54 }
  0xb2   : > { %v574_v59 = vadd.f32 %v572_v57, %v570_v56 }
  0xb3   : > { %790 = vrsqrt.f32 %v573_v38  ;;  %vm582_vm2 = vcmp.eq.f32.partialorder %v573_v38, inf  ;;  %v585_v43 = vand.u32 2147483648, %v573_v38  ;;  %vm584_vm3 = vcmp.eq.f32.partialorder %v573_v38, 0.0 }
  0xb4   : > { %792 = vrsqrt.f32 %v574_v59  ;;  %v1074_v35 = vpop.permute.xlu2 %371  ;;  %v260_v58 = vpop.permute.xlu0 %259  ;;  %vm594_vm4 = vcmp.eq.f32.partialorder %v574_v59, inf  ;;  %v597_v36 = vand.u32 2147483648, %v574_v59  ;;  %vm596_vm5 = vcmp.eq.f32.partialorder %v574_v59, 0.0 }
  0xb5   : > { %v262_v23 = vpop.permute.xlu1 %261 }
  0xb9   : > { %v791_v39 = vpop.eup %790 }
  0xba   : > { %v793_v0 = vpop.eup %792  ;;  %v576_v24 = vmul.f32 %v791_v39, %v573_v38 }
  0xbb   : > { %v588_v26 = vmul.f32 %v793_v0, %v574_v59 }
  0xbc   : > { %v409_v62 = vpop.permute.xlu2 %408  ;;  %v1078_v18 = vpop.permute.xlu0 %265  ;;  %v577_v63 = vmul.f32 %v791_v39, %v576_v24 }
  0xbd   : > { %v424_v6 = vadd.f32 %v409_v62, %v381_v20  ;;  %v1085_v21 = vpop.permute.xlu1 %267  ;;  %v589_v28 = vmul.f32 %v793_v0, %v588_v26  ;;  %v228_v62 = vadd.f32 %v1052_v3, %v941_v42  ;;  %v457_v3 = vrot.slane %v941_v42, 2 }
  0xbe   : > { %v578_v11 = vmul.f32 0.5, %v577_v63  ;;  %v506_v63 = vrot.slane %v882_v13, 2 }
  0xbf   : > { %v1088_v40 = vadd.f32 %v1083_v16, %v424_v6  ;;  %v590_v5 = vmul.f32 0.5, %v589_v28 }
  0xc0   : > { %v579_v29 = vsub.f32 1.5, %v578_v11  ;;  %v507_v11 = vrot.slane %v913_v34, 2 }
  0xc1   : > { %v591_v19 = vsub.f32 1.5, %v590_v5  ;;  %v450_v5 = vmul.f32 0.07511361, %v958_v47 }
  0xc2   : > { %v580_v25 = vmul.f32 %v791_v39, %v579_v29  ;;  %v227_v39 = vadd.f32 %v1050_v15, %v938_v41  ;;  %v278_v29 = vadd.f32 %v262_v23, %v228_v62  ;;  %v504_v15 = vrot.slane %v1007_v31, 2 }
  0xc3   : > { %v592_v37 = vmul.f32 %v793_v0, %v591_v19  ;;  %v509_v19 = vrot.slane %v1004_v30, 2  ;;  %v230_v31 = vadd.f32 %v1047_v4, %v961_v48 }
  0xc4   : > { %v362_v44 = vpop.permute.xlu0 %361  ;;  %v581_v49 = vmul.f32 %v580_v25, %v573_v38  ;;  %v277_v6 = vadd.f32 %v260_v58, %v227_v39  ;;  %v456_v25 = vrot.slane %v938_v41, 2  ;;  %v508_v58 = vsel %vm430_vm1, %v506_v63, %v507_v11 }
  0xc5   : > { %v364_v14 = vpop.permute.xlu1 %363  ;;  %v593_v50 = vmul.f32 %v592_v37, %v574_v59  ;;  %v459_v37 = vrot.slane %v450_v5, 2  ;;  %v505_v34 = vsel %vm430_vm1, %v502_v55, %v504_v15  ;;  %v510_v30 = vsel %vm430_vm1, %v507_v11, %v509_v19 }
  0xc6   : > { %v583_v54 = vsel %vm582_vm2, %v573_v38, %v581_v49  ;;  %v322_v13 = vadd.f32 %v950_v45, %v277_v6  ;;  %v323_v49 = vadd.f32 %v1010_v33, %v278_v29  ;;  %v231_v41 = vadd.f32 %v1054_v9, %v966_v51 }
  0xc7   : > { %v586_v56 = vsel %vm584_vm3, %v585_v43, %v583_v54  ;;  %v595_v57 = vsel %vm594_vm4, %v574_v59, %v593_v50  ;;  %v458_v43 = vsel %vm430_vm1, %v456_v25, %v457_v3  ;;  %v451_v33 = vmul.f32 0.07511361, %v981_v61 }
  0xc8   : > { %v599_v17 = vadd.f32 1.0, %v586_v56  ;;  %v598_v24 = vsel %vm596_vm5, %v597_v36, %v595_v57  ;;  %v379_v23 = vadd.f32 %v362_v44, %v322_v13  ;;  %v380_v42 = vadd.f32 %v364_v14, %v323_v49 }
  0xc9   : > { %v600_v20 = vadd.f32 1.0, %v598_v24  ;;  %v280_v10 = vadd.f32 %v1078_v18, %v230_v31  ;;  %v460_v44 = vsel %vm430_vm1, %v457_v3, %v459_v37  ;;  %v281_v50 = vadd.f32 %v1085_v21, %v231_v41 }
  0xca   : > { %v604_v26 = vrot.slane %v599_v17, 7  ;;  %v464_v36 = vrot.slane %v451_v33, 2  ;;  %v466_v18 = vrot.slane %v966_v51, 2  ;;  %v467_v57 = vrot.slane %v955_v46, 2 }
  0xcb   : > { %v605_v0 = vrot.slane %v600_v20, 7  ;;  %v325_v56 = vadd.f32 %v1026_v52, %v280_v10  ;;  %v326_v17 = vadd.f32 %v1029_v53, %v281_v50  ;;  %v452_v20 = vmul.f32 0.07511361, %v978_v60 }
  0xcc   : > { %607 = vrot.lane.b32.xlu1 %v604_v26, %s804_s17  ;;  %v368_v38 = vpop.permute.xlu0 %367  ;;  %v465_v39 = vsel %vm430_vm1, %v462_v22, %v464_v36  ;;  %v468_v51 = vsel %vm430_vm1, %v466_v18, %v467_v57  ;;  %v384_v63 = vadd.f32 %v1074_v35, %v1068_v27  ;;  %v415_v22 = vpop.permute.xlu2 %414 }
  0xcd   : > { %v370_v28 = vpop.permute.xlu1 %369  ;;  %611 = vrot.lane.b32.xlu0 %v605_v0, %s804_s17  ;;  %v606_v59 = vsel %vm603_vm6, %v604_v26, %v605_v0  ;;  %v382_v24 = vadd.f32 %v368_v38, %v325_v56  ;;  %v469_v52 = vrot.slane %v452_v20, 2 }
  0xce   : > { %609 = vrot.lane.b32.xlu2 %v606_v59, %s804_s17  ;;  %v383_v21 = vadd.f32 %v370_v28, %v326_v17  ;;  %v427_v6 = vadd.f32 %v415_v22, %v384_v63 }
  0xcf   : > { %v470_v48 = vsel %vm430_vm1, %v467_v57, %v469_v52 }
  0xd0   : > { %v482_v28 = vadd.f32 %v470_v48, %v427_v6 }
  0xd4   : > { %519 = vrot.lane.b32.xlu1 %v508_v58, %s802_s15  ;;  %v405_v45 = vpop.permute.xlu0 %404 }
  0xd5   : > { %v407_v55 = vpop.permute.xlu1 %406  ;;  %517 = vrot.lane.b32.xlu0 %v505_v34, %s802_s15  ;;  %v422_v4 = vadd.f32 %v405_v45, %v379_v23 }
  0xd6   : > { %v423_v54 = vadd.f32 %v407_v55, %v380_v42  ;;  %521 = vrot.lane.b32.xlu2 %v510_v30, %s802_s15 }
  0xd7   : > { %v1120_v9 = vadd.f32 %v458_v43, %v422_v4 }
  0xd8   : > { %v1122_v14 = vadd.f32 %v460_v44, %v423_v54 }
  0xdc   : > { %547 = vrot.lane.b32.xlu1 %v460_v44, %s803_s16  ;;  %v411_v26 = vpop.permute.xlu0 %410 }
  0xdd   : > { %v413_v0 = vpop.permute.xlu1 %412  ;;  %v425_v62 = vadd.f32 %v411_v26, %v382_v24  ;;  %545 = vrot.lane.b32.xlu0 %v458_v43, %s803_s16 }
  0xde   : > { %v426_v46 = vadd.f32 %v413_v0, %v383_v21  ;;  %549 = vrot.lane.b32.xlu2 %v1083_v16, %s803_s16  ;;  %v516_v16 = vpop.permute.xlu2 %515 }
  0xdf   : > { %v480_v53 = vadd.f32 %v465_v39, %v425_v62  ;;  %v531_v29 = vadd.f32 %v516_v16, %v1088_v40 }
  0xe0   : > { %v481_v38 = vadd.f32 %v468_v51, %v426_v46 }
  0xe4   : > { %553 = vrot.lane.b32.xlu1 %v468_v51, %s803_s16  ;;  %v512_v15 = vpop.permute.xlu0 %511 }
  0xe5   : > { %551 = vrot.lane.b32.xlu0 %v465_v39, %s803_s16  ;;  %v514_v35 = vpop.permute.xlu1 %513 }
  0xe6   : > { %555 = vrot.lane.b32.xlu2 %v470_v48, %s803_s16 }
 0x128   : > { %v610_v59 = vpop.permute.xlu2 %609 }
 0x129   : > { %v617_v11 = vmul.f32 %v610_v59, %v862_v8  ;;  %v620_v27 = vmul.f32 %v610_v59, %v859_v7  ;;  %v623_v19 = vmul.f32 %v610_v59, %v909_v32 }
 0x12b   : > { %636 = vrot.lane.b32.xlu1 %v617_v11, %s802_s15 }
 0x130   : > { %v522_v5 = vpop.permute.xlu2 %521 }
 0x131   : > { %v534_v40 = vadd.f32 %v522_v5, %v482_v28 }
 0x133   : > { %642 = vrot.lane.b32.xlu1 %v620_v27, %s802_s15 }
 0x138   : > { %v550_v8 = vpop.permute.xlu2 %549 }
 0x139   : > { %v565_v7 = vadd.f32 %v550_v8, %v531_v29 }
 0x13b   : > { %675 = vst.msk [vmem:[%s1154_s21 + $0x10] sm:$0xff] %vm663_vm7, %v565_v7  ;;  %648 = vrot.lane.b32.xlu1 %v623_v19, %s802_s15 }
 0x13e   : > { %v608_v3 = vpop.permute.xlu1 %607 }
 0x13f   : > { %v616_v25 = vmul.f32 %v608_v3, %v841_v2  ;;  %v612_v13 = vpop.permute.xlu0 %611  ;;  %v619_v34 = vmul.f32 %v608_v3, %v838_v1  ;;  %v530_v2 = vadd.f32 %v514_v35, %v1122_v14  ;;  %v622_v41 = vmul.f32 %v608_v3, %v879_v12 }
 0x140   : > { %v618_v58 = vmul.f32 %v612_v13, %v958_v47  ;;  %v556_v37 = vpop.permute.xlu2 %555  ;;  %v621_v23 = vmul.f32 %v612_v13, %v981_v61  ;;  %v529_v47 = vadd.f32 %v512_v15, %v1120_v9  ;;  %v624_v1 = vmul.f32 %v612_v13, %v978_v60 }
 0x141   : > { %v568_v49 = vadd.f32 %v556_v37, %v534_v40  ;;  %634 = vrot.lane.b32.xlu0 %v616_v25, %s802_s15 }
 0x142   : > { %638 = vrot.lane.b32.xlu2 %v618_v58, %s802_s15 }
 0x143   : > { %678 = vst.msk [vmem:[%s1154_s21 + $0x28] sm:$0xff] %vm663_vm7, %v568_v49 }
 0x146   : > { %v520_v32 = vpop.permute.xlu1 %519 }
 0x147   : > { %v518_v31 = vpop.permute.xlu0 %517  ;;  %v533_v61 = vadd.f32 %v520_v32, %v481_v38 }
 0x148   : > { %v532_v33 = vadd.f32 %v518_v31, %v480_v53 }
 0x149   : > { %640 = vrot.lane.b32.xlu0 %v619_v34, %s802_s15 }
 0x14a   : > { %644 = vrot.lane.b32.xlu2 %v621_v23, %s802_s15 }
 0x14e   : > { %v548_v30 = vpop.permute.xlu1 %547 }
 0x14f   : > { %v564_v42 = vadd.f32 %v548_v30, %v530_v2  ;;  %v546_v45 = vpop.permute.xlu0 %545 }
 0x150   : > { %v563_v43 = vadd.f32 %v546_v45, %v529_v47 }
 0x151   : > { %674 = vst.msk [vmem:[%s1154_s21 + $0x8] sm:$0xff] %vm663_vm7, %v564_v42  ;;  %646 = vrot.lane.b32.xlu0 %v622_v41, %s802_s15 }
 0x152   : > { %673 = vst.msk [vmem:[%s1154_s21] sm:$0xff] %vm663_vm7, %v563_v43  ;;  %650 = vrot.lane.b32.xlu2 %v624_v1, %s802_s15 }
 0x156   : > { %v554_v10 = vpop.permute.xlu1 %553 }
 0x157   : > { %v567_v55 = vadd.f32 %v554_v10, %v533_v61  ;;  %v552_v12 = vpop.permute.xlu0 %551 }
 0x158   : > { %v566_v4 = vadd.f32 %v552_v12, %v532_v33 }
 0x159   : > { %677 = vst.msk [vmem:[%s1154_s21 + $0x20] sm:$0xff] %vm663_vm7, %v567_v55 }
 0x15a   : > { %676 = vst.msk [vmem:[%s1154_s21 + $0x18] sm:$0xff] %vm663_vm7, %v566_v4 }
 0x19c   : > { %v639_v60 = vpop.permute.xlu2 %638 }
 0x19d   : > { %666 = vst.msk [vmem:[%s151_s24 + $0xf] sm:$0x1] %vm665_vm8, %v639_v60  ;;  %v637_v44 = vpop.permute.xlu1 %636 }
 0x19e   : > { %664 = vst.msk [vmem:[%s151_s24 + $0x7] sm:$0xff] %vm663_vm7, %v637_v44 }
 0x1a4   : > { %v645_v50 = vpop.permute.xlu2 %644 }
 0x1a5   : > { %669 = vst.msk [vmem:[%s151_s24 + $0x1f] sm:$0x1] %vm665_vm8, %v645_v50  ;;  %v643_v54 = vpop.permute.xlu1 %642 }
 0x1a6   : > { %668 = vst.msk [vmem:[%s151_s24 + $0x17] sm:$0xff] %vm663_vm7, %v643_v54 }
 0x1ac   : > { %v651_v9 = vpop.permute.xlu2 %650 }
 0x1ad   : > { %672 = vst.msk [vmem:[%s151_s24 + $0x2f] sm:$0x1] %vm665_vm8, %v651_v9  ;;  %v649_v14 = vpop.permute.xlu1 %648 }
 0x1ae   : > { %671 = vst.msk [vmem:[%s151_s24 + $0x27] sm:$0xff] %vm663_vm7, %v649_v14 }
 0x1b3   : > { %v635_v36 = vpop.permute.xlu0 %634 }
 0x1b4   : > { %662 = vst.msk [vmem:[%s151_s24 - $0x1] sm:$0xfe] %vm661_vm9, %v635_v36 }
 0x1bb   : > { %v641_v56 = vpop.permute.xlu0 %640 }
 0x1bc   : > { %667 = vst.msk [vmem:[%s151_s24 + $0xf] sm:$0xfe] %vm661_vm9, %v641_v56 }
 0x1c3   : > { %v647_v18 = vpop.permute.xlu0 %646 }
 0x1c4   : > { %670 = vst.msk [vmem:[%s151_s24 + $0x1f] sm:$0xfe] %vm661_vm9, %v647_v18 }
 0x1c5 PF: > { %s13_s9 = sadd.s32 1, %s800_s9  }
 0x1c6   : > { %p10_p4 = scmp.ge.s32.totalorder %s13_s9, 6  }
 0x1c8   :  { %12 = sbr.rel (!%p10_p4) target bundleno = 1 (0x1), region = 66 }

// kernel: hlcdnet_forward.26
= control target key start
LH: loop header
LB: loop body
LE: loop exit
PB: predicated region body
PF: predicated region fallthrough
CT: control target
= control target key end

     0   :  { %vm319_vm0 = vcmask 1040384   ;;  %vm320_vm1 = vcmask 1041408   ;;  %v879_v2 = vmov 65535   ;;  %vm270_vm2 = vcmask 154624   ;;  %s1351_s1 = inlined_call_operand.vmem [shape: bf16[147,64], index: 1, kind: input, shape index: {}]   ;;  %s1352_s0 = inlined_call_operand.vmem [shape: bf16[256,147], index: 0, kind: input, shape index: {}]   ;;  %s1353_s2 = inlined_call_operand.vmem [shape: f32[1,64], index: 2, kind: input, shape index: {}]   ;;  %s1354_s3 = inlined_call_operand.vmem [shape: f32[1,64], index: 3, kind: input, shape index: {}]   ;;  %s1355_s4 = inlined_call_operand.vmem [shape: f32[256,64], index: 4, kind: output, shape index: {}]  }
   0x1   :  { %v864_v0 = vld [vmem:[%s1351_s1 + $0x38] sm:$0xff]  ;;  %v68_v1 = vld [vmem:[%s1351_s1 + $0x48] sm:$0x3]  ;;  %v321_v3 = vsel %vm319_vm0, 4294967295, %v879_v2  ;;  %v863_v5 = vld [vmem:[%s1351_s1 + $0x30] sm:$0xff]  ;;  %vm608_vm3 = vcmask 523264  }
   0x2   :  { %v250_v4 = vunpack.c.l.b16 %v68_v1  ;;  %326 = vmatpush.bf16.msra.mxu0 %v864_v0  ;;  %866 = vmatpush.bf16.msra.mxu2 %v864_v0  ;;  %v322_v6 = vsel %vm320_vm1, %v321_v3, 0  ;;  %v862_v9 = vld [vmem:[%s1351_s1 + $0x28] sm:$0xff]  ;;  %v865_v10 = vld [vmem:[%s1351_s1 + $0x40] sm:$0xff]  ;;  %v843_v13 = vld [vmem:[%s1352_s0 + $0x94] sm:$0xf] }
   0x3   :  { %v825_v11 = vld [vmem:[%s1352_s0 + $0x4] sm:$0xf]  ;;  %v649_v12 = vld [vmem:[%s1352_s0 + $0x8] sm:$0xf0]  ;;  %v721_v14 = vld [vmem:[%s1352_s0 + $0x98] sm:$0xf0] }
   0x4   :  { %v260_v7 = vpack.c.b16 %v250_v4, %v250_v4  ;;  %v652_v15 = vor.u32 %v825_v11, %v649_v12  ;;  %v861_v16 = vld [vmem:[%s1351_s1 + $0x20] sm:$0xff]  ;;  %v724_v17 = vor.u32 %v843_v13, %v721_v14  ;;  %v860_v18 = vld [vmem:[%s1351_s1 + $0x18] sm:$0xff]  ;;  %v859_v19 = vld [vmem:[%s1351_s1 + $0x10] sm:$0xff] }
   0x5   :  { %v858_v20 = vld [vmem:[%s1351_s1 + $0x8] sm:$0xff]  ;;  %v827_v21 = vld [vmem:[%s1352_s0 + $0x14] sm:$0xf]  ;;  %v657_v22 = vld [vmem:[%s1352_s0 + $0x18] sm:$0xf0] }
   0x6   :  { %v324_v8 = vand.u32 %v322_v6, %v260_v7  ;;  %327 = vmatpush.bf16.msra.mxu0 %v863_v5  ;;  %867 = vmatpush.bf16.msra.mxu2 %v863_v5  ;;  %v845_v23 = vld [vmem:[%s1352_s0 + $0xa4] sm:$0xf]  ;;  %v729_v24 = vld [vmem:[%s1352_s0 + $0xa8] sm:$0xf0]  ;;  %v660_v25 = vor.u32 %v827_v21, %v657_v22  ;;  %v647_v27 = vld [vmem:[%s1352_s0] sm:$0xf] }
   0x7   :  { %v857_v26 = vld [vmem:[%s1351_s1] sm:$0xff]  ;;  %v826_v28 = vld [vmem:[%s1352_s0 + $0x4] sm:$0xf0]  ;;  %v732_v31 = vor.u32 %v845_v23, %v729_v24  ;;  %v665_v35 = vld [vmem:[%s1352_s0 + $0x28] sm:$0xf0] }
   0x8   :  { %421 = vmatpush.bf16.msra.mxu1 %v324_v8  ;;  %874 = vmatpush.bf16.msra.mxu3 %v324_v8  ;;  %v711_v29 = vld [vmem:[%s1352_s0 + $0x80] sm:$0xf]  ;;  %v842_v30 = vld [vmem:[%s1352_s0 + $0x84] sm:$0xf0]  ;;  %v648_v32 = vor.u32 %v826_v28, %v647_v27  ;;  %v829_v34 = vld [vmem:[%s1352_s0 + $0x24] sm:$0xf] }
   0x9   :  { %v712_v33 = vor.u32 %v842_v30, %v711_v29  ;;  %v847_v36 = vld [vmem:[%s1352_s0 + $0xb4] sm:$0xf]  ;;  %v737_v37 = vld [vmem:[%s1352_s0 + $0xb8] sm:$0xf0]  ;;  %v668_v38 = vor.u32 %v829_v34, %v665_v35  ;;  %v655_v39 = vld [vmem:[%s1352_s0 + $0x10] sm:$0xf] }
   0xa   :  { %328 = vmatpush.bf16.msra.mxu0 %v862_v9  ;;  %868 = vmatpush.bf16.msra.mxu2 %v862_v9  ;;  %v828_v40 = vld [vmem:[%s1352_s0 + $0x14] sm:$0xf0]  ;;  %v719_v41 = vld [vmem:[%s1352_s0 + $0x90] sm:$0xf]  ;;  %v740_v43 = vor.u32 %v847_v36, %v737_v37  ;;  %v831_v46 = vld [vmem:[%s1352_s0 + $0x34] sm:$0xf] }
   0xb   :  { %v844_v42 = vld [vmem:[%s1352_s0 + $0x94] sm:$0xf0]  ;;  %v656_v44 = vor.u32 %v828_v40, %v655_v39  ;;  %v673_v47 = vld [vmem:[%s1352_s0 + $0x38] sm:$0xf0]  ;;  %v849_v48 = vld [vmem:[%s1352_s0 + $0xc4] sm:$0xf] }
   0xc   :  { %422 = vmatpush.bf16.msra.mxu1 %v865_v10  ;;  %875 = vmatpush.bf16.msra.mxu3 %v865_v10  ;;  %v720_v45 = vor.u32 %v844_v42, %v719_v41  ;;  %v745_v49 = vld [vmem:[%s1352_s0 + $0xc8] sm:$0xf0]  ;;  %v676_v50 = vor.u32 %v831_v46, %v673_v47  ;;  %v663_v51 = vld [vmem:[%s1352_s0 + $0x20] sm:$0xf]  ;;  %v830_v52 = vld [vmem:[%s1352_s0 + $0x24] sm:$0xf0] }
   0xd   :  { %v727_v53 = vld [vmem:[%s1352_s0 + $0xa0] sm:$0xf]  ;;  %v846_v54 = vld [vmem:[%s1352_s0 + $0xa4] sm:$0xf0]  ;;  %v748_v55 = vor.u32 %v849_v48, %v745_v49  ;;  %v664_v56 = vor.u32 %v830_v52, %v663_v51  ;;  %v833_v58 = vld [vmem:[%s1352_s0 + $0x44] sm:$0xf] }
   0xe   :  { %329 = vmatpush.bf16.msra.mxu0 %v861_v16  ;;  %869 = vmatpush.bf16.msra.mxu2 %v861_v16  ;;  %v728_v57 = vor.u32 %v846_v54, %v727_v53  ;;  %v681_v59 = vld [vmem:[%s1352_s0 + $0x48] sm:$0xf0]  ;;  %v851_v60 = vld [vmem:[%s1352_s0 + $0xd4] sm:$0xf]  ;;  %v753_v61 = vld [vmem:[%s1352_s0 + $0xd8] sm:$0xf0] }
   0xf   :  { %809 = vmatmul.msk.bf16.vlgmr.msra.gmra.mxu1 %vm270_vm2, %v652_v15  ;;  %818 = vmatmul.msk.bf16.vlgmr.msra.gmra.mxu3 %vm270_vm2, %v724_v17  ;;  %v684_v62 = vor.u32 %v833_v58, %v681_v59  ;;  %v671_v63 = vld [vmem:[%s1352_s0 + $0x30] sm:$0xf]  ;;  %v832_v0 = vld [vmem:[%s1352_s0 + $0x34] sm:$0xf0]  ;;  %v756_v3 = vor.u32 %v851_v60, %v753_v61  ;;  %v835_v6 = vld [vmem:[%s1352_s0 + $0x54] sm:$0xf] }
  0x10   :  { %v735_v1 = vld [vmem:[%s1352_s0 + $0xb0] sm:$0xf]  ;;  %v848_v2 = vld [vmem:[%s1352_s0 + $0xb4] sm:$0xf0]  ;;  %v672_v4 = vor.u32 %v832_v0, %v671_v63  ;;  %v689_v7 = vld [vmem:[%s1352_s0 + $0x58] sm:$0xf0] }
  0x11   :  { %v736_v5 = vor.u32 %v848_v2, %v735_v1  ;;  %v853_v8 = vld [vmem:[%s1352_s0 + $0xe4] sm:$0xf]  ;;  %v761_v9 = vld [vmem:[%s1352_s0 + $0xe8] sm:$0xf0]  ;;  %v692_v10 = vor.u32 %v835_v6, %v689_v7  ;;  %v679_v11 = vld [vmem:[%s1352_s0 + $0x40] sm:$0xf] }
  0x12   :  { %330 = vmatpush.bf16.msra.mxu0 %v860_v18  ;;  %870 = vmatpush.bf16.msra.mxu2 %v860_v18  ;;  %v834_v12 = vld [vmem:[%s1352_s0 + $0x44] sm:$0xf0]  ;;  %v743_v13 = vld [vmem:[%s1352_s0 + $0xc0] sm:$0xf]  ;;  %v764_v15 = vor.u32 %v853_v8, %v761_v9  ;;  %v837_v18 = vld [vmem:[%s1352_s0 + $0x64] sm:$0xf] }
  0x13   :  { %v850_v14 = vld [vmem:[%s1352_s0 + $0xc4] sm:$0xf0]  ;;  %v680_v16 = vor.u32 %v834_v12, %v679_v11  ;;  %v769_v21 = vld [vmem:[%s1352_s0 + $0xf8] sm:$0xf0]  ;;  %v687_v23 = vld [vmem:[%s1352_s0 + $0x50] sm:$0xf] }
  0x14   :  { %v744_v17 = vor.u32 %v850_v14, %v743_v13  ;;  %v836_v24 = vld [vmem:[%s1352_s0 + $0x54] sm:$0xf0]  ;;  %v839_v30 = vld [vmem:[%s1352_s0 + $0x74] sm:$0xf]  ;;  %v838_v34 = vld [vmem:[%s1352_s0 + $0x64] sm:$0xf0] }
  0x15   :  { %v688_v28 = vor.u32 %v836_v24, %v687_v23  ;;  %v759_v35 = vld [vmem:[%s1352_s0 + $0xe0] sm:$0xf]  ;;  %v854_v36 = vld [vmem:[%s1352_s0 + $0xe4] sm:$0xf0]  ;;  %v841_v39 = vld [vmem:[%s1352_s0 + $0x84] sm:$0xf] }
  0x16   :  { %331 = vmatpush.bf16.msra.mxu0 %v859_v19  ;;  %871 = vmatpush.bf16.msra.mxu2 %v859_v19  ;;  %v697_v19 = vld [vmem:[%s1352_s0 + $0x68] sm:$0xf0]  ;;  %v703_v42 = vld [vmem:[%s1352_s0 + $0x70] sm:$0xf]  ;;  %v856_v46 = vld [vmem:[%s1352_s0 + $0xf4] sm:$0xf0] }
  0x17   :  { %v700_v22 = vor.u32 %v837_v18, %v697_v19  ;;  %v713_v40 = vld [vmem:[%s1352_s0 + $0x88] sm:$0xf0]  ;;  %v1146_v52 = vld [vmem:[%s1353_s2] ss:$0 sm:$0xff] }
  0x18   :  { %v716_v41 = vor.u32 %v841_v39, %v713_v40 }
  0x1a   :  { %332 = vmatpush.bf16.msra.mxu0 %v858_v20  ;;  %872 = vmatpush.bf16.msra.mxu2 %v858_v20  ;;  %v855_v20 = vld [vmem:[%s1352_s0 + $0xf4] sm:$0xf] }
  0x1b   :  { %v772_v27 = vor.u32 %v855_v20, %v769_v21 }
  0x1e   :  { %333 = vmatpush.bf16.msra.mxu0 %v857_v26  ;;  %873 = vmatpush.bf16.msra.mxu2 %v857_v26  ;;  %v852_v26 = vld [vmem:[%s1352_s0 + $0xd4] sm:$0xf0] }
  0x1f   :  { %810 = vmatmul.msk.bf16.gmra.mxu1 %vm270_vm2, %v660_v25  ;;  %819 = vmatmul.msk.bf16.gmra.mxu3 %vm270_vm2, %v732_v31  ;;  %v751_v25 = vld [vmem:[%s1352_s0 + $0xd0] sm:$0xf]  ;;  %v705_v31 = vld [vmem:[%s1352_s0 + $0x78] sm:$0xf0] }
  0x20   :  { %v752_v29 = vor.u32 %v852_v26, %v751_v25 }
  0x21   :  { %334 = vmatmul.bf16.vlgmr.msra.gmra.mxu0 %v648_v32  ;;  %374 = vmatmul.bf16.vlgmr.msra.gmra.mxu2 %v712_v33  ;;  %v708_v32 = vor.u32 %v839_v30, %v705_v31  ;;  %v695_v33 = vld [vmem:[%s1352_s0 + $0x60] sm:$0xf] }
  0x22   :  { %v696_v37 = vor.u32 %v838_v34, %v695_v33 }
  0x2f   :  { %811 = vmatmul.msk.bf16.gmra.mxu1 %vm270_vm2, %v668_v38  ;;  %820 = vmatmul.msk.bf16.gmra.mxu3 %vm270_vm2, %v740_v43  ;;  %v760_v38 = vor.u32 %v854_v36, %v759_v35  ;;  %v840_v43 = vld [vmem:[%s1352_s0 + $0x74] sm:$0xf0] }
  0x30   :  { %v704_v47 = vor.u32 %v840_v43, %v703_v42 }
  0x31   :  { %339 = vmatmul.bf16.gmra.mxu0 %v656_v44  ;;  %379 = vmatmul.bf16.gmra.mxu2 %v720_v45  ;;  %v767_v45 = vld [vmem:[%s1352_s0 + $0xf0] sm:$0xf] }
  0x32   :  { %v768_v48 = vor.u32 %v856_v46, %v767_v45 }
  0x3f   :  { %812 = vmatmul.msk.bf16.gmra.mxu1 %vm270_vm2, %v676_v50  ;;  %821 = vmatmul.msk.bf16.gmra.mxu3 %vm270_vm2, %v748_v55  ;;  %v1151_v55 = vld [vmem:[%s1354_s3] ss:$0 sm:$0xff] }
  0x41   :  { %344 = vmatmul.bf16.gmra.mxu0 %v664_v56  ;;  %384 = vmatmul.bf16.gmra.mxu2 %v728_v57 }
  0x4f   :  { %813 = vmatmul.msk.bf16.gmra.mxu1 %vm270_vm2, %v684_v62  ;;  %822 = vmatmul.msk.bf16.gmra.mxu3 %vm270_vm2, %v756_v3 }
  0x51   :  { %349 = vmatmul.bf16.gmra.mxu0 %v672_v4  ;;  %389 = vmatmul.bf16.gmra.mxu2 %v736_v5 }
  0x5f   :  { %814 = vmatmul.msk.bf16.gmra.mxu1 %vm270_vm2, %v692_v10  ;;  %823 = vmatmul.msk.bf16.gmra.mxu3 %vm270_vm2, %v764_v15 }
  0x61   :  { %354 = vmatmul.bf16.gmra.mxu0 %v680_v16  ;;  %394 = vmatmul.bf16.gmra.mxu2 %v744_v17 }
  0x6f   :  { %815 = vmatmul.msk.bf16.gmra.mxu1 %vm270_vm2, %v700_v22  ;;  %824 = vmatmul.msk.bf16.gmra.mxu3 %vm270_vm2, %v772_v27 }
  0x71   :  { %359 = vmatmul.bf16.gmra.mxu0 %v688_v28  ;;  %399 = vmatmul.bf16.gmra.mxu2 %v752_v29 }
  0x7f   :  { %816 = vmatmul.msk.bf16.gmra.mxu1 %vm270_vm2, %v708_v32 }
  0x81   :  { %364 = vmatmul.bf16.gmra.mxu0 %v696_v37  ;;  %404 = vmatmul.bf16.gmra.mxu2 %v760_v38 }
  0x8c   :  { %v424_v44 = vpop.f32.mrf.mxu1 }
  0x8f   :  { %817 = vmatmul.msk.bf16.gmra.mxu1 %vm270_vm2, %v716_v41 }
  0x91   :  { %369 = vmatmul.bf16.gmra.mxu0 %v704_v47  ;;  %409 = vmatmul.bf16.gmra.mxu2 %v768_v48 }
  0x92   :  { %v469_v51 = vpop.f32.mrf.mxu3 }
  0x94   :  { %v426_v49 = vpop.f32.mrf.mxu1 }
  0x9a   :  { %v471_v61 = vpop.f32.mrf.mxu3 }
  0x9c   :  { %v429_v50 = vpop.f32.mrf.mxu1 }
  0x9e   :  { %v335_v53 = vpop.f32.mrf.mxu0 }
  0x9f   :  { %v425_v54 = vadd.f32 %v424_v44, %v335_v53 }
  0xa1   :  { %v508_v56 = vmul.f32 %v1146_v52, %v425_v54 }
  0xa2   :  { %v474_v7 = vpop.f32.mrf.mxu3 }
  0xa3   :  { %v544_v57 = vadd.f32 %v1151_v55, %v508_v56 }
  0xa4   :  { %v431_v58 = vpop.f32.mrf.mxu1  ;;  %v1155_v60 = vpop.f32.mrf.mxu2 }
  0xa5   :  { %v576_v59 = vmax.f32 %v544_v57, 0.0 }
  0xa6   :  { %v337_v62 = vpop.f32.mrf.mxu0 }
  0xa7   :  { %609 = vst.msk [vmem:[%s1355_s4] sm:$0xff] %vm608_vm3, %v576_v59  ;;  %v427_v63 = vadd.f32 %v426_v49, %v337_v62 }
  0xa9   :  { %v509_v0 = vmul.f32 %v1146_v52, %v427_v63 }
  0xaa   :  { %v476_v18 = vpop.f32.mrf.mxu3 }
  0xab   :  { %v545_v1 = vadd.f32 %v1151_v55, %v509_v0 }
  0xac   :  { %v434_v2 = vpop.f32.mrf.mxu1  ;;  %v1163_v4 = vpop.f32.mrf.mxu2 }
  0xad   :  { %v577_v3 = vmax.f32 %v545_v1, 0.0 }
  0xae   :  { %v340_v5 = vpop.f32.mrf.mxu0 }
  0xaf   :  { %610 = vst.msk [vmem:[%s1355_s4 + $0x8] sm:$0xff] %vm608_vm3, %v577_v3  ;;  %v430_v6 = vadd.f32 %v429_v50, %v340_v5 }
  0xb1   :  { %v510_v8 = vmul.f32 %v1146_v52, %v430_v6 }
  0xb2   :  { %v479_v33 = vpop.f32.mrf.mxu3 }
  0xb3   :  { %v546_v9 = vadd.f32 %v1151_v55, %v510_v8 }
  0xb4   :  { %v436_v10 = vpop.f32.mrf.mxu1  ;;  %v380_v12 = vpop.f32.mrf.mxu2 }
  0xb5   :  { %v578_v11 = vmax.f32 %v546_v9, 0.0  ;;  %v470_v13 = vadd.f32 %v469_v51, %v380_v12 }
  0xb6   :  { %v342_v14 = vpop.f32.mrf.mxu0 }
  0xb7   :  { %611 = vst.msk [vmem:[%s1355_s4 + $0x10] sm:$0xff] %vm608_vm3, %v578_v11  ;;  %v432_v15 = vadd.f32 %v431_v58, %v342_v14  ;;  %v526_v16 = vmul.f32 %v1146_v52, %v470_v13 }
  0xb9   :  { %v511_v17 = vmul.f32 %v1146_v52, %v432_v15  ;;  %v562_v19 = vadd.f32 %v1151_v55, %v526_v16 }
  0xba   :  { %v481_v48 = vpop.f32.mrf.mxu3 }
  0xbb   :  { %v547_v20 = vadd.f32 %v1151_v55, %v511_v17  ;;  %v594_v22 = vmax.f32 %v562_v19, 0.0 }
  0xbc   :  { %v439_v21 = vpop.f32.mrf.mxu1  ;;  %v382_v24 = vpop.f32.mrf.mxu2 }
  0xbd   :  { %v579_v23 = vmax.f32 %v547_v20, 0.0  ;;  %627 = vst.msk [vmem:[%s1355_s4 + $0x90] sm:$0xff] %vm608_vm3, %v594_v22  ;;  %v472_v25 = vadd.f32 %v471_v61, %v382_v24 }
  0xbe   :  { %v345_v26 = vpop.f32.mrf.mxu0 }
  0xbf   :  { %612 = vst.msk [vmem:[%s1355_s4 + $0x18] sm:$0xff] %vm608_vm3, %v579_v23  ;;  %v435_v27 = vadd.f32 %v434_v2, %v345_v26  ;;  %v527_v28 = vmul.f32 %v1146_v52, %v472_v25 }
  0xc1   :  { %v512_v29 = vmul.f32 %v1146_v52, %v435_v27  ;;  %v563_v30 = vadd.f32 %v1151_v55, %v527_v28 }
  0xc2   :  { %v484_v2 = vpop.f32.mrf.mxu3 }
  0xc3   :  { %v548_v31 = vadd.f32 %v1151_v55, %v512_v29  ;;  %v595_v34 = vmax.f32 %v563_v30, 0.0 }
  0xc4   :  { %v441_v32 = vpop.f32.mrf.mxu1  ;;  %v385_v36 = vpop.f32.mrf.mxu2 }
  0xc5   :  { %v580_v35 = vmax.f32 %v548_v31, 0.0  ;;  %628 = vst.msk [vmem:[%s1355_s4 + $0x98] sm:$0xff] %vm608_vm3, %v595_v34  ;;  %v475_v37 = vadd.f32 %v474_v7, %v385_v36 }
  0xc6   :  { %v347_v38 = vpop.f32.mrf.mxu0 }
  0xc7   :  { %613 = vst.msk [vmem:[%s1355_s4 + $0x20] sm:$0xff] %vm608_vm3, %v580_v35  ;;  %v437_v39 = vadd.f32 %v436_v10, %v347_v38  ;;  %v528_v40 = vmul.f32 %v1146_v52, %v475_v37 }
  0xc9   :  { %v513_v41 = vmul.f32 %v1146_v52, %v437_v39  ;;  %v564_v42 = vadd.f32 %v1151_v55, %v528_v40 }
  0xca   :  { %v486_v17 = vpop.f32.mrf.mxu3 }
  0xcb   :  { %v549_v43 = vadd.f32 %v1151_v55, %v513_v41  ;;  %v596_v45 = vmax.f32 %v564_v42, 0.0 }
  0xcc   :  { %v444_v44 = vpop.f32.mrf.mxu1  ;;  %v387_v47 = vpop.f32.mrf.mxu2 }
  0xcd   :  { %v581_v46 = vmax.f32 %v549_v43, 0.0  ;;  %629 = vst.msk [vmem:[%s1355_s4 + $0xa0] sm:$0xff] %vm608_vm3, %v596_v45  ;;  %v477_v49 = vadd.f32 %v476_v18, %v387_v47 }
  0xce   :  { %v350_v50 = vpop.f32.mrf.mxu0 }
  0xcf   :  { %614 = vst.msk [vmem:[%s1355_s4 + $0x28] sm:$0xff] %vm608_vm3, %v581_v46  ;;  %v440_v51 = vadd.f32 %v439_v21, %v350_v50  ;;  %v529_v53 = vmul.f32 %v1146_v52, %v477_v49 }
  0xd1   :  { %v514_v54 = vmul.f32 %v1146_v52, %v440_v51  ;;  %v565_v56 = vadd.f32 %v1151_v55, %v529_v53 }
  0xd3   :  { %v550_v57 = vadd.f32 %v1151_v55, %v514_v54  ;;  %v597_v59 = vmax.f32 %v565_v56, 0.0 }
  0xd4   :  { %v446_v58 = vpop.f32.mrf.mxu1  ;;  %v390_v62 = vpop.f32.mrf.mxu2 }
  0xd5   :  { %v582_v61 = vmax.f32 %v550_v57, 0.0  ;;  %630 = vst.msk [vmem:[%s1355_s4 + $0xa8] sm:$0xff] %vm608_vm3, %v597_v59  ;;  %v480_v63 = vadd.f32 %v479_v33, %v390_v62 }
  0xd6   :  { %v352_v0 = vpop.f32.mrf.mxu0 }
  0xd7   :  { %615 = vst.msk [vmem:[%s1355_s4 + $0x30] sm:$0xff] %vm608_vm3, %v582_v61  ;;  %v442_v1 = vadd.f32 %v441_v32, %v352_v0  ;;  %v530_v3 = vmul.f32 %v1146_v52, %v480_v63  ;;  %v489_v32 = vpop.f32.mrf.mxu3 }
  0xd9   :  { %v515_v5 = vmul.f32 %v1146_v52, %v442_v1  ;;  %v566_v6 = vadd.f32 %v1151_v55, %v530_v3 }
  0xdb   :  { %v551_v7 = vadd.f32 %v1151_v55, %v515_v5  ;;  %v598_v9 = vmax.f32 %v566_v6, 0.0 }
  0xdc   :  { %v449_v8 = vpop.f32.mrf.mxu1  ;;  %v392_v11 = vpop.f32.mrf.mxu2 }
  0xdd   :  { %v583_v10 = vmax.f32 %v551_v7, 0.0  ;;  %631 = vst.msk [vmem:[%s1355_s4 + $0xb0] sm:$0xff] %vm608_vm3, %v598_v9  ;;  %v482_v12 = vadd.f32 %v481_v48, %v392_v11 }
  0xde   :  { %v355_v13 = vpop.f32.mrf.mxu0 }
  0xdf   :  { %616 = vst.msk [vmem:[%s1355_s4 + $0x38] sm:$0xff] %vm608_vm3, %v583_v10  ;;  %v445_v14 = vadd.f32 %v444_v44, %v355_v13  ;;  %v531_v15 = vmul.f32 %v1146_v52, %v482_v12  ;;  %v491_v47 = vpop.f32.mrf.mxu3 }
  0xe1   :  { %v516_v16 = vmul.f32 %v1146_v52, %v445_v14  ;;  %v567_v18 = vadd.f32 %v1151_v55, %v531_v15 }
  0xe3   :  { %v552_v19 = vadd.f32 %v1151_v55, %v516_v16  ;;  %v599_v21 = vmax.f32 %v567_v18, 0.0 }
  0xe4   :  { %v451_v20 = vpop.f32.mrf.mxu1  ;;  %v395_v23 = vpop.f32.mrf.mxu2 }
  0xe5   :  { %v584_v22 = vmax.f32 %v552_v19, 0.0  ;;  %632 = vst.msk [vmem:[%s1355_s4 + $0xb8] sm:$0xff] %vm608_vm3, %v599_v21  ;;  %v485_v24 = vadd.f32 %v484_v2, %v395_v23 }
  0xe6   :  { %v357_v25 = vpop.f32.mrf.mxu0 }
  0xe7   :  { %617 = vst.msk [vmem:[%s1355_s4 + $0x40] sm:$0xff] %vm608_vm3, %v584_v22  ;;  %v447_v26 = vadd.f32 %v446_v58, %v357_v25  ;;  %v532_v27 = vmul.f32 %v1146_v52, %v485_v24  ;;  %v494_v0 = vpop.f32.mrf.mxu3 }
  0xe9   :  { %v517_v28 = vmul.f32 %v1146_v52, %v447_v26  ;;  %v568_v29 = vadd.f32 %v1151_v55, %v532_v27 }
  0xeb   :  { %v553_v30 = vadd.f32 %v1151_v55, %v517_v28  ;;  %v600_v33 = vmax.f32 %v568_v29, 0.0 }
  0xec   :  { %v454_v31 = vpop.f32.mrf.mxu1  ;;  %v397_v35 = vpop.f32.mrf.mxu2 }
  0xed   :  { %v585_v34 = vmax.f32 %v553_v30, 0.0  ;;  %633 = vst.msk [vmem:[%s1355_s4 + $0xc0] sm:$0xff] %vm608_vm3, %v600_v33  ;;  %v487_v36 = vadd.f32 %v486_v17, %v397_v35 }
  0xee   :  { %v360_v37 = vpop.f32.mrf.mxu0 }
  0xef   :  { %618 = vst.msk [vmem:[%s1355_s4 + $0x48] sm:$0xff] %vm608_vm3, %v585_v34  ;;  %v450_v38 = vadd.f32 %v449_v8, %v360_v37  ;;  %v533_v39 = vmul.f32 %v1146_v52, %v487_v36  ;;  %v496_v15 = vpop.f32.mrf.mxu3 }
  0xf1   :  { %v518_v40 = vmul.f32 %v1146_v52, %v450_v38  ;;  %v569_v41 = vadd.f32 %v1151_v55, %v533_v39 }
  0xf3   :  { %v554_v42 = vadd.f32 %v1151_v55, %v518_v40  ;;  %v601_v44 = vmax.f32 %v569_v41, 0.0 }
  0xf4   :  { %v456_v43 = vpop.f32.mrf.mxu1  ;;  %v400_v46 = vpop.f32.mrf.mxu2 }
  0xf5   :  { %v586_v45 = vmax.f32 %v554_v42, 0.0  ;;  %634 = vst.msk [vmem:[%s1355_s4 + $0xc8] sm:$0xff] %vm608_vm3, %v601_v44  ;;  %v490_v48 = vadd.f32 %v489_v32, %v400_v46 }
  0xf6   :  { %v362_v49 = vpop.f32.mrf.mxu0 }
  0xf7   :  { %619 = vst.msk [vmem:[%s1355_s4 + $0x50] sm:$0xff] %vm608_vm3, %v586_v45  ;;  %v452_v50 = vadd.f32 %v451_v20, %v362_v49  ;;  %v534_v51 = vmul.f32 %v1146_v52, %v490_v48  ;;  %v499_v32 = vpop.f32.mrf.mxu3 }
  0xf9   :  { %v519_v53 = vmul.f32 %v1146_v52, %v452_v50  ;;  %v570_v54 = vadd.f32 %v1151_v55, %v534_v51 }
  0xfb   :  { %v555_v56 = vadd.f32 %v1151_v55, %v519_v53  ;;  %v602_v58 = vmax.f32 %v570_v54, 0.0 }
  0xfc   :  { %v459_v57 = vpop.f32.mrf.mxu1  ;;  %v402_v61 = vpop.f32.mrf.mxu2 }
  0xfd   :  { %v587_v59 = vmax.f32 %v555_v56, 0.0  ;;  %635 = vst.msk [vmem:[%s1355_s4 + $0xd0] sm:$0xff] %vm608_vm3, %v602_v58  ;;  %v492_v62 = vadd.f32 %v491_v47, %v402_v61 }
  0xfe   :  { %v365_v63 = vpop.f32.mrf.mxu0 }
  0xff   :  { %620 = vst.msk [vmem:[%s1355_s4 + $0x58] sm:$0xff] %vm608_vm3, %v587_v59  ;;  %v455_v1 = vadd.f32 %v454_v31, %v365_v63  ;;  %v535_v2 = vmul.f32 %v1146_v52, %v492_v62  ;;  %v501_v49 = vpop.f32.mrf.mxu3 }
 0x101   :  { %v520_v3 = vmul.f32 %v1146_v52, %v455_v1  ;;  %v571_v5 = vadd.f32 %v1151_v55, %v535_v2 }
 0x103   :  { %v556_v6 = vadd.f32 %v1151_v55, %v520_v3  ;;  %v603_v8 = vmax.f32 %v571_v5, 0.0 }
 0x104   :  { %v461_v7 = vpop.f32.mrf.mxu1  ;;  %v405_v10 = vpop.f32.mrf.mxu2 }
 0x105   :  { %v588_v9 = vmax.f32 %v556_v6, 0.0  ;;  %636 = vst.msk [vmem:[%s1355_s4 + $0xd8] sm:$0xff] %vm608_vm3, %v603_v8  ;;  %v495_v11 = vadd.f32 %v494_v0, %v405_v10 }
 0x106   :  { %v367_v12 = vpop.f32.mrf.mxu0 }
 0x107   :  { %621 = vst.msk [vmem:[%s1355_s4 + $0x60] sm:$0xff] %vm608_vm3, %v588_v9  ;;  %v457_v13 = vadd.f32 %v456_v43, %v367_v12  ;;  %v536_v14 = vmul.f32 %v1146_v52, %v495_v11 }
 0x109   :  { %v521_v16 = vmul.f32 %v1146_v52, %v457_v13  ;;  %v572_v17 = vadd.f32 %v1151_v55, %v536_v14 }
 0x10b   :  { %v557_v18 = vadd.f32 %v1151_v55, %v521_v16  ;;  %v604_v20 = vmax.f32 %v572_v17, 0.0 }
 0x10c   :  { %v464_v19 = vpop.f32.mrf.mxu1  ;;  %v407_v23 = vpop.f32.mrf.mxu2 }
 0x10d   :  { %v465_v21 = vadd.f32 %v464_v19, %v1155_v60  ;;  %v589_v22 = vmax.f32 %v557_v18, 0.0  ;;  %637 = vst.msk [vmem:[%s1355_s4 + $0xe0] sm:$0xff] %vm608_vm3, %v604_v20  ;;  %v497_v25 = vadd.f32 %v496_v15, %v407_v23 }
 0x10e   :  { %v370_v26 = vpop.f32.mrf.mxu0 }
 0x10f   :  { %v524_v24 = vmul.f32 %v1146_v52, %v465_v21  ;;  %622 = vst.msk [vmem:[%s1355_s4 + $0x68] sm:$0xff] %vm608_vm3, %v589_v22  ;;  %v460_v27 = vadd.f32 %v459_v57, %v370_v26  ;;  %v537_v60 = vmul.f32 %v1146_v52, %v497_v25 }
 0x111   :  { %v560_v28 = vadd.f32 %v1151_v55, %v524_v24  ;;  %v522_v29 = vmul.f32 %v1146_v52, %v460_v27  ;;  %v573_v31 = vadd.f32 %v1151_v55, %v537_v60 }
 0x113   :  { %v592_v30 = vmax.f32 %v560_v28, 0.0  ;;  %v558_v33 = vadd.f32 %v1151_v55, %v522_v29  ;;  %v605_v35 = vmax.f32 %v573_v31, 0.0 }
 0x114   :  { %v466_v34 = vpop.f32.mrf.mxu1  ;;  %v410_v38 = vpop.f32.mrf.mxu2 }
 0x115   :  { %625 = vst.msk [vmem:[%s1355_s4 + $0x80] sm:$0xff] %vm608_vm3, %v592_v30  ;;  %v467_v36 = vadd.f32 %v466_v34, %v1163_v4  ;;  %v590_v37 = vmax.f32 %v558_v33, 0.0  ;;  %v500_v40 = vadd.f32 %v499_v32, %v410_v38 }
 0x116   :  { %638 = vst.msk [vmem:[%s1355_s4 + $0xe8] sm:$0xff] %vm608_vm3, %v605_v35  ;;  %v372_v41 = vpop.f32.mrf.mxu0 }
 0x117   :  { %v525_v39 = vmul.f32 %v1146_v52, %v467_v36  ;;  %623 = vst.msk [vmem:[%s1355_s4 + $0x70] sm:$0xff] %vm608_vm3, %v590_v37  ;;  %v462_v42 = vadd.f32 %v461_v7, %v372_v41  ;;  %v538_v4 = vmul.f32 %v1146_v52, %v500_v40 }
 0x119   :  { %v561_v43 = vadd.f32 %v1151_v55, %v525_v39  ;;  %v523_v44 = vmul.f32 %v1146_v52, %v462_v42  ;;  %v574_v46 = vadd.f32 %v1151_v55, %v538_v4 }
 0x11b   :  { %v593_v45 = vmax.f32 %v561_v43, 0.0  ;;  %v559_v47 = vadd.f32 %v1151_v55, %v523_v44  ;;  %v606_v48 = vmax.f32 %v574_v46, 0.0 }
 0x11c   :  { %v412_v51 = vpop.f32.mrf.mxu2 }
 0x11d   :  { %626 = vst.msk [vmem:[%s1355_s4 + $0x88] sm:$0xff] %vm608_vm3, %v593_v45  ;;  %v591_v50 = vmax.f32 %v559_v47, 0.0  ;;  %v502_v53 = vadd.f32 %v501_v49, %v412_v51 }
 0x11e   :  { %639 = vst.msk [vmem:[%s1355_s4 + $0xf0] sm:$0xff] %vm608_vm3, %v606_v48 }
 0x11f   :  { %624 = vst.msk [vmem:[%s1355_s4 + $0x78] sm:$0xff] %vm608_vm3, %v591_v50  ;;  %v539_v54 = vmul.f32 %v1146_v52, %v502_v53 }
 0x121   :  { %v575_v56 = vadd.f32 %v1151_v55, %v539_v54 }
 0x123   :  { %v607_v57 = vmax.f32 %v575_v56, 0.0 }
 0x125   :  { %640 = vst.msk [vmem:[%s1355_s4 + $0xf8] sm:$0xff] %vm608_vm3, %v607_v57 }

// kernel: hlcdnet_forward.27
= control target key start
LH: loop header
LB: loop body
LE: loop exit
PB: predicated region body
PF: predicated region fallthrough
CT: control target
= control target key end

     0   :  { %s508_s15 = smov 0   ;;  %s587_s0 = inlined_call_operand.vmem [shape: f32[4,5,5,64], index: 0, kind: input, shape index: {}]   ;;  %s588_s1 = inlined_call_operand.vmem [shape: f32[4,5,4,64], index: 1, kind: input, shape index: {}]   ;;  %s589_s2 = inlined_call_operand.vmem [shape: f32[4,4,5,64], index: 2, kind: input, shape index: {}]   ;;  %s590_s3 = inlined_call_operand.vmem [shape: f32[4,4,4,64], index: 3, kind: input, shape index: {}]   ;;  %s591_s4 = inlined_call_operand.vmem [shape: f32[4,8,6,64], index: 4, kind: output, shape index: {}]  }
   0x1 LB: > { %s441_s16 = sadd.s32 4294967295, %s480_s15   ;;  %p445_p0 = scmp.ge.s32.totalorder %s480_s15, 1  ;;  %s480_s15 = sphi %s508_s15, %s14_s15  }
   0x2   : > { %p192_p1 = scmp.lt.s32.totalorder %s480_s15, 5 }
   0x4   : > { %p193_p2 = pnand %p445_p0, %p192_p1 }
   0x5   : > { %p233_p3 = scmp.lt.s32.totalorder (!%p193_p2), %s441_s16, 3 }
   0x6   : > { %196 = sbr.rel (%p193_p2) target bundleno = 39 (0x27), region = 36 }
   0xb   : > { %s593_s16 = smov (!%p233_p3, %s441_s16), 3  ;;  %vm335_vm0 = vcmask 521216   ;;  %v482_v0 = vmov 0.0   ;;  %vm345_vm1 = vcmask 519168  }
   0xc   : > { %s462_s17 = sshll.u32 %s593_s16, 6  ;;  %s463_s18 = smul.u32 40, %s593_s16 }
   0xd   : > { %s523_s21 = scalar_lea.vmem %s591_s4, %s462_s17  ;;  %s461_s25 = sshll.u32 %s593_s16, 4 }
   0xe   : > { %338 = vst.msk [vmem:[%s523_s21 + $0x10] sm:$0x3f] %vm335_vm0, %v482_v0  ;;  %s530_s24 = scalar_lea.vmem %s587_s0, %s463_s18  ;;  %s464_s26 = smul.u32 20, %s593_s16 }
   0xf   : > { %336 = vst.msk [vmem:[%s523_s21] sm:$0x3f] %vm335_vm0, %v482_v0  ;;  %v258_v1 = vld [vmem:[%s530_s24] sm:$0x1f]  ;;  %v259_v2 = vld [vmem:[%s530_s24 + $0x8] sm:$0x1f]  ;;  %s252_s29 = scalar_lea.vmem %s590_s3, %s461_s25 }
  0x10   : > { %337 = vst.msk [vmem:[%s523_s21 + $0x8] sm:$0x3f] %vm335_vm0, %v482_v0  ;;  %v284_v3 = vrot.slane %v258_v1, 1  ;;  %v272_v4 = vld [vmem:[%s252_s29] sm:$0xf]  ;;  %s460_s30 = sshll.u32 %s593_s16, 5  ;;  %s558_s7 = scalar_lea.vmem %s588_s1, %s464_s26 }
  0x11   : > { %339 = vst.msk [vmem:[%s523_s21 + $0x18] sm:$0x3f] %vm335_vm0, %v482_v0  ;;  %v276_v5 = vmax.f32 %v272_v4, %v258_v1  ;;  %v285_v6 = vrot.slane %v259_v2, 1  ;;  %v260_v7 = vld [vmem:[%s530_s24 + $0x10] sm:$0x1f]  ;;  %s564_s10 = scalar_lea.vmem %s589_s2, %s460_s30 }
  0x12   : > { %340 = vst.msk [vmem:[%s523_s21 + $0x20] sm:$0x3f] %vm335_vm0, %v482_v0  ;;  %v273_v8 = vld [vmem:[%s252_s29 + $0x4] sm:$0xf]  ;;  %v286_v11 = vrot.slane %v260_v7, 1 }
  0x13   : > { %341 = vst.msk [vmem:[%s523_s21 + $0x28] sm:$0x3f] %vm335_vm0, %v482_v0  ;;  %v292_v9 = vmax.f32 %v276_v5, %v284_v3  ;;  %v277_v10 = vmax.f32 %v273_v8, %v259_v2  ;;  %v261_v12 = vld [vmem:[%s530_s24 + $0x18] sm:$0x1f]  ;;  %v274_v13 = vld [vmem:[%s252_s29 + $0x8] sm:$0xf] }
  0x14   : > { %342 = vst.msk [vmem:[%s523_s21 + $0x30] sm:$0x3f] %vm335_vm0, %v482_v0  ;;  %v278_v16 = vmax.f32 %v274_v13, %v260_v7  ;;  %v287_v17 = vrot.slane %v261_v12, 1  ;;  %v262_v18 = vld [vmem:[%s530_s24 + $0x20] sm:$0x1f] }
  0x15   : > { %343 = vst.msk [vmem:[%s523_s21 + $0x38] sm:$0x3f] %vm335_vm0, %v482_v0  ;;  %v296_v14 = vmax.f32 %v292_v9, %v259_v2  ;;  %v293_v15 = vmax.f32 %v277_v10, %v285_v6  ;;  %v263_v19 = vld [vmem:[%s558_s7] sm:$0xf]  ;;  %v275_v20 = vld [vmem:[%s252_s29 + $0xc] sm:$0xf] }
  0x16   : > { %v268_v21 = vld [vmem:[%s564_s10] sm:$0x1f]  ;;  %v294_v24 = vmax.f32 %v278_v16, %v286_v11  ;;  %v279_v25 = vmax.f32 %v275_v20, %v261_v12  ;;  %v301_v27 = vrot.slane %v262_v18, 1  ;;  %v269_v29 = vld [vmem:[%s564_s10 + $0x8] sm:$0x1f] }
  0x17   : > { %v303_v22 = vmax.f32 %v296_v14, %v285_v6  ;;  %v297_v23 = vmax.f32 %v293_v15, %v260_v7  ;;  %v264_v26 = vld [vmem:[%s558_s7 + $0x4] sm:$0xf]  ;;  %v323_v33 = vrot.slane %v268_v21, 1  ;;  %v265_v34 = vld [vmem:[%s558_s7 + $0x8] sm:$0xf]  ;;  %v324_v40 = vrot.slane %v269_v29, 1 }
  0x18   : > { %v298_v31 = vmax.f32 %v294_v24, %v261_v12  ;;  %v295_v32 = vmax.f32 %v279_v25, %v287_v17  ;;  %v270_v37 = vld [vmem:[%s564_s10 + $0x10] sm:$0x1f]  ;;  %v266_v41 = vld [vmem:[%s558_s7 + $0xc] sm:$0xf]  ;;  %v271_v48 = vld [vmem:[%s564_s10 + $0x18] sm:$0x1f] }
  0x19   : > { %v307_v28 = vmax.f32 %v303_v22, %v263_v19  ;;  %v304_v30 = vmax.f32 %v297_v23, %v286_v11  ;;  %v325_v46 = vrot.slane %v270_v37, 1  ;;  %v267_v47 = vld [vmem:[%s558_s7 + $0x10] sm:$0xf]  ;;  %v326_v56 = vrot.slane %v271_v48, 1 }
  0x1a   : > { %v305_v38 = vmax.f32 %v298_v31, %v287_v17  ;;  %v299_v39 = vmax.f32 %v295_v32, %v262_v18 }
  0x1b   : > { %v311_v35 = vmax.f32 %v307_v28, %v264_v26  ;;  %v308_v36 = vmax.f32 %v304_v30, %v264_v26 }
  0x1c   : > { %v309_v44 = vmax.f32 %v305_v38, %v265_v34  ;;  %v306_v45 = vmax.f32 %v299_v39, %v301_v27 }
  0x1d   : > { %v315_v42 = vmax.f32 %v311_v35, %v268_v21  ;;  %v312_v43 = vmax.f32 %v308_v36, %v265_v34 }
  0x1e   : > { %v313_v51 = vmax.f32 %v309_v44, %v266_v41  ;;  %v310_v52 = vmax.f32 %v306_v45, %v266_v41 }
  0x1f   : > { %v331_v49 = vmax.f32 %v315_v42, %v323_v33  ;;  %v316_v50 = vmax.f32 %v312_v43, %v269_v29 }
  0x20   : > { %v317_v54 = vmax.f32 %v313_v51, %v270_v37  ;;  %v314_v55 = vmax.f32 %v310_v52, %v267_v47 }
  0x21   : > { %454 = vst.msk [vmem:[%s523_s21 + $0x11] sm:$0xf] %vm345_vm1, %v331_v49  ;;  %v332_v53 = vmax.f32 %v316_v50, %v324_v40 }
  0x22   : > { %v333_v57 = vmax.f32 %v317_v54, %v325_v46  ;;  %v318_v58 = vmax.f32 %v314_v55, %v271_v48 }
  0x23   : > { %455 = vst.msk [vmem:[%s523_s21 + $0x19] sm:$0xf] %vm345_vm1, %v332_v53 }
  0x24   : > { %456 = vst.msk [vmem:[%s523_s21 + $0x21] sm:$0xf] %vm345_vm1, %v333_v57  ;;  %v334_v59 = vmax.f32 %v318_v58, %v326_v56 }
  0x26   : > { %457 = vst.msk [vmem:[%s523_s21 + $0x29] sm:$0xf] %vm345_vm1, %v334_v59 }
  0x27 PF: > { %s14_s15 = sadd.s32 1, %s480_s15  }
  0x28   : > { %p11_p4 = scmp.ge.s32.totalorder %s14_s15, 6  }
  0x2a   :  { %13 = sbr.rel (!%p11_p4) target bundleno = 1 (0x1), region = 76 }

// kernel: hlcdnet_forward.29
= control target key start
LH: loop header
LB: loop body
LE: loop exit
PB: predicated region body
PF: predicated region fallthrough
CT: control target
= control target key end

     0   :  { %s1308_s21 = smov 0   ;;  %s1532_s0 = inlined_call_operand.vmem [shape: f32[4,48,64], index: 0, kind: input, shape index: {}]   ;;  %s1533_s1 = inlined_call_operand.vmem [shape: f32[4,48,64], index: 1, kind: input, shape index: {}]   ;;  %s1534_s2 = inlined_call_operand.vmem [shape: bf16[3,3,64,64], index: 2, kind: input, shape index: {}]   ;;  %s1535_s3 = inlined_call_operand.vmem [shape: f32[1,64], index: 3, kind: input, shape index: {}]   ;;  %s1536_s4 = inlined_call_operand.vmem [shape: f32[1,64], index: 4, kind: input, shape index: {}]   ;;  %s1537_s5 = inlined_call_operand.vmem [shape: f32[24,1], index: 5, kind: input, shape index: {}]   ;;  %s1538_s6 = inlined_call_operand.vmem [shape: f32[4,48,64], index: 6, kind: output, shape index: {}]  }
   0x1 LB: > { %s972_s22 = sadd.s32 4294967295, %s1269_s21   ;;  %p976_p0 = scmp.ge.s32.totalorder %s1269_s21, 1  ;;  %s1269_s21 = sphi %s1308_s21, %s16_s21  }
   0x2   : > { %p222_p1 = scmp.lt.s32.totalorder %s1269_s21, 5 }
   0x4   : > { %p223_p2 = pnand %p976_p0, %p222_p1 }
   0x5   : > { %p257_p3 = scmp.lt.s32.totalorder (!%p223_p2), %s972_s22, 3 }
   0x6   : > { %226 = sbr.rel (%p223_p2) target bundleno = 237 (0xed), region = 44 }
   0xb   : > { %v1215_v0 = vld [vmem:[%s1534_s2 + $0x38] sm:$0xff]  ;;  %v1214_v3 = vld [vmem:[%s1534_s2 + $0x30] sm:$0xff]  ;;  %s1540_s22 = smov (!%p257_p3, %s972_s22), 3  ;;  %v1213_v6 = vld [vmem:[%s1534_s2 + $0x28] sm:$0xff]  ;;  %vm324_vm0 = vcmask 523264  }
   0xc   : > { %v1219_v1 = vld [vmem:[%s1534_s2 + $0x58] sm:$0xff]  ;;  %335 = vmatpush.bf16.msra.mxu0 %v1215_v0  ;;  %1244 = vmatpush.bf16.msra.mxu1 %v1215_v0  ;;  %v1218_v4 = vld [vmem:[%s1534_s2 + $0x50] sm:$0xff]  ;;  %s1334_s11 = smul.u32 48, %s1540_s22  ;;  %v1217_v7 = vld [vmem:[%s1534_s2 + $0x48] sm:$0xff] }
   0xd   : > { %v1223_v2 = vld [vmem:[%s1534_s2 + $0x78] sm:$0xff]  ;;  %445 = vmatpush.bf16.msra.mxu2 %v1219_v1  ;;  %v1222_v5 = vld [vmem:[%s1534_s2 + $0x70] sm:$0xff]  ;;  %v1221_v8 = vld [vmem:[%s1534_s2 + $0x68] sm:$0xff] }
   0xe   : > { %510 = vmatpush.bf16.msra.mxu3 %v1223_v2  ;;  %s1349_s20 = scalar_lea.vmem %s1532_s0, %s1334_s11  ;;  %v1212_v9 = vld [vmem:[%s1534_s2 + $0x20] sm:$0xff]  ;;  %v1211_v10 = vld [vmem:[%s1534_s2 + $0x18] sm:$0xff]  ;;  %v1210_v25 = vld [vmem:[%s1534_s2 + $0x10] sm:$0xff]  ;;  %s1494_s18 = scalar_lea.vmem %s1538_s6, %s1334_s11 }
   0xf   : > { %v1216_v11 = vld [vmem:[%s1534_s2 + $0x40] sm:$0xff]  ;;  %v287_v13 = vld [vmem:[%s1349_s20 + $0xe] sm:$0xff]  ;;  %v288_v14 = vld [vmem:[%s1349_s20 + $0x16] sm:$0xff]  ;;  %s1518_s27 = scalar_lea.vmem %s1533_s1, %s1334_s11 }
  0x10   : > { %336 = vmatpush.bf16.msra.mxu0 %v1214_v3  ;;  %1245 = vmatpush.bf16.msra.mxu1 %v1214_v3  ;;  %v286_v12 = vld [vmem:[%s1349_s20 + $0x6] sm:$0xff]  ;;  %v1227_v15 = vld [vmem:[%s1534_s2 + $0x98] sm:$0xff]  ;;  %v398_v17 = vld [vmem:[%s1349_s20 + $0xf] sm:$0xff]  ;;  %v290_v22 = vpack.c.bf16 %v288_v14, %v288_v14 }
  0x11   : > { %446 = vmatpush.bf16.msra.mxu2 %v1218_v4  ;;  %v397_v16 = vld [vmem:[%s1349_s20 + $0x7] sm:$0xff]  ;;  %v1373_v20 = vld [vmem:[%s1349_s20 + $0x13] sm:$0xff]  ;;  %v289_v21 = vpack.c.bf16 %v287_v13, %v286_v12  ;;  %v464_v45 = vld [vmem:[%s1349_s20 + $0x1b] sm:$0xff]  ;;  %v1271_v4 = vmov 0  }
  0x12   : > { %511 = vmatpush.bf16.msra.mxu3 %v1222_v5  ;;  %v1220_v18 = vld [vmem:[%s1534_s2 + $0x60] sm:$0xff]  ;;  %v462_v19 = vld [vmem:[%s1349_s20 + $0xb] sm:$0xff]  ;;  %v400_v23 = vpack.c.bf16 %v398_v17, %v397_v16  ;;  %v1239_v24 = vld [vmem:[%s1534_s2 + $0xf8] sm:$0xff]  ;;  %v466_v51 = vpack.c.bf16 %v464_v45, %v464_v45  ;;  %1259 = vset.pattern.permute.xlu0 %v1271_v4 }
  0x13   : > { %v465_v26 = vpack.c.bf16 %v1373_v20, %v462_v19  ;;  %v1226_v27 = vld [vmem:[%s1534_s2 + $0x90] sm:$0xff]  ;;  %v1235_v28 = vld [vmem:[%s1534_s2 + $0xd8] sm:$0xff]  ;;  %v1209_v30 = vld [vmem:[%s1534_s2 + $0x8] sm:$0xff]  ;;  %1260 = vset.pattern.permute.xlu1 %v1271_v4 }
  0x14   : > { %337 = vmatpush.bf16.msra.mxu0 %v1213_v6  ;;  %1246 = vmatpush.bf16.msra.mxu1 %v1213_v6  ;;  %v1238_v29 = vld [vmem:[%s1534_s2 + $0xf0] sm:$0xff]  ;;  %v1225_v31 = vld [vmem:[%s1534_s2 + $0x88] sm:$0xff]  ;;  %v1208_v34 = vld [vmem:[%s1534_s2] sm:$0xff] }
  0x15   : > { %447 = vmatpush.bf16.msra.mxu2 %v1217_v7  ;;  %v1234_v32 = vld [vmem:[%s1534_s2 + $0xd0] sm:$0xff]  ;;  %v1237_v33 = vld [vmem:[%s1534_s2 + $0xe8] sm:$0xff]  ;;  %v1224_v35 = vld [vmem:[%s1534_s2 + $0x80] sm:$0xff] }
  0x16   : > { %512 = vmatpush.bf16.msra.mxu3 %v1221_v8  ;;  %v273_v36 = vld [vmem:[%s1349_s20 + $0x5] sm:$0xff]  ;;  %v1231_v37 = vld [vmem:[%s1534_s2 + $0xb8] sm:$0xff]  ;;  %v1418_v38 = vld [vmem:[%s1349_s20 + $0xd] sm:$0xff] }
  0x17   : > { %v1243_v39 = vld [vmem:[%s1534_s2 + $0x118] sm:$0xff]  ;;  %v1233_v40 = vld [vmem:[%s1534_s2 + $0xc8] sm:$0xff]  ;;  %v1236_v43 = vld [vmem:[%s1534_s2 + $0xe0] sm:$0xff]  ;;  %v276_v47 = vpack.c.bf16 %v1418_v38, %v273_v36 }
  0x18   : > { %338 = vmatpush.bf16.msra.mxu0 %v1212_v9  ;;  %1247 = vmatpush.bf16.msra.mxu1 %v1212_v9  ;;  %v527_v41 = vld [vmem:[%s1349_s20 + $0xc] sm:$0xff]  ;;  %v528_v42 = vld [vmem:[%s1349_s20 + $0x14] sm:$0xff]  ;;  %v1232_v52 = vld [vmem:[%s1534_s2 + $0xc0] sm:$0xff] }
  0x19   : > { %448 = vmatpush.bf16.msra.mxu2 %v1216_v11  ;;  %v399_v44 = vld [vmem:[%s1349_s20 + $0x17] sm:$0xff]  ;;  %v530_v48 = vpack.c.bf16 %v528_v42, %v527_v41  ;;  %v1229_v53 = vld [vmem:[%s1534_s2 + $0xa8] sm:$0xff]  ;;  %v1228_v55 = vld [vmem:[%s1534_s2 + $0xa0] sm:$0xff] }
  0x1a   : > { %513 = vmatpush.bf16.msra.mxu3 %v1220_v18  ;;  %v1230_v46 = vld [vmem:[%s1534_s2 + $0xb0] sm:$0xff]  ;;  %v401_v49 = vpack.c.bf16 %v399_v44, %v399_v44  ;;  %v1241_v54 = vld [vmem:[%s1534_s2 + $0x108] sm:$0xff]  ;;  %v1240_v56 = vld [vmem:[%s1534_s2 + $0x100] sm:$0xff] }
  0x1b   : > { %1004 = vmatmul.msk.bf16.vlgmr.msra.gmra.mxu0 %vm324_vm0, %v289_v21  ;;  %1005 = vmatmul.msk.bf16.vlgmr.msra.gmra.mxu1 %vm324_vm0, %v290_v22  ;;  %v1242_v50 = vld [vmem:[%s1534_s2 + $0x110] sm:$0xff]  ;;  %v529_v58 = vld [vmem:[%s1349_s20 + $0x1c] sm:$0xff]  ;;  %v876_v6 = vld [vmem:[%s1537_s5 + $0x8] sm:$0xff] }
  0x1c   : > { %383 = vmatpush.bf16.msrb.mxu1 %v1211_v10  ;;  %575 = vmatpush.bf16.msrb.mxu0 %v1227_v15  ;;  %v275_v57 = vld [vmem:[%s1349_s20 + $0x15] sm:$0xff]  ;;  %v531_v0 = vpack.c.bf16 %v529_v58, %v529_v58  ;;  %v875_v3 = vld [vmem:[%s1537_s5] sm:$0xff]  ;;  %v790_v10 = vpack.c.bf16 %v464_v45, %v1373_v20 }
  0x1d   : > { %1048 = vmatmul.msk.bf16.vlgmr.msra.gmra.mxu2 %vm324_vm0, %v400_v23  ;;  %1074 = vmatmul.msk.bf16.vlgmr.msra.gmra.mxu3 %vm324_vm0, %v465_v26  ;;  %v657_v59 = vld [vmem:[%s1349_s20 + $0x11] sm:$0xff]  ;;  %v658_v60 = vld [vmem:[%s1349_s20 + $0x19] sm:$0xff]  ;;  %v277_v63 = vpack.c.bf16 %v275_v57, %v275_v57  ;;  %v659_v7 = vld [vmem:[%s1349_s20 + $0x21] sm:$0xff]  ;;  %v595_v9 = vpack.c.bf16 %v275_v57, %v1418_v38 }
  0x1e   : > { %770 = vmatpush.bf16.msrb.mxu3 %v1239_v24  ;;  %705 = vmatpush.bf16.msrb.mxu2 %v1235_v28  ;;  %v722_v61 = vld [vmem:[%s1349_s20 + $0x12] sm:$0xff]  ;;  %v723_v62 = vld [vmem:[%s1349_s20 + $0x1a] sm:$0xff]  ;;  %v660_v1 = vpack.c.bf16 %v658_v60, %v657_v59  ;;  %v724_v8 = vld [vmem:[%s1349_s20 + $0x22] sm:$0xff]  ;;  %v661_v11 = vpack.c.bf16 %v659_v7, %v659_v7 }
  0x1f   : > { %v725_v2 = vpack.c.bf16 %v723_v62, %v722_v61  ;;  %v877_v5 = vld [vmem:[%s1537_s5 + $0x10] sm:$0xff]  ;;  %880 = vperm.xlu0 %1259, %v875_v3   ;;  %v726_v12 = vpack.c.bf16 %v724_v8, %v724_v8  ;;  %v594_v13 = vld [vmem:[%s1349_s20 + $0x1d] sm:$0xff] }
  0x20   : > { %384 = vmatpush.bf16.msrb.mxu1 %v1210_v25  ;;  %576 = vmatpush.bf16.msrb.mxu0 %v1226_v27  ;;  %v789_v14 = vld [vmem:[%s1349_s20 + $0x23] sm:$0xff]  ;;  %v596_v15 = vpack.c.bf16 %v594_v13, %v594_v13  ;;  %v1262_v59 = vld [vmem:[%s1536_s4] ss:$0 sm:$0xff] }
  0x21   : > { %890 = vperm.xlu1 %1260, %v877_v5   ;;  %v791_v16 = vpack.c.bf16 %v789_v14, %v789_v14 }
  0x22   : > { %771 = vmatpush.bf16.msrb.mxu3 %v1238_v29  ;;  %706 = vmatpush.bf16.msrb.mxu2 %v1234_v32 }
  0x24   : > { %385 = vmatpush.bf16.msrb.mxu1 %v1209_v30  ;;  %577 = vmatpush.bf16.msrb.mxu0 %v1225_v31 }
  0x26   : > { %772 = vmatpush.bf16.msrb.mxu3 %v1237_v33  ;;  %707 = vmatpush.bf16.msrb.mxu2 %v1233_v40 }
  0x27   : > { %885 = vperm.xlu0 %1259, %v876_v6  }
  0x28   : > { %386 = vmatpush.bf16.msrb.mxu1 %v1208_v34  ;;  %578 = vmatpush.bf16.msrb.mxu0 %v1224_v35  ;;  %v1272_v35 = vmov 0.0  }
  0x29   : > { %896 = vst.msk [vmem:[%s1494_s18] sm:$0xff] %vm324_vm0, %v1272_v35 }
  0x2a   : > { %773 = vmatpush.bf16.msrb.mxu3 %v1236_v43  ;;  %708 = vmatpush.bf16.msrb.mxu2 %v1232_v52  ;;  %897 = vst.msk [vmem:[%s1494_s18 + $0x8] sm:$0xff] %vm324_vm0, %v1272_v35 }
  0x2b   : > { %1022 = vmatmul.msk.bf16.vlgmr.msrb.gmra.mxu1 %vm324_vm0, %v276_v47  ;;  %1100 = vmatmul.msk.bf16.vlgmr.msrb.gmra.mxu0 %vm324_vm0, %v530_v48  ;;  %898 = vst.msk [vmem:[%s1494_s18 + $0x10] sm:$0xff] %vm324_vm0, %v1272_v35 }
  0x2c   : > { %640 = vmatpush.bf16.msra.mxu1 %v1231_v37  ;;  %835 = vmatpush.bf16.msra.mxu0 %v1243_v39  ;;  %901 = vst.msk [vmem:[%s1494_s18 + $0x28] sm:$0xff] %vm324_vm0, %v1272_v35 }
  0x2d   : > { %1049 = vmatmul.msk.bf16.gmra.mxu2 %vm324_vm0, %v401_v49  ;;  %1075 = vmatmul.msk.bf16.gmra.mxu3 %vm324_vm0, %v466_v51  ;;  %899 = vst.msk [vmem:[%s1494_s18 + $0x18] sm:$0xff] %vm324_vm0, %v1272_v35 }
  0x2e   : > { %900 = vst.msk [vmem:[%s1494_s18 + $0x20] sm:$0xff] %vm324_vm0, %v1272_v35 }
  0x30   : > { %641 = vmatpush.bf16.msra.mxu1 %v1230_v46  ;;  %836 = vmatpush.bf16.msra.mxu0 %v1242_v50 }
  0x34   : > { %642 = vmatpush.bf16.msra.mxu1 %v1229_v53  ;;  %837 = vmatpush.bf16.msra.mxu0 %v1241_v54 }
  0x38   : > { %643 = vmatpush.bf16.msra.mxu1 %v1228_v55  ;;  %838 = vmatpush.bf16.msra.mxu0 %v1240_v56  ;;  %v1261_v55 = vld [vmem:[%s1535_s3] ss:$0 sm:$0xff] }
  0x3b   : > { %1023 = vmatmul.msk.bf16.gmra.mxu1 %vm324_vm0, %v277_v63  ;;  %1101 = vmatmul.msk.bf16.gmra.mxu0 %vm324_vm0, %v531_v0 }
  0x3d   : > { %1152 = vmatmul.msk.bf16.vlgmr.msrb.gmra.mxu2 %vm324_vm0, %v660_v1  ;;  %1178 = vmatmul.msk.bf16.vlgmr.msrb.gmra.mxu3 %vm324_vm0, %v725_v2  ;;  %v866_v2 = vld [vmem:[%s1518_s27 + $0xc] sm:$0xff] }
  0x4b   : > { %1126 = vmatmul.msk.bf16.vlgmr.msra.gmra.mxu1 %vm324_vm0, %v595_v9  ;;  %1204 = vmatmul.msk.bf16.vlgmr.msra.gmra.mxu0 %vm324_vm0, %v790_v10 }
  0x4d   : > { %1153 = vmatmul.msk.bf16.gmra.mxu2 %vm324_vm0, %v661_v11  ;;  %1179 = vmatmul.msk.bf16.gmra.mxu3 %vm324_vm0, %v726_v12 }
  0x5b   : > { %1127 = vmatmul.msk.bf16.gmra.mxu1 %vm324_vm0, %v596_v15  ;;  %1205 = vmatmul.msk.bf16.gmra.mxu0 %vm324_vm0, %v791_v16 }
  0x91   : > { %v881_v6 = vpop.permute.xlu0 %880 }
  0x98   : > { %v340_v17 = vpop.f32.mrf.mxu0  ;;  %v345_v18 = vpop.f32.mrf.mxu1 }
  0xa0   : > { %v450_v19 = vpop.f32.mrf.mxu2  ;;  %v342_v20 = vpop.f32.mrf.mxu0 }
  0xa1   : > { %v347_v21 = vpop.f32.mrf.mxu1  ;;  %v515_v22 = vpop.f32.mrf.mxu3 }
  0xa8   : > { %v452_v23 = vpop.f32.mrf.mxu2  ;;  %v580_v25 = vpop.f32.mrf.mxu0 }
  0xa9   : > { %v388_v24 = vpop.f32.mrf.mxu1  ;;  %v517_v26 = vpop.f32.mrf.mxu3 }
  0xaa   : > { %v389_v36 = vadd.f32 %v388_v24, %v340_v17  ;;  %v886_v24 = vpop.permute.xlu0 %885 }
  0xac   : > { %v459_v37 = vadd.f32 %v450_v19, %v389_v36  ;;  %v867_v19 = vld [vmem:[%s1518_s27 + $0x14] sm:$0xff] }
  0xae   : > { %v524_v42 = vadd.f32 %v515_v22, %v459_v37 }
  0xb0   : > { %v455_v27 = vpop.f32.mrf.mxu2  ;;  %v582_v29 = vpop.f32.mrf.mxu0  ;;  %v589_v44 = vadd.f32 %v580_v25, %v524_v42 }
  0xb1   : > { %v390_v28 = vpop.f32.mrf.mxu1  ;;  %v520_v30 = vpop.f32.mrf.mxu3 }
  0xb2   : > { %v391_v43 = vadd.f32 %v390_v28, %v342_v20 }
  0xb4   : > { %v460_v45 = vadd.f32 %v452_v23, %v391_v43 }
  0xb6   : > { %v525_v51 = vadd.f32 %v517_v26, %v460_v45 }
  0xb8   : > { %v457_v31 = vpop.f32.mrf.mxu2  ;;  %v585_v33 = vpop.f32.mrf.mxu0  ;;  %v590_v56 = vadd.f32 %v582_v29, %v525_v51 }
  0xb9   : > { %v393_v32 = vpop.f32.mrf.mxu1  ;;  %v522_v34 = vpop.f32.mrf.mxu3  ;;  %v868_v31 = vld [vmem:[%s1518_s27 + $0x1c] sm:$0xff] }
  0xba   : > { %v394_v52 = vadd.f32 %v393_v32, %v345_v18  ;;  %v891_v34 = vpop.permute.xlu1 %890 }
  0xbc   : > { %v461_v57 = vadd.f32 %v455_v27, %v394_v52 }
  0xbe   : > { %v526_v3 = vadd.f32 %v520_v30, %v461_v57 }
  0xc0   : > { %v710_v38 = vpop.f32.mrf.mxu2  ;;  %v587_v40 = vpop.f32.mrf.mxu0  ;;  %v591_v9 = vadd.f32 %v585_v33, %v526_v3 }
  0xc1   : > { %v395_v39 = vpop.f32.mrf.mxu1  ;;  %v775_v41 = vpop.f32.mrf.mxu3 }
  0xc8   : > { %v712_v46 = vpop.f32.mrf.mxu2  ;;  %v840_v48 = vpop.f32.mrf.mxu0 }
  0xc9   : > { %v645_v47 = vpop.f32.mrf.mxu1  ;;  %v777_v50 = vpop.f32.mrf.mxu3 }
  0xca   : > { %v654_v49 = vadd.f32 %v645_v47, %v589_v44 }
  0xcc   : > { %v719_v53 = vadd.f32 %v710_v38, %v654_v49 }
  0xce   : > { %v784_v54 = vadd.f32 %v775_v41, %v719_v53 }
  0xd0   : > { %v849_v58 = vadd.f32 %v840_v48, %v784_v54  ;;  %v715_v60 = vpop.f32.mrf.mxu2  ;;  %v842_v62 = vpop.f32.mrf.mxu0 }
  0xd1   : > { %v647_v61 = vpop.f32.mrf.mxu1  ;;  %v780_v1 = vpop.f32.mrf.mxu3 }
  0xd2   : > { %v856_v63 = vmul.f32 %v1261_v55, %v849_v58  ;;  %v655_v0 = vadd.f32 %v647_v61, %v590_v56 }
  0xd4   : > { %v863_v4 = vadd.f32 %v1262_v59, %v856_v63  ;;  %v720_v5 = vadd.f32 %v712_v46, %v655_v0 }
  0xd6   : > { %v785_v7 = vadd.f32 %v777_v50, %v720_v5  ;;  %v869_v8 = vadd.f32 %v866_v2, %v863_v4 }
  0xd8   : > { %v850_v10 = vadd.f32 %v842_v62, %v785_v7  ;;  %v872_v11 = vmax.f32 %v869_v8, 0.0  ;;  %v717_v12 = vpop.f32.mrf.mxu2  ;;  %v845_v14 = vpop.f32.mrf.mxu0 }
  0xd9   : > { %v650_v13 = vpop.f32.mrf.mxu1  ;;  %v782_v18 = vpop.f32.mrf.mxu3 }
  0xda   : > { %v857_v15 = vmul.f32 %v1261_v55, %v850_v10  ;;  %v893_v16 = vmul.f32 %v881_v6, %v872_v11  ;;  %v656_v17 = vadd.f32 %v650_v13, %v591_v9 }
  0xdc   : > { %v864_v20 = vadd.f32 %v1262_v59, %v857_v15  ;;  %902 = vst.msk [vmem:[%s1494_s18 + $0xc] sm:$0xff] %vm324_vm0, %v893_v16  ;;  %v721_v21 = vadd.f32 %v715_v60, %v656_v17 }
  0xde   : > { %v786_v22 = vadd.f32 %v780_v1, %v721_v21  ;;  %v870_v23 = vadd.f32 %v867_v19, %v864_v20 }
  0xe0   : > { %v851_v25 = vadd.f32 %v845_v14, %v786_v22  ;;  %v873_v26 = vmax.f32 %v870_v23, 0.0  ;;  %v847_v28 = vpop.f32.mrf.mxu0 }
  0xe1   : > { %v652_v27 = vpop.f32.mrf.mxu1 }
  0xe2   : > { %v858_v29 = vmul.f32 %v1261_v55, %v851_v25  ;;  %v894_v30 = vmul.f32 %v886_v24, %v873_v26 }
  0xe4   : > { %v865_v32 = vadd.f32 %v1262_v59, %v858_v29  ;;  %903 = vst.msk [vmem:[%s1494_s18 + $0x14] sm:$0xff] %vm324_vm0, %v894_v30 }
  0xe6   : > { %v871_v33 = vadd.f32 %v868_v31, %v865_v32 }
  0xe8   : > { %v874_v35 = vmax.f32 %v871_v33, 0.0 }
  0xea   : > { %v895_v36 = vmul.f32 %v891_v34, %v874_v35 }
  0xec   : > { %904 = vst.msk [vmem:[%s1494_s18 + $0x1c] sm:$0xff] %vm324_vm0, %v895_v36 }
  0xed PF: > { %s16_s21 = sadd.s32 1, %s1269_s21  }
  0xee   : > { %p13_p4 = scmp.ge.s32.totalorder %s16_s21, 6  }
  0xf0   :  { %15 = sbr.rel (!%p13_p4) target bundleno = 1 (0x1), region = 85 }

// kernel: hlcdnet_forward.28
= control target key start
LH: loop header
LB: loop body
LE: loop exit
PB: predicated region body
PF: predicated region fallthrough
CT: control target
= control target key end

     0   :  { %s1237_s18 = smov 0   ;;  %s1455_s0 = inlined_call_operand.vmem [shape: f32[4,48,64], index: 0, kind: input, shape index: {}]   ;;  %s1456_s1 = inlined_call_operand.vmem [shape: bf16[3,3,64,64], index: 1, kind: input, shape index: {}]   ;;  %s1457_s2 = inlined_call_operand.vmem [shape: f32[1,64], index: 2, kind: input, shape index: {}]   ;;  %s1458_s3 = inlined_call_operand.vmem [shape: f32[1,64], index: 3, kind: input, shape index: {}]   ;;  %s1459_s4 = inlined_call_operand.vmem [shape: f32[24,1], index: 4, kind: input, shape index: {}]   ;;  %s1460_s5 = inlined_call_operand.vmem [shape: f32[4,48,64], index: 5, kind: output, shape index: {}]  }
   0x1 LB: > { %s907_s19 = sadd.s32 4294967295, %s1203_s18   ;;  %p911_p0 = scmp.ge.s32.totalorder %s1203_s18, 1  ;;  %s1203_s18 = sphi %s1237_s18, %s15_s18  }
   0x2   : > { %p187_p1 = scmp.lt.s32.totalorder %s1203_s18, 5 }
   0x4   : > { %p188_p2 = pnand %p911_p0, %p187_p1 }
   0x5   : > { %p215_p3 = scmp.lt.s32.totalorder (!%p188_p2), %s907_s19, 3 }
   0x6   : > { %191 = sbr.rel (%p188_p2) target bundleno = 235 (0xeb), region = 40 }
   0xb   : > { %v1149_v0 = vld [vmem:[%s1456_s1 + $0x38] sm:$0xff]  ;;  %v1148_v3 = vld [vmem:[%s1456_s1 + $0x30] sm:$0xff]  ;;  %s1462_s19 = smov (!%p215_p3, %s907_s19), 3  ;;  %v1147_v6 = vld [vmem:[%s1456_s1 + $0x28] sm:$0xff]  ;;  %vm277_vm0 = vcmask 523264  }
   0xc   : > { %v1153_v1 = vld [vmem:[%s1456_s1 + $0x58] sm:$0xff]  ;;  %288 = vmatpush.bf16.msra.mxu0 %v1149_v0  ;;  %1178 = vmatpush.bf16.msra.mxu1 %v1149_v0  ;;  %v1152_v4 = vld [vmem:[%s1456_s1 + $0x50] sm:$0xff]  ;;  %s1182_s7 = smul.u32 48, %s1462_s19  ;;  %v1151_v7 = vld [vmem:[%s1456_s1 + $0x48] sm:$0xff] }
   0xd   : > { %v1157_v2 = vld [vmem:[%s1456_s1 + $0x78] sm:$0xff]  ;;  %398 = vmatpush.bf16.msra.mxu2 %v1153_v1  ;;  %v1156_v5 = vld [vmem:[%s1456_s1 + $0x70] sm:$0xff]  ;;  %v1155_v8 = vld [vmem:[%s1456_s1 + $0x68] sm:$0xff] }
   0xe   : > { %463 = vmatpush.bf16.msra.mxu3 %v1157_v2  ;;  %s1280_s16 = scalar_lea.vmem %s1455_s0, %s1182_s7  ;;  %v1146_v9 = vld [vmem:[%s1456_s1 + $0x20] sm:$0xff]  ;;  %v1145_v10 = vld [vmem:[%s1456_s1 + $0x18] sm:$0xff]  ;;  %v1144_v25 = vld [vmem:[%s1456_s1 + $0x10] sm:$0xff]  ;;  %s1426_s14 = scalar_lea.vmem %s1460_s5, %s1182_s7 }
   0xf   : > { %v1150_v11 = vld [vmem:[%s1456_s1 + $0x40] sm:$0xff]  ;;  %v240_v13 = vld [vmem:[%s1280_s16 + $0xe] sm:$0xff]  ;;  %v241_v14 = vld [vmem:[%s1280_s16 + $0x16] sm:$0xff] }
  0x10   : > { %289 = vmatpush.bf16.msra.mxu0 %v1148_v3  ;;  %1179 = vmatpush.bf16.msra.mxu1 %v1148_v3  ;;  %v239_v12 = vld [vmem:[%s1280_s16 + $0x6] sm:$0xff]  ;;  %v1161_v15 = vld [vmem:[%s1456_s1 + $0x98] sm:$0xff]  ;;  %v351_v17 = vld [vmem:[%s1280_s16 + $0xf] sm:$0xff]  ;;  %v243_v22 = vpack.c.bf16 %v241_v14, %v241_v14 }
  0x11   : > { %399 = vmatpush.bf16.msra.mxu2 %v1152_v4  ;;  %v350_v16 = vld [vmem:[%s1280_s16 + $0x7] sm:$0xff]  ;;  %v1304_v20 = vld [vmem:[%s1280_s16 + $0x13] sm:$0xff]  ;;  %v242_v21 = vpack.c.bf16 %v240_v13, %v239_v12  ;;  %v417_v45 = vld [vmem:[%s1280_s16 + $0x1b] sm:$0xff]  ;;  %v1205_v4 = vmov 0  }
  0x12   : > { %464 = vmatpush.bf16.msra.mxu3 %v1156_v5  ;;  %v1154_v18 = vld [vmem:[%s1456_s1 + $0x60] sm:$0xff]  ;;  %v415_v19 = vld [vmem:[%s1280_s16 + $0xb] sm:$0xff]  ;;  %v353_v23 = vpack.c.bf16 %v351_v17, %v350_v16  ;;  %v1173_v24 = vld [vmem:[%s1456_s1 + $0xf8] sm:$0xff]  ;;  %v419_v51 = vpack.c.bf16 %v417_v45, %v417_v45  ;;  %1193 = vset.pattern.permute.xlu0 %v1205_v4 }
  0x13   : > { %v418_v26 = vpack.c.bf16 %v1304_v20, %v415_v19  ;;  %v1160_v27 = vld [vmem:[%s1456_s1 + $0x90] sm:$0xff]  ;;  %v1169_v28 = vld [vmem:[%s1456_s1 + $0xd8] sm:$0xff]  ;;  %v1143_v30 = vld [vmem:[%s1456_s1 + $0x8] sm:$0xff]  ;;  %1194 = vset.pattern.permute.xlu1 %v1205_v4 }
  0x14   : > { %290 = vmatpush.bf16.msra.mxu0 %v1147_v6  ;;  %1180 = vmatpush.bf16.msra.mxu1 %v1147_v6  ;;  %v1172_v29 = vld [vmem:[%s1456_s1 + $0xf0] sm:$0xff]  ;;  %v1159_v31 = vld [vmem:[%s1456_s1 + $0x88] sm:$0xff]  ;;  %v1142_v34 = vld [vmem:[%s1456_s1] sm:$0xff] }
  0x15   : > { %400 = vmatpush.bf16.msra.mxu2 %v1151_v7  ;;  %v1168_v32 = vld [vmem:[%s1456_s1 + $0xd0] sm:$0xff]  ;;  %v1171_v33 = vld [vmem:[%s1456_s1 + $0xe8] sm:$0xff]  ;;  %v1158_v35 = vld [vmem:[%s1456_s1 + $0x80] sm:$0xff] }
  0x16   : > { %465 = vmatpush.bf16.msra.mxu3 %v1155_v8  ;;  %v226_v36 = vld [vmem:[%s1280_s16 + $0x5] sm:$0xff]  ;;  %v1165_v37 = vld [vmem:[%s1456_s1 + $0xb8] sm:$0xff]  ;;  %v1349_v38 = vld [vmem:[%s1280_s16 + $0xd] sm:$0xff] }
  0x17   : > { %v1177_v39 = vld [vmem:[%s1456_s1 + $0x118] sm:$0xff]  ;;  %v1167_v40 = vld [vmem:[%s1456_s1 + $0xc8] sm:$0xff]  ;;  %v1170_v43 = vld [vmem:[%s1456_s1 + $0xe0] sm:$0xff]  ;;  %v229_v47 = vpack.c.bf16 %v1349_v38, %v226_v36 }
  0x18   : > { %291 = vmatpush.bf16.msra.mxu0 %v1146_v9  ;;  %1181 = vmatpush.bf16.msra.mxu1 %v1146_v9  ;;  %v480_v41 = vld [vmem:[%s1280_s16 + $0xc] sm:$0xff]  ;;  %v481_v42 = vld [vmem:[%s1280_s16 + $0x14] sm:$0xff]  ;;  %v1166_v52 = vld [vmem:[%s1456_s1 + $0xc0] sm:$0xff] }
  0x19   : > { %401 = vmatpush.bf16.msra.mxu2 %v1150_v11  ;;  %v352_v44 = vld [vmem:[%s1280_s16 + $0x17] sm:$0xff]  ;;  %v483_v48 = vpack.c.bf16 %v481_v42, %v480_v41  ;;  %v1163_v53 = vld [vmem:[%s1456_s1 + $0xa8] sm:$0xff]  ;;  %v1162_v55 = vld [vmem:[%s1456_s1 + $0xa0] sm:$0xff] }
  0x1a   : > { %466 = vmatpush.bf16.msra.mxu3 %v1154_v18  ;;  %v1164_v46 = vld [vmem:[%s1456_s1 + $0xb0] sm:$0xff]  ;;  %v354_v49 = vpack.c.bf16 %v352_v44, %v352_v44  ;;  %v1175_v54 = vld [vmem:[%s1456_s1 + $0x108] sm:$0xff]  ;;  %v1174_v56 = vld [vmem:[%s1456_s1 + $0x100] sm:$0xff] }
  0x1b   : > { %938 = vmatmul.msk.bf16.vlgmr.msra.gmra.mxu0 %vm277_vm0, %v242_v21  ;;  %939 = vmatmul.msk.bf16.vlgmr.msra.gmra.mxu1 %vm277_vm0, %v243_v22  ;;  %v1176_v50 = vld [vmem:[%s1456_s1 + $0x110] sm:$0xff]  ;;  %v482_v58 = vld [vmem:[%s1280_s16 + $0x1c] sm:$0xff]  ;;  %v823_v6 = vld [vmem:[%s1459_s4 + $0x8] sm:$0xff] }
  0x1c   : > { %336 = vmatpush.bf16.msrb.mxu1 %v1145_v10  ;;  %528 = vmatpush.bf16.msrb.mxu0 %v1161_v15  ;;  %v228_v57 = vld [vmem:[%s1280_s16 + $0x15] sm:$0xff]  ;;  %v484_v0 = vpack.c.bf16 %v482_v58, %v482_v58  ;;  %v822_v3 = vld [vmem:[%s1459_s4] sm:$0xff]  ;;  %v743_v10 = vpack.c.bf16 %v417_v45, %v1304_v20 }
  0x1d   : > { %982 = vmatmul.msk.bf16.vlgmr.msra.gmra.mxu2 %vm277_vm0, %v353_v23  ;;  %1008 = vmatmul.msk.bf16.vlgmr.msra.gmra.mxu3 %vm277_vm0, %v418_v26  ;;  %v610_v59 = vld [vmem:[%s1280_s16 + $0x11] sm:$0xff]  ;;  %v611_v60 = vld [vmem:[%s1280_s16 + $0x19] sm:$0xff]  ;;  %v230_v63 = vpack.c.bf16 %v228_v57, %v228_v57  ;;  %v612_v7 = vld [vmem:[%s1280_s16 + $0x21] sm:$0xff]  ;;  %v548_v9 = vpack.c.bf16 %v228_v57, %v1349_v38 }
  0x1e   : > { %723 = vmatpush.bf16.msrb.mxu3 %v1173_v24  ;;  %658 = vmatpush.bf16.msrb.mxu2 %v1169_v28  ;;  %v675_v61 = vld [vmem:[%s1280_s16 + $0x12] sm:$0xff]  ;;  %v676_v62 = vld [vmem:[%s1280_s16 + $0x1a] sm:$0xff]  ;;  %v613_v1 = vpack.c.bf16 %v611_v60, %v610_v59  ;;  %v677_v8 = vld [vmem:[%s1280_s16 + $0x22] sm:$0xff]  ;;  %v614_v11 = vpack.c.bf16 %v612_v7, %v612_v7 }
  0x1f   : > { %v678_v2 = vpack.c.bf16 %v676_v62, %v675_v61  ;;  %v824_v5 = vld [vmem:[%s1459_s4 + $0x10] sm:$0xff]  ;;  %827 = vperm.xlu0 %1193, %v822_v3   ;;  %v679_v12 = vpack.c.bf16 %v677_v8, %v677_v8  ;;  %v547_v13 = vld [vmem:[%s1280_s16 + $0x1d] sm:$0xff] }
  0x20   : > { %337 = vmatpush.bf16.msrb.mxu1 %v1144_v25  ;;  %529 = vmatpush.bf16.msrb.mxu0 %v1160_v27  ;;  %v742_v14 = vld [vmem:[%s1280_s16 + $0x23] sm:$0xff]  ;;  %v549_v15 = vpack.c.bf16 %v547_v13, %v547_v13  ;;  %v1196_v60 = vld [vmem:[%s1458_s3] ss:$0 sm:$0xff] }
  0x21   : > { %837 = vperm.xlu1 %1194, %v824_v5   ;;  %v744_v16 = vpack.c.bf16 %v742_v14, %v742_v14 }
  0x22   : > { %724 = vmatpush.bf16.msrb.mxu3 %v1172_v29  ;;  %659 = vmatpush.bf16.msrb.mxu2 %v1168_v32 }
  0x24   : > { %338 = vmatpush.bf16.msrb.mxu1 %v1143_v30  ;;  %530 = vmatpush.bf16.msrb.mxu0 %v1159_v31 }
  0x26   : > { %725 = vmatpush.bf16.msrb.mxu3 %v1171_v33  ;;  %660 = vmatpush.bf16.msrb.mxu2 %v1167_v40 }
  0x27   : > { %832 = vperm.xlu0 %1193, %v823_v6  }
  0x28   : > { %339 = vmatpush.bf16.msrb.mxu1 %v1142_v34  ;;  %531 = vmatpush.bf16.msrb.mxu0 %v1158_v35  ;;  %v1206_v34 = vmov 0.0  }
  0x29   : > { %843 = vst.msk [vmem:[%s1426_s14] sm:$0xff] %vm277_vm0, %v1206_v34 }
  0x2a   : > { %726 = vmatpush.bf16.msrb.mxu3 %v1170_v43  ;;  %661 = vmatpush.bf16.msrb.mxu2 %v1166_v52  ;;  %844 = vst.msk [vmem:[%s1426_s14 + $0x8] sm:$0xff] %vm277_vm0, %v1206_v34 }
  0x2b   : > { %956 = vmatmul.msk.bf16.vlgmr.msrb.gmra.mxu1 %vm277_vm0, %v229_v47  ;;  %1034 = vmatmul.msk.bf16.vlgmr.msrb.gmra.mxu0 %vm277_vm0, %v483_v48  ;;  %845 = vst.msk [vmem:[%s1426_s14 + $0x10] sm:$0xff] %vm277_vm0, %v1206_v34 }
  0x2c   : > { %593 = vmatpush.bf16.msra.mxu1 %v1165_v37  ;;  %788 = vmatpush.bf16.msra.mxu0 %v1177_v39  ;;  %848 = vst.msk [vmem:[%s1426_s14 + $0x28] sm:$0xff] %vm277_vm0, %v1206_v34 }
  0x2d   : > { %983 = vmatmul.msk.bf16.gmra.mxu2 %vm277_vm0, %v354_v49  ;;  %1009 = vmatmul.msk.bf16.gmra.mxu3 %vm277_vm0, %v419_v51  ;;  %846 = vst.msk [vmem:[%s1426_s14 + $0x18] sm:$0xff] %vm277_vm0, %v1206_v34 }
  0x2e   : > { %847 = vst.msk [vmem:[%s1426_s14 + $0x20] sm:$0xff] %vm277_vm0, %v1206_v34 }
  0x30   : > { %594 = vmatpush.bf16.msra.mxu1 %v1164_v46  ;;  %789 = vmatpush.bf16.msra.mxu0 %v1176_v50 }
  0x34   : > { %595 = vmatpush.bf16.msra.mxu1 %v1163_v53  ;;  %790 = vmatpush.bf16.msra.mxu0 %v1175_v54 }
  0x38   : > { %596 = vmatpush.bf16.msra.mxu1 %v1162_v55  ;;  %791 = vmatpush.bf16.msra.mxu0 %v1174_v56  ;;  %v1195_v55 = vld [vmem:[%s1457_s2] ss:$0 sm:$0xff] }
  0x3b   : > { %957 = vmatmul.msk.bf16.gmra.mxu1 %vm277_vm0, %v230_v63  ;;  %1035 = vmatmul.msk.bf16.gmra.mxu0 %vm277_vm0, %v484_v0 }
  0x3d   : > { %1086 = vmatmul.msk.bf16.vlgmr.msrb.gmra.mxu2 %vm277_vm0, %v613_v1  ;;  %1112 = vmatmul.msk.bf16.vlgmr.msrb.gmra.mxu3 %vm277_vm0, %v678_v2 }
  0x4b   : > { %1060 = vmatmul.msk.bf16.vlgmr.msra.gmra.mxu1 %vm277_vm0, %v548_v9  ;;  %1138 = vmatmul.msk.bf16.vlgmr.msra.gmra.mxu0 %vm277_vm0, %v743_v10 }
  0x4d   : > { %1087 = vmatmul.msk.bf16.gmra.mxu2 %vm277_vm0, %v614_v11  ;;  %1113 = vmatmul.msk.bf16.gmra.mxu3 %vm277_vm0, %v679_v12 }
  0x5b   : > { %1061 = vmatmul.msk.bf16.gmra.mxu1 %vm277_vm0, %v549_v15  ;;  %1139 = vmatmul.msk.bf16.gmra.mxu0 %vm277_vm0, %v744_v16 }
  0x91   : > { %v828_v2 = vpop.permute.xlu0 %827 }
  0x98   : > { %v293_v17 = vpop.f32.mrf.mxu0  ;;  %v298_v18 = vpop.f32.mrf.mxu1 }
  0xa0   : > { %v403_v19 = vpop.f32.mrf.mxu2  ;;  %v295_v20 = vpop.f32.mrf.mxu0 }
  0xa1   : > { %v300_v21 = vpop.f32.mrf.mxu1  ;;  %v468_v22 = vpop.f32.mrf.mxu3 }
  0xa8   : > { %v405_v23 = vpop.f32.mrf.mxu2  ;;  %v533_v25 = vpop.f32.mrf.mxu0 }
  0xa9   : > { %v341_v24 = vpop.f32.mrf.mxu1  ;;  %v470_v26 = vpop.f32.mrf.mxu3 }
  0xaa   : > { %v342_v36 = vadd.f32 %v341_v24, %v293_v17 }
  0xac   : > { %v412_v37 = vadd.f32 %v403_v19, %v342_v36  ;;  %v833_v19 = vpop.permute.xlu0 %832 }
  0xae   : > { %v477_v42 = vadd.f32 %v468_v22, %v412_v37 }
  0xb0   : > { %v408_v27 = vpop.f32.mrf.mxu2  ;;  %v535_v29 = vpop.f32.mrf.mxu0  ;;  %v542_v44 = vadd.f32 %v533_v25, %v477_v42 }
  0xb1   : > { %v343_v28 = vpop.f32.mrf.mxu1  ;;  %v473_v30 = vpop.f32.mrf.mxu3 }
  0xb2   : > { %v344_v43 = vadd.f32 %v343_v28, %v295_v20  ;;  %v838_v28 = vpop.permute.xlu1 %837 }
  0xb4   : > { %v413_v45 = vadd.f32 %v405_v23, %v344_v43 }
  0xb6   : > { %v478_v51 = vadd.f32 %v470_v26, %v413_v45 }
  0xb8   : > { %v410_v31 = vpop.f32.mrf.mxu2  ;;  %v538_v33 = vpop.f32.mrf.mxu0  ;;  %v543_v56 = vadd.f32 %v535_v29, %v478_v51 }
  0xb9   : > { %v346_v32 = vpop.f32.mrf.mxu1  ;;  %v475_v35 = vpop.f32.mrf.mxu3 }
  0xba   : > { %v347_v52 = vadd.f32 %v346_v32, %v298_v18 }
  0xbc   : > { %v414_v57 = vadd.f32 %v408_v27, %v347_v52 }
  0xbe   : > { %v479_v3 = vadd.f32 %v473_v30, %v414_v57 }
  0xc0   : > { %v663_v38 = vpop.f32.mrf.mxu2  ;;  %v540_v40 = vpop.f32.mrf.mxu0  ;;  %v544_v8 = vadd.f32 %v538_v33, %v479_v3 }
  0xc1   : > { %v348_v39 = vpop.f32.mrf.mxu1  ;;  %v728_v41 = vpop.f32.mrf.mxu3 }
  0xc8   : > { %v665_v46 = vpop.f32.mrf.mxu2  ;;  %v793_v48 = vpop.f32.mrf.mxu0 }
  0xc9   : > { %v598_v47 = vpop.f32.mrf.mxu1  ;;  %v730_v50 = vpop.f32.mrf.mxu3 }
  0xca   : > { %v607_v49 = vadd.f32 %v598_v47, %v542_v44 }
  0xcc   : > { %v672_v53 = vadd.f32 %v663_v38, %v607_v49 }
  0xce   : > { %v737_v54 = vadd.f32 %v728_v41, %v672_v53 }
  0xd0   : > { %v802_v58 = vadd.f32 %v793_v48, %v737_v54  ;;  %v668_v59 = vpop.f32.mrf.mxu2  ;;  %v795_v62 = vpop.f32.mrf.mxu0 }
  0xd1   : > { %v600_v61 = vpop.f32.mrf.mxu1  ;;  %v733_v1 = vpop.f32.mrf.mxu3 }
  0xd2   : > { %v809_v63 = vmul.f32 %v1195_v55, %v802_v58  ;;  %v608_v0 = vadd.f32 %v600_v61, %v543_v56 }
  0xd4   : > { %v673_v4 = vadd.f32 %v665_v46, %v608_v0  ;;  %v816_v5 = vadd.f32 %v1196_v60, %v809_v63 }
  0xd6   : > { %v738_v6 = vadd.f32 %v730_v50, %v673_v4  ;;  %v819_v7 = vmax.f32 %v816_v5, 0.0 }
  0xd8   : > { %v803_v9 = vadd.f32 %v795_v62, %v738_v6  ;;  %v840_v10 = vmul.f32 %v828_v2, %v819_v7  ;;  %v670_v11 = vpop.f32.mrf.mxu2  ;;  %v798_v13 = vpop.f32.mrf.mxu0 }
  0xd9   : > { %v603_v12 = vpop.f32.mrf.mxu1  ;;  %v735_v16 = vpop.f32.mrf.mxu3 }
  0xda   : > { %v810_v14 = vmul.f32 %v1195_v55, %v803_v9  ;;  %849 = vst.msk [vmem:[%s1426_s14 + $0xc] sm:$0xff] %vm277_vm0, %v840_v10  ;;  %v609_v15 = vadd.f32 %v603_v12, %v544_v8 }
  0xdc   : > { %v674_v17 = vadd.f32 %v668_v59, %v609_v15  ;;  %v817_v18 = vadd.f32 %v1196_v60, %v810_v14 }
  0xde   : > { %v739_v20 = vadd.f32 %v733_v1, %v674_v17  ;;  %v820_v21 = vmax.f32 %v817_v18, 0.0 }
  0xe0   : > { %v804_v22 = vadd.f32 %v798_v13, %v739_v20  ;;  %v841_v23 = vmul.f32 %v833_v19, %v820_v21  ;;  %v800_v25 = vpop.f32.mrf.mxu0 }
  0xe1   : > { %v605_v24 = vpop.f32.mrf.mxu1 }
  0xe2   : > { %v811_v26 = vmul.f32 %v1195_v55, %v804_v22  ;;  %850 = vst.msk [vmem:[%s1426_s14 + $0x14] sm:$0xff] %vm277_vm0, %v841_v23 }
  0xe4   : > { %v818_v27 = vadd.f32 %v1196_v60, %v811_v26 }
  0xe6   : > { %v821_v29 = vmax.f32 %v818_v27, 0.0 }
  0xe8   : > { %v842_v30 = vmul.f32 %v838_v28, %v821_v29 }
  0xea   : > { %851 = vst.msk [vmem:[%s1426_s14 + $0x1c] sm:$0xff] %vm277_vm0, %v842_v30 }
  0xeb PF: > { %s15_s18 = sadd.s32 1, %s1203_s18  }
  0xec   : > { %p12_p4 = scmp.ge.s32.totalorder %s15_s18, 6  }
  0xee   :  { %14 = sbr.rel (!%p12_p4) target bundleno = 1 (0x1), region = 78 }

</bundles_post_ra>
